<compile_context>
chip_gen: v7x
topology: tpu7x:2x2x1
jax: 0.10.0
libtpu: 0.0.40
codegen_flags: <defaults>
</compile_context>

<pallas_src>
import functools

import jax
import jax.numpy as jnp
from jax.experimental import pallas as pl
from jax.experimental.pallas import tpu as pltpu

_PW = 8  # sublane-aligned column padding of the image (>= 1 needed for 3x3 conv)


def _round_up(x, m):
    return ((x + m - 1) // m) * m


def _pick_row_tile(H):
    """Pick a row tile TH dividing H; target ~8-32 rows per step."""
    if H <= 4:
        return H
    target = 16 if H > 32 else max(H // 2, 1)
    th = min(H, target)
    while H % th:
        th -= 1
    return th


def _fourier_block_kernel(x_ref, w_all_ref, b_all_ref, w3_ref, b3_ref, o_ref,
                          slab_ref, xpad2_ref, *, TH, W, Cp):
    h = pl.program_id(1)
    row0 = h * TH                       # top of this tile's window in the padded image
    Wp = W + 2 * _PW

    # ---- pass 1: im2col slab over TH+2 output rows (1-row halo for x3m) -----
    # One aligned full-width band load per dy; the dx=-1/0/+1 windows are
    # slices of the in-register band (aligned load + sublane shifts).
    for dy in range(3):
        band = x_ref[pl.ds(row0 + dy, TH + 2), :, :]           # (TH+2, Wp, Cp) bf16
        for dx in range(3):
            k = dy * 3 + dx
            c0 = _PW - 1 + dx
            slab_ref[:, :, k * Cp:(k + 1) * Cp] = band[:, c0:c0 + W, :]

    slab = slab_ref[...].reshape((TH + 2) * W, 9 * Cp)

    # conv1 (center tap) + conv2 + conv3, BN-folded, in ONE MXU matmul
    pre = jnp.dot(slab, w_all_ref[...], preferred_element_type=jnp.float32)
    pre = (pre + b_all_ref[...]).reshape(TH + 2, W, 3 * Cp)

    # direct per-branch channel stores (no concat); x1/x2 only need the TH
    # interior rows, x3m needs all TH+2 rows as the halo for the second conv.
    o_ref[:, :, 0:Cp] = pre[1:TH + 1, :, 0:Cp].astype(o_ref.dtype)
    o_ref[:, :, Cp:2 * Cp] = jnp.maximum(
        pre[1:TH + 1, :, Cp:2 * Cp], 0.0).astype(o_ref.dtype)
    x3m = jnp.maximum(pre[:, :, 2 * Cp:3 * Cp], 0.0)            # (TH+2, W, Cp) f32

    # ---- pass 2: second conv3/bn3 on x3m -------------------------------------
    # zero only the halo column strips (interior is fully overwritten each step)
    xpad2_ref[:, 0:_PW, :] = jnp.zeros((TH + 2, _PW, Cp), jnp.bfloat16)
    xpad2_ref[:, _PW + W:Wp, :] = jnp.zeros((TH + 2, _PW, Cp), jnp.bfloat16)
    xpad2_ref[:, _PW:_PW + W, :] = x3m.astype(jnp.bfloat16)

    # halo rows that fall outside the image must be zero: the 3x3 conv at the
    # image boundary reads zero padding, not the bias-driven out-of-range rows.
    @pl.when(h == 0)
    def _():
        xpad2_ref[0:1, :, :] = jnp.zeros((1, Wp, Cp), jnp.bfloat16)

    @pl.when(h == pl.num_programs(1) - 1)
    def _():
        xpad2_ref[TH + 1:TH + 2, :, :] = jnp.zeros((1, Wp, Cp), jnp.bfloat16)

    for dy in range(3):
        band2 = xpad2_ref[dy:dy + TH, :, :]                     # (TH, Wp, Cp) bf16
        for dx in range(3):
            k = dy * 3 + dx
            c0 = _PW - 1 + dx
            slab_ref[0:TH, :, k * Cp:(k + 1) * Cp] = band2[:, c0:c0 + W, :]

    slab2 = slab_ref[0:TH, :, :].reshape(TH * W, 9 * Cp)
    x3 = jnp.dot(slab2, w3_ref[...], preferred_element_type=jnp.float32)
    x3 = (x3 + b3_ref[...]).reshape(TH, W, Cp)
    o_ref[:, :, 2 * Cp:3 * Cp] = x3.astype(o_ref.dtype)


def fourier_block_forward(x_nchw, params, *, eps=1e-5, row_tile=None):
    """Forward pass of FourierBlock.  x_nchw: (B, C, H, W) f32.  Returns (B, 3C, H, W)."""
    B, Cin, H, W = x_nchw.shape
    C = params["conv1_w"].shape[0]
    assert Cin == C, "FourierBlock requires in_channels == out_channels"
    Cp = _round_up(C, 128)              # lane-dense channel padding
    TH = row_tile if row_tile is not None else _pick_row_tile(H)
    assert H % TH == 0, f"row tile {TH} must divide H={H}"

    # ---- fold BatchNorm (inference mode) into the conv weights --------------
    def fold(w, b, g, bt, m, v):
        s = g * jax.lax.rsqrt(v + eps)
        return w * s[:, None, None, None], (b - m) * s + bt

    w1f, b1f = fold(params["conv1_w"], params["conv1_b"], params["bn1_gamma"],
                    params["bn1_beta"], params["bn1_mean"], params["bn1_var"])
    w2f, b2f = fold(params["conv2_w"], params["conv2_b"], params["bn2_gamma"],
                    params["bn2_beta"], params["bn2_mean"], params["bn2_var"])
    w3f, b3f = fold(params["conv3_w"], params["conv3_b"], params["bn3_gamma"],
                    params["bn3_beta"], params["bn3_mean"], params["bn3_var"])

    def taps(w):  # OIHW (C, C, 3, 3) -> (9, Cin, Cout), k = kh*3 + kw
        return jnp.transpose(w, (2, 3, 1, 0)).reshape(9, C, C)

    w2k, w3k = taps(w2f), taps(w3f)
    w1k = jnp.transpose(w1f[:, :, 0, 0], (1, 0))  # (Cin, Cout)

    # fused first-level weight: columns [0:Cp)=conv1, [Cp:2Cp)=conv2, [2Cp:3Cp)=conv3
    w_all = jnp.zeros((9 * Cp, 3 * Cp), jnp.float32)
    w_all = w_all.at[4 * Cp:4 * Cp + C, 0:C].set(w1k)   # 1x1 conv lives at center tap
    w3b = jnp.zeros((9 * Cp, Cp), jnp.float32)
    for k in range(9):
        w_all = w_all.at[k * Cp:k * Cp + C, Cp:Cp + C].set(w2k[k])
        w_all = w_all.at[k * Cp:k * Cp + C, 2 * Cp:2 * Cp + C].set(w3k[k])
        w3b = w3b.at[k * Cp:k * Cp + C, 0:C].set(w3k[k])
    w_all = w_all.astype(jnp.bfloat16)
    w3b = w3b.astype(jnp.bfloat16)

    b_all = jnp.zeros((1, 3 * Cp), jnp.float32)
    b_all = b_all.at[0, 0:C].set(b1f).at[0, Cp:Cp + C].set(b2f)
    b_all = b_all.at[0, 2 * Cp:2 * Cp + C].set(b3f)
    b3v = jnp.zeros((1, Cp), jnp.float32).at[0, 0:C].set(b3f)

    # ---- FFT (XLA op; no Pallas equivalent) + layout / padding / bf16 cast ---
    # One fused wrapper pass replaces the per-step in-kernel memset + pad fill.
    xr = jnp.fft.fft2(x_nchw, axes=(2, 3)).real
    x_nhwc = jnp.transpose(xr, (0, 2, 3, 1))                    # (B, H, W, C)
    x_pad = jnp.pad(x_nhwc, ((0, 0), (2, 2), (_PW, _PW), (0, Cp - C)))
    x_pad = x_pad.astype(jnp.bfloat16)   # conv math runs bf16 on the MXU anyway
    Hp, Wp = H + 4, W + 2 * _PW

    kernel = functools.partial(_fourier_block_kernel, TH=TH, W=W, Cp=Cp)

    # ---- per-step VMEM estimate -> limit with headroom -----------------------
    bf16, f32 = 2, 4
    in_blk = Hp * Wp * Cp * bf16
    out_blk = TH * W * 3 * Cp * f32
    wgt = (9 * Cp * 3 * Cp + 9 * Cp * Cp) * bf16 + (3 * Cp + Cp) * f32
    scratch = (TH + 2) * W * 9 * Cp * bf16 + (TH + 2) * Wp * Cp * bf16
    vmem_need = 2 * (in_blk + out_blk + wgt) + scratch          # double-buffered I/O
    # leave >=16 MiB for Mosaic internal scratch; cap well under v5e/v6e's 128 MiB
    vmem_limit = int(min(max(vmem_need + (16 << 20), 32 << 20), 96 << 20))

    out_p = pl.pallas_call(
        kernel,
        out_shape=jax.ShapeDtypeStruct((B, H, W, 3 * Cp), jnp.float32),
        grid=(B, H // TH),
        in_specs=[
            # whole padded image stays resident across the row-tile axis
            pl.BlockSpec((None, Hp, Wp, Cp), lambda b, h: (b, 0, 0, 0)),
            pl.BlockSpec((9 * Cp, 3 * Cp), lambda b, h: (0, 0)),
            pl.BlockSpec((1, 3 * Cp), lambda b, h: (0, 0)),
            pl.BlockSpec((9 * Cp, Cp), lambda b, h: (0, 0)),
            pl.BlockSpec((1, Cp), lambda b, h: (0, 0)),
        ],
        out_specs=pl.BlockSpec((None, TH, W, 3 * Cp), lambda b, h: (b, h, 0, 0)),
        scratch_shapes=[
            pltpu.VMEM((TH + 2, W, 9 * Cp), jnp.bfloat16),      # im2col slab (both passes)
            pltpu.VMEM((TH + 2, Wp, Cp), jnp.bfloat16),         # padded x3m for 2nd conv3
        ],
        compiler_params=pltpu.CompilerParams(
            dimension_semantics=("parallel", "parallel"),
            vmem_limit_bytes=vmem_limit),
    )(x_pad, w_all, b_all, w3b, b3v)

    # gather the three branch channel blocks -> concat([x1, x2, x3], channels)
    if Cp == C:
        y = out_p
    else:
        y = jnp.concatenate(
            [out_p[..., 0:C], out_p[..., Cp:Cp + C],
             out_p[..., 2 * Cp:2 * Cp + C]], axis=-1)

    y = jnp.fft.ifft2(y, axes=(1, 2)).real
    return jnp.transpose(y, (0, 3, 1, 2))  # NCHW (B, 3C, H, W)


def fourier_block_reference(x, params, *, eps=1e-5):
    """Pure-JAX f32 reference (NCHW), mirrors the PyTorch module (eval-mode BN)."""
    p = params

    def conv(z, w, b, pad):
        y = jax.lax.conv_general_dilated(
            z, w, window_strides=(1, 1), padding=((pad, pad), (pad, pad)),
            dimension_numbers=("NCHW", "OIHW", "NCHW"))
        return y + b[None, :, None, None]

    def bn(z, g, bt, m, v):
        return ((z - m[None, :, None, None])
                * jax.lax.rsqrt(v[None, :, None, None] + eps)
                * g[None, :, None, None] + bt[None, :, None, None])

    xr = jnp.fft.fft2(x, axes=(2, 3)).real
    x1 = bn(conv(xr, p["conv1_w"], p["conv1_b"], 0),
            p["bn1_gamma"], p["bn1_beta"], p["bn1_mean"], p["bn1_var"])
    x2 = jax.nn.relu(bn(conv(xr, p["conv2_w"], p["conv2_b"], 1),
                        p["bn2_gamma"], p["bn2_beta"], p["bn2_mean"], p["bn2_var"]))
    x3 = jax.nn.relu(bn(conv(xr, p["conv3_w"], p["conv3_b"], 1),
                        p["bn3_gamma"], p["bn3_beta"], p["bn3_mean"], p["bn3_var"]))
    x3 = bn(conv(x3, p["conv3_w"], p["conv3_b"], 1),
            p["bn3_gamma"], p["bn3_beta"], p["bn3_mean"], p["bn3_var"])
    out = jnp.concatenate([x1, x2, x3], axis=1)
    return jnp.fft.ifft2(out, axes=(2, 3)).real


if __name__ == "__main__":
    B, C, H, W = 2, 4, 16, 16  # in_channels == out_channels (required by the module)

    key = jax.random.PRNGKey(0)
    ks = jax.random.split(key, 20)

    def nrm(k, shape, scale=1.0):
        return scale * jax.random.normal(k, shape, jnp.float32)

    params = {
        "conv1_w": nrm(ks[0], (C, C, 1, 1), 0.1), "conv1_b": nrm(ks[1], (C,), 0.1),
        "conv2_w": nrm(ks[2], (C, C, 3, 3), 0.1), "conv2_b": nrm(ks[3], (C,), 0.1),
        "conv3_w": nrm(ks[4], (C, C, 3, 3), 0.1), "conv3_b": nrm(ks[5], (C,), 0.1),
        "bn1_gamma": 1.0 + nrm(ks[6], (C,), 0.1), "bn1_beta": nrm(ks[7], (C,), 0.1),
        "bn1_mean": nrm(ks[8], (C,), 0.1),
        "bn1_var": jax.random.uniform(ks[9], (C,), jnp.float32, 0.5, 1.5),
        "bn2_gamma": 1.0 + nrm(ks[10], (C,), 0.1), "bn2_beta": nrm(ks[11], (C,), 0.1),
        "bn2_mean": nrm(ks[12], (C,), 0.1),
        "bn2_var": jax.random.uniform(ks[13], (C,), jnp.float32, 0.5, 1.5),
        "bn3_gamma": 1.0 + nrm(ks[14], (C,), 0.1), "bn3_beta": nrm(ks[15], (C,), 0.1),
        "bn3_mean": nrm(ks[16], (C,), 0.1),
        "bn3_var": jax.random.uniform(ks[17], (C,), jnp.float32, 0.5, 1.5),
    }
    x = nrm(ks[18], (B, C, H, W))

    # row_tile=8 -> 2 row tiles at H=16, so the halo/tiling path is exercised.
    out = jax.block_until_ready(fourier_block_forward(x, params, row_tile=8))
    ref = jax.block_until_ready(fourier_block_reference(x, params))

    assert out.shape == (B, 3 * C, H, W)
    if not jnp.allclose(out, ref, rtol=2e-2, atol=2e-2):
        max_err = float(jnp.max(jnp.abs(out - ref)))
        raise AssertionError(
            f"Pallas kernel output mismatch vs reference (max abs err {max_err})")

    print("KERNEL_OK")
</pallas_src>

<mosaic_0001>
module attributes {stable_mosaic.version = 11 : i64} {
  func.func @_fourier_block_kernel(%arg0: i32, %arg1: i32, %arg2: memref<1x20x32x128xbf16, #tpu.memory_space<vmem>>, %arg3: memref<1152x384xbf16, #tpu.memory_space<vmem>>, %arg4: memref<1x384xf32, #tpu.memory_space<vmem>>, %arg5: memref<1152x128xbf16, #tpu.memory_space<vmem>>, %arg6: memref<1x128xf32, #tpu.memory_space<vmem>>, %arg7: memref<1x8x16x384xf32, #tpu.memory_space<vmem>>, %arg8: memref<10x16x1152xbf16, #tpu.memory_space<vmem>>, %arg9: memref<10x32x128xbf16, #tpu.memory_space<vmem>>) attributes {dimension_semantics = [#tpu.dimension_semantics<parallel>, #tpu.dimension_semantics<parallel>], iteration_bounds = array<i64: 2, 2>, scalar_prefetch = 0 : i64, scratch_operands = 2 : i64, tpu.core_type = #tpu.core_type<tc>, window_params = [{transform_indices = @transform_0, window_bounds = array<i64: 1, 20, 32, 128>}, {pipeline_mode = #tpu.pipeline_mode<synchronous>, transform_indices = @transform_1, window_bounds = array<i64: 1152, 384>}, {pipeline_mode = #tpu.pipeline_mode<synchronous>, transform_indices = @transform_2, window_bounds = array<i64: 1, 384>}, {pipeline_mode = #tpu.pipeline_mode<synchronous>, transform_indices = @transform_3, window_bounds = array<i64: 1152, 128>}, {pipeline_mode = #tpu.pipeline_mode<synchronous>, transform_indices = @transform_4, window_bounds = array<i64: 1, 128>}, {transform_indices = @transform_5, window_bounds = array<i64: 1, 8, 16, 384>}]} {
    %c8_i32 = arith.constant 8 : i32
    %0 = arith.muli %arg1, %c8_i32 : i32
    %c0_i32 = arith.constant 0 : i32
    %1 = arith.addi %0, %c0_i32 : i32
    %c0 = arith.constant 0 : index
    %2 = arith.index_cast %1 : i32 to index
    %c0_0 = arith.constant 0 : index
    %c0_1 = arith.constant 0 : index
    %3 = vector.load %arg2[%c0, %2, %c0_0, %c0_1] : memref<1x20x32x128xbf16, #tpu.memory_space<vmem>>, vector<1x10x32x128xbf16>
    %4 = vector.shape_cast %3 : vector<1x10x32x128xbf16> to vector<10x32x128xbf16>
    %5 = vector.extract_strided_slice %4 {offsets = [0, 7, 0], sizes = [10, 16, 128], strides = [1, 1, 1]} : vector<10x32x128xbf16> to vector<10x16x128xbf16>
    %c0_2 = arith.constant 0 : index
    %c0_3 = arith.constant 0 : index
    %c0_4 = arith.constant 0 : index
    %6 = vector.load %arg8[%c0_2, %c0_3, %c0_4] : memref<10x16x1152xbf16, #tpu.memory_space<vmem>>, vector<10x16x128xbf16>
    tpu.vector_store %arg8[%c0_2, %c0_3, %c0_4], %5 {strides = array<i32>} : memref<10x16x1152xbf16, #tpu.memory_space<vmem>>, vector<10x16x128xbf16>,
    %7 = vector.extract_strided_slice %4 {offsets = [0, 8, 0], sizes = [10, 16, 128], strides = [1, 1, 1]} : vector<10x32x128xbf16> to vector<10x16x128xbf16>
    %c0_5 = arith.constant 0 : index
    %c0_6 = arith.constant 0 : index
    %c128 = arith.constant 128 : index
    %8 = vector.load %arg8[%c0_5, %c0_6, %c128] : memref<10x16x1152xbf16, #tpu.memory_space<vmem>>, vector<10x16x128xbf16>
    tpu.vector_store %arg8[%c0_5, %c0_6, %c128], %7 {strides = array<i32>} : memref<10x16x1152xbf16, #tpu.memory_space<vmem>>, vector<10x16x128xbf16>,
    %9 = vector.extract_strided_slice %4 {offsets = [0, 9, 0], sizes = [10, 16, 128], strides = [1, 1, 1]} : vector<10x32x128xbf16> to vector<10x16x128xbf16>
    %c0_7 = arith.constant 0 : index
    %c0_8 = arith.constant 0 : index
    %c256 = arith.constant 256 : index
    %10 = vector.load %arg8[%c0_7, %c0_8, %c256] : memref<10x16x1152xbf16, #tpu.memory_space<vmem>>, vector<10x16x128xbf16>
    tpu.vector_store %arg8[%c0_7, %c0_8, %c256], %9 {strides = array<i32>} : memref<10x16x1152xbf16, #tpu.memory_space<vmem>>, vector<10x16x128xbf16>,
    %c1_i32 = arith.constant 1 : i32
    %11 = arith.addi %0, %c1_i32 : i32
    %c0_9 = arith.constant 0 : index
    %12 = arith.index_cast %11 : i32 to index
    %c0_10 = arith.constant 0 : index
    %c0_11 = arith.constant 0 : index
    %13 = vector.load %arg2[%c0_9, %12, %c0_10, %c0_11] : memref<1x20x32x128xbf16, #tpu.memory_space<vmem>>, vector<1x10x32x128xbf16>
    %14 = vector.shape_cast %13 : vector<1x10x32x128xbf16> to vector<10x32x128xbf16>
    %15 = vector.extract_strided_slice %14 {offsets = [0, 7, 0], sizes = [10, 16, 128], strides = [1, 1, 1]} : vector<10x32x128xbf16> to vector<10x16x128xbf16>
    %c0_12 = arith.constant 0 : index
    %c0_13 = arith.constant 0 : index
    %c384 = arith.constant 384 : index
    %16 = vector.load %arg8[%c0_12, %c0_13, %c384] : memref<10x16x1152xbf16, #tpu.memory_space<vmem>>, vector<10x16x128xbf16>
    tpu.vector_store %arg8[%c0_12, %c0_13, %c384], %15 {strides = array<i32>} : memref<10x16x1152xbf16, #tpu.memory_space<vmem>>, vector<10x16x128xbf16>,
    %17 = vector.extract_strided_slice %14 {offsets = [0, 8, 0], sizes = [10, 16, 128], strides = [1, 1, 1]} : vector<10x32x128xbf16> to vector<10x16x128xbf16>
    %c0_14 = arith.constant 0 : index
    %c0_15 = arith.constant 0 : index
    %c512 = arith.constant 512 : index
    %18 = vector.load %arg8[%c0_14, %c0_15, %c512] : memref<10x16x1152xbf16, #tpu.memory_space<vmem>>, vector<10x16x128xbf16>
    tpu.vector_store %arg8[%c0_14, %c0_15, %c512], %17 {strides = array<i32>} : memref<10x16x1152xbf16, #tpu.memory_space<vmem>>, vector<10x16x128xbf16>,
    %19 = vector.extract_strided_slice %14 {offsets = [0, 9, 0], sizes = [10, 16, 128], strides = [1, 1, 1]} : vector<10x32x128xbf16> to vector<10x16x128xbf16>
    %c0_16 = arith.constant 0 : index
    %c0_17 = arith.constant 0 : index
    %c640 = arith.constant 640 : index
    %20 = vector.load %arg8[%c0_16, %c0_17, %c640] : memref<10x16x1152xbf16, #tpu.memory_space<vmem>>, vector<10x16x128xbf16>
    tpu.vector_store %arg8[%c0_16, %c0_17, %c640], %19 {strides = array<i32>} : memref<10x16x1152xbf16, #tpu.memory_space<vmem>>, vector<10x16x128xbf16>,
    %c2_i32 = arith.constant 2 : i32
    %21 = arith.addi %0, %c2_i32 : i32
    %c0_18 = arith.constant 0 : index
    %22 = arith.index_cast %21 : i32 to index
    %c0_19 = arith.constant 0 : index
    %c0_20 = arith.constant 0 : index
    %23 = vector.load %arg2[%c0_18, %22, %c0_19, %c0_20] : memref<1x20x32x128xbf16, #tpu.memory_space<vmem>>, vector<1x10x32x128xbf16>
    %24 = vector.shape_cast %23 : vector<1x10x32x128xbf16> to vector<10x32x128xbf16>
    %25 = vector.extract_strided_slice %24 {offsets = [0, 7, 0], sizes = [10, 16, 128], strides = [1, 1, 1]} : vector<10x32x128xbf16> to vector<10x16x128xbf16>
    %c0_21 = arith.constant 0 : index
    %c0_22 = arith.constant 0 : index
    %c768 = arith.constant 768 : index
    %26 = vector.load %arg8[%c0_21, %c0_22, %c768] : memref<10x16x1152xbf16, #tpu.memory_space<vmem>>, vector<10x16x128xbf16>
    tpu.vector_store %arg8[%c0_21, %c0_22, %c768], %25 {strides = array<i32>} : memref<10x16x1152xbf16, #tpu.memory_space<vmem>>, vector<10x16x128xbf16>,
    %27 = vector.extract_strided_slice %24 {offsets = [0, 8, 0], sizes = [10, 16, 128], strides = [1, 1, 1]} : vector<10x32x128xbf16> to vector<10x16x128xbf16>
    %c0_23 = arith.constant 0 : index
    %c0_24 = arith.constant 0 : index
    %c896 = arith.constant 896 : index
    %28 = vector.load %arg8[%c0_23, %c0_24, %c896] : memref<10x16x1152xbf16, #tpu.memory_space<vmem>>, vector<10x16x128xbf16>
    tpu.vector_store %arg8[%c0_23, %c0_24, %c896], %27 {strides = array<i32>} : memref<10x16x1152xbf16, #tpu.memory_space<vmem>>, vector<10x16x128xbf16>,
    %29 = vector.extract_strided_slice %24 {offsets = [0, 9, 0], sizes = [10, 16, 128], strides = [1, 1, 1]} : vector<10x32x128xbf16> to vector<10x16x128xbf16>
    %c0_25 = arith.constant 0 : index
    %c0_26 = arith.constant 0 : index
    %c1024 = arith.constant 1024 : index
    %30 = vector.load %arg8[%c0_25, %c0_26, %c1024] : memref<10x16x1152xbf16, #tpu.memory_space<vmem>>, vector<10x16x128xbf16>
    tpu.vector_store %arg8[%c0_25, %c0_26, %c1024], %29 {strides = array<i32>} : memref<10x16x1152xbf16, #tpu.memory_space<vmem>>, vector<10x16x128xbf16>,
    %c0_27 = arith.constant 0 : index
    %c0_28 = arith.constant 0 : index
    %c0_29 = arith.constant 0 : index
    %31 = vector.load %arg8[%c0_27, %c0_28, %c0_29] : memref<10x16x1152xbf16, #tpu.memory_space<vmem>>, vector<10x16x1152xbf16>
    %32 = vector.shape_cast %31 : vector<10x16x1152xbf16> to vector<160x1152xbf16>
    %c0_30 = arith.constant 0 : index
    %c0_31 = arith.constant 0 : index
    %33 = vector.load %arg3[%c0_30, %c0_31] : memref<1152x384xbf16, #tpu.memory_space<vmem>>, vector<1152x384xbf16>
    %cst = arith.constant dense<0.000000e+00> : vector<160x384xf32>
    %34 = tpu.matmul %32, %33, %cst {dimension_numbers = #tpu.dot_dimension_numbers<[1], [0], [0], [1], [0, 0, 1, 1], [], []>} : vector<160x1152xbf16>, vector<1152x384xbf16>, vector<160x384xf32> -> vector<160x384xf32>
    %c0_32 = arith.constant 0 : index
    %c0_33 = arith.constant 0 : index
    %35 = vector.load %arg4[%c0_32, %c0_33] : memref<1x384xf32, #tpu.memory_space<vmem>>, vector<1x384xf32>
    %36 = vector.broadcast %35 : vector<1x384xf32> to vector<160x384xf32>
    %37 = arith.addf %34, %36 : vector<160x384xf32>
    %38 = vector.shape_cast %37 : vector<160x384xf32> to vector<10x16x384xf32>
    %39 = vector.extract_strided_slice %38 {offsets = [1, 0, 0], sizes = [8, 16, 128], strides = [1, 1, 1]} : vector<10x16x384xf32> to vector<8x16x128xf32>
    %c0_34 = arith.constant 0 : index
    %c0_35 = arith.constant 0 : index
    %c0_36 = arith.constant 0 : index
    %c0_37 = arith.constant 0 : index
    %40 = vector.load %arg7[%c0_34, %c0_35, %c0_36, %c0_37] : memref<1x8x16x384xf32, #tpu.memory_space<vmem>>, vector<1x8x16x128xf32>
    %41 = vector.shape_cast %40 : vector<1x8x16x128xf32> to vector<8x16x128xf32>
    %42 = vector.shape_cast %39 : vector<8x16x128xf32> to vector<1x8x16x128xf32>
    tpu.vector_store %arg7[%c0_34, %c0_35, %c0_36, %c0_37], %42 {strides = array<i32>} : memref<1x8x16x384xf32, #tpu.memory_space<vmem>>, vector<1x8x16x128xf32>,
    %43 = vector.extract_strided_slice %38 {offsets = [1, 0, 128], sizes = [8, 16, 128], strides = [1, 1, 1]} : vector<10x16x384xf32> to vector<8x16x128xf32>
    %cst_38 = arith.constant 0.000000e+00 : f32
    %44 = vector.broadcast %cst_38 : f32 to vector<8x16x128xf32>
    %45 = arith.maximumf %43, %44 : vector<8x16x128xf32>
    %c0_39 = arith.constant 0 : index
    %c0_40 = arith.constant 0 : index
    %c0_41 = arith.constant 0 : index
    %c128_42 = arith.constant 128 : index
    %46 = vector.load %arg7[%c0_39, %c0_40, %c0_41, %c128_42] : memref<1x8x16x384xf32, #tpu.memory_space<vmem>>, vector<1x8x16x128xf32>
    %47 = vector.shape_cast %46 : vector<1x8x16x128xf32> to vector<8x16x128xf32>
    %48 = vector.shape_cast %45 : vector<8x16x128xf32> to vector<1x8x16x128xf32>
    tpu.vector_store %arg7[%c0_39, %c0_40, %c0_41, %c128_42], %48 {strides = array<i32>} : memref<1x8x16x384xf32, #tpu.memory_space<vmem>>, vector<1x8x16x128xf32>,
    %49 = vector.extract_strided_slice %38 {offsets = [0, 0, 256], sizes = [10, 16, 128], strides = [1, 1, 1]} : vector<10x16x384xf32> to vector<10x16x128xf32>
    %cst_43 = arith.constant 0.000000e+00 : f32
    %50 = vector.broadcast %cst_43 : f32 to vector<10x16x128xf32>
    %51 = arith.maximumf %49, %50 : vector<10x16x128xf32>
    %cst_44 = arith.constant 0.000000e+00 : bf16
    %52 = vector.broadcast %cst_44 : bf16 to vector<10x8x128xbf16>
    %c0_45 = arith.constant 0 : index
    %c0_46 = arith.constant 0 : index
    %c0_47 = arith.constant 0 : index
    %53 = vector.load %arg9[%c0_45, %c0_46, %c0_47] : memref<10x32x128xbf16, #tpu.memory_space<vmem>>, vector<10x8x128xbf16>
    tpu.vector_store %arg9[%c0_45, %c0_46, %c0_47], %52 {strides = array<i32>} : memref<10x32x128xbf16, #tpu.memory_space<vmem>>, vector<10x8x128xbf16>,
    %cst_48 = arith.constant 0.000000e+00 : bf16
    %54 = vector.broadcast %cst_48 : bf16 to vector<10x8x128xbf16>
    %c0_49 = arith.constant 0 : index
    %c24 = arith.constant 24 : index
    %c0_50 = arith.constant 0 : index
    %55 = vector.load %arg9[%c0_49, %c24, %c0_50] : memref<10x32x128xbf16, #tpu.memory_space<vmem>>, vector<10x8x128xbf16>
    tpu.vector_store %arg9[%c0_49, %c24, %c0_50], %54 {strides = array<i32>} : memref<10x32x128xbf16, #tpu.memory_space<vmem>>, vector<10x8x128xbf16>,
    %56 = arith.truncf %51 : vector<10x16x128xf32> to vector<10x16x128xbf16>
    %c0_51 = arith.constant 0 : index
    %c8 = arith.constant 8 : index
    %c0_52 = arith.constant 0 : index
    %57 = vector.load %arg9[%c0_51, %c8, %c0_52] : memref<10x32x128xbf16, #tpu.memory_space<vmem>>, vector<10x16x128xbf16>
    tpu.vector_store %arg9[%c0_51, %c8, %c0_52], %56 {strides = array<i32>} : memref<10x32x128xbf16, #tpu.memory_space<vmem>>, vector<10x16x128xbf16>,
    %c0_i32_53 = arith.constant 0 : i32
    %58 = arith.cmpi eq, %arg1, %c0_i32_53 : i32
    %59 = arith.extui %58 : i1 to i32
    %c0_i32_54 = arith.constant 0 : i32
    %60 = arith.cmpi ne, %59, %c0_i32_54 : i32
    scf.if %60 {
      %cst_103 = arith.constant 0.000000e+00 : bf16
      %96 = vector.broadcast %cst_103 : bf16 to vector<1x32x128xbf16>
      %c0_104 = arith.constant 0 : index
      %c0_105 = arith.constant 0 : index
      %c0_106 = arith.constant 0 : index
      %97 = vector.load %arg9[%c0_104, %c0_105, %c0_106] : memref<10x32x128xbf16, #tpu.memory_space<vmem>>, vector<1x32x128xbf16>
      tpu.vector_store %arg9[%c0_104, %c0_105, %c0_106], %96 {strides = array<i32>} : memref<10x32x128xbf16, #tpu.memory_space<vmem>>, vector<1x32x128xbf16>,
    } else {
    }
    %c1_i32_55 = arith.constant 1 : i32
    %61 = arith.cmpi eq, %arg1, %c1_i32_55 : i32
    %62 = arith.extui %61 : i1 to i32
    %c0_i32_56 = arith.constant 0 : i32
    %63 = arith.cmpi ne, %62, %c0_i32_56 : i32
    scf.if %63 {
      %cst_103 = arith.constant 0.000000e+00 : bf16
      %96 = vector.broadcast %cst_103 : bf16 to vector<1x32x128xbf16>
      %c9 = arith.constant 9 : index
      %c0_104 = arith.constant 0 : index
      %c0_105 = arith.constant 0 : index
      %97 = vector.load %arg9[%c9, %c0_104, %c0_105] : memref<10x32x128xbf16, #tpu.memory_space<vmem>>, vector<1x32x128xbf16>
      tpu.vector_store %arg9[%c9, %c0_104, %c0_105], %96 {strides = array<i32>} : memref<10x32x128xbf16, #tpu.memory_space<vmem>>, vector<1x32x128xbf16>,
    } else {
    }
    %c0_57 = arith.constant 0 : index
    %c0_58 = arith.constant 0 : index
    %c0_59 = arith.constant 0 : index
    %64 = vector.load %arg9[%c0_57, %c0_58, %c0_59] : memref<10x32x128xbf16, #tpu.memory_space<vmem>>, vector<8x32x128xbf16>
    %65 = vector.extract_strided_slice %64 {offsets = [0, 7, 0], sizes = [8, 16, 128], strides = [1, 1, 1]} : vector<8x32x128xbf16> to vector<8x16x128xbf16>
    %c0_60 = arith.constant 0 : index
    %c0_61 = arith.constant 0 : index
    %c0_62 = arith.constant 0 : index
    %66 = vector.load %arg8[%c0_60, %c0_61, %c0_62] : memref<10x16x1152xbf16, #tpu.memory_space<vmem>>, vector<8x16x128xbf16>
    tpu.vector_store %arg8[%c0_60, %c0_61, %c0_62], %65 {strides = array<i32>} : memref<10x16x1152xbf16, #tpu.memory_space<vmem>>, vector<8x16x128xbf16>,
    %67 = vector.extract_strided_slice %64 {offsets = [0, 8, 0], sizes = [8, 16, 128], strides = [1, 1, 1]} : vector<8x32x128xbf16> to vector<8x16x128xbf16>
    %c0_63 = arith.constant 0 : index
    %c0_64 = arith.constant 0 : index
    %c128_65 = arith.constant 128 : index
    %68 = vector.load %arg8[%c0_63, %c0_64, %c128_65] : memref<10x16x1152xbf16, #tpu.memory_space<vmem>>, vector<8x16x128xbf16>
    tpu.vector_store %arg8[%c0_63, %c0_64, %c128_65], %67 {strides = array<i32>} : memref<10x16x1152xbf16, #tpu.memory_space<vmem>>, vector<8x16x128xbf16>,
    %69 = vector.extract_strided_slice %64 {offsets = [0, 9, 0], sizes = [8, 16, 128], strides = [1, 1, 1]} : vector<8x32x128xbf16> to vector<8x16x128xbf16>
    %c0_66 = arith.constant 0 : index
    %c0_67 = arith.constant 0 : index
    %c256_68 = arith.constant 256 : index
    %70 = vector.load %arg8[%c0_66, %c0_67, %c256_68] : memref<10x16x1152xbf16, #tpu.memory_space<vmem>>, vector<8x16x128xbf16>
    tpu.vector_store %arg8[%c0_66, %c0_67, %c256_68], %69 {strides = array<i32>} : memref<10x16x1152xbf16, #tpu.memory_space<vmem>>, vector<8x16x128xbf16>,
    %c1 = arith.constant 1 : index
    %c0_69 = arith.constant 0 : index
    %c0_70 = arith.constant 0 : index
    %71 = vector.load %arg9[%c1, %c0_69, %c0_70] : memref<10x32x128xbf16, #tpu.memory_space<vmem>>, vector<8x32x128xbf16>
    %72 = vector.extract_strided_slice %71 {offsets = [0, 7, 0], sizes = [8, 16, 128], strides = [1, 1, 1]} : vector<8x32x128xbf16> to vector<8x16x128xbf16>
    %c0_71 = arith.constant 0 : index
    %c0_72 = arith.constant 0 : index
    %c384_73 = arith.constant 384 : index
    %73 = vector.load %arg8[%c0_71, %c0_72, %c384_73] : memref<10x16x1152xbf16, #tpu.memory_space<vmem>>, vector<8x16x128xbf16>
    tpu.vector_store %arg8[%c0_71, %c0_72, %c384_73], %72 {strides = array<i32>} : memref<10x16x1152xbf16, #tpu.memory_space<vmem>>, vector<8x16x128xbf16>,
    %74 = vector.extract_strided_slice %71 {offsets = [0, 8, 0], sizes = [8, 16, 128], strides = [1, 1, 1]} : vector<8x32x128xbf16> to vector<8x16x128xbf16>
    %c0_74 = arith.constant 0 : index
    %c0_75 = arith.constant 0 : index
    %c512_76 = arith.constant 512 : index
    %75 = vector.load %arg8[%c0_74, %c0_75, %c512_76] : memref<10x16x1152xbf16, #tpu.memory_space<vmem>>, vector<8x16x128xbf16>
    tpu.vector_store %arg8[%c0_74, %c0_75, %c512_76], %74 {strides = array<i32>} : memref<10x16x1152xbf16, #tpu.memory_space<vmem>>, vector<8x16x128xbf16>,
    %76 = vector.extract_strided_slice %71 {offsets = [0, 9, 0], sizes = [8, 16, 128], strides = [1, 1, 1]} : vector<8x32x128xbf16> to vector<8x16x128xbf16>
    %c0_77 = arith.constant 0 : index
    %c0_78 = arith.constant 0 : index
    %c640_79 = arith.constant 640 : index
    %77 = vector.load %arg8[%c0_77, %c0_78, %c640_79] : memref<10x16x1152xbf16, #tpu.memory_space<vmem>>, vector<8x16x128xbf16>
    tpu.vector_store %arg8[%c0_77, %c0_78, %c640_79], %76 {strides = array<i32>} : memref<10x16x1152xbf16, #tpu.memory_space<vmem>>, vector<8x16x128xbf16>,
    %c2 = arith.constant 2 : index
    %c0_80 = arith.constant 0 : index
    %c0_81 = arith.constant 0 : index
    %78 = vector.load %arg9[%c2, %c0_80, %c0_81] : memref<10x32x128xbf16, #tpu.memory_space<vmem>>, vector<8x32x128xbf16>
    %79 = vector.extract_strided_slice %78 {offsets = [0, 7, 0], sizes = [8, 16, 128], strides = [1, 1, 1]} : vector<8x32x128xbf16> to vector<8x16x128xbf16>
    %c0_82 = arith.constant 0 : index
    %c0_83 = arith.constant 0 : index
    %c768_84 = arith.constant 768 : index
    %80 = vector.load %arg8[%c0_82, %c0_83, %c768_84] : memref<10x16x1152xbf16, #tpu.memory_space<vmem>>, vector<8x16x128xbf16>
    tpu.vector_store %arg8[%c0_82, %c0_83, %c768_84], %79 {strides = array<i32>} : memref<10x16x1152xbf16, #tpu.memory_space<vmem>>, vector<8x16x128xbf16>,
    %81 = vector.extract_strided_slice %78 {offsets = [0, 8, 0], sizes = [8, 16, 128], strides = [1, 1, 1]} : vector<8x32x128xbf16> to vector<8x16x128xbf16>
    %c0_85 = arith.constant 0 : index
    %c0_86 = arith.constant 0 : index
    %c896_87 = arith.constant 896 : index
    %82 = vector.load %arg8[%c0_85, %c0_86, %c896_87] : memref<10x16x1152xbf16, #tpu.memory_space<vmem>>, vector<8x16x128xbf16>
    tpu.vector_store %arg8[%c0_85, %c0_86, %c896_87], %81 {strides = array<i32>} : memref<10x16x1152xbf16, #tpu.memory_space<vmem>>, vector<8x16x128xbf16>,
    %83 = vector.extract_strided_slice %78 {offsets = [0, 9, 0], sizes = [8, 16, 128], strides = [1, 1, 1]} : vector<8x32x128xbf16> to vector<8x16x128xbf16>
    %c0_88 = arith.constant 0 : index
    %c0_89 = arith.constant 0 : index
    %c1024_90 = arith.constant 1024 : index
    %84 = vector.load %arg8[%c0_88, %c0_89, %c1024_90] : memref<10x16x1152xbf16, #tpu.memory_space<vmem>>, vector<8x16x128xbf16>
    tpu.vector_store %arg8[%c0_88, %c0_89, %c1024_90], %83 {strides = array<i32>} : memref<10x16x1152xbf16, #tpu.memory_space<vmem>>, vector<8x16x128xbf16>,
    %c0_91 = arith.constant 0 : index
    %c0_92 = arith.constant 0 : index
    %c0_93 = arith.constant 0 : index
    %85 = vector.load %arg8[%c0_91, %c0_92, %c0_93] : memref<10x16x1152xbf16, #tpu.memory_space<vmem>>, vector<8x16x1152xbf16>
    %86 = vector.shape_cast %85 : vector<8x16x1152xbf16> to vector<128x1152xbf16>
    %c0_94 = arith.constant 0 : index
    %c0_95 = arith.constant 0 : index
    %87 = vector.load %arg5[%c0_94, %c0_95] : memref<1152x128xbf16, #tpu.memory_space<vmem>>, vector<1152x128xbf16>
    %cst_96 = arith.constant dense<0.000000e+00> : vector<128x128xf32>
    %88 = tpu.matmul %86, %87, %cst_96 {dimension_numbers = #tpu.dot_dimension_numbers<[1], [0], [0], [1], [0, 0, 1, 1], [], []>} : vector<128x1152xbf16>, vector<1152x128xbf16>, vector<128x128xf32> -> vector<128x128xf32>
    %c0_97 = arith.constant 0 : index
    %c0_98 = arith.constant 0 : index
    %89 = vector.load %arg6[%c0_97, %c0_98] : memref<1x128xf32, #tpu.memory_space<vmem>>, vector<1x128xf32>
    %90 = vector.broadcast %89 : vector<1x128xf32> to vector<128x128xf32>
    %91 = arith.addf %88, %90 : vector<128x128xf32>
    %92 = vector.shape_cast %91 : vector<128x128xf32> to vector<8x16x128xf32>
    %c0_99 = arith.constant 0 : index
    %c0_100 = arith.constant 0 : index
    %c0_101 = arith.constant 0 : index
    %c256_102 = arith.constant 256 : index
    %93 = vector.load %arg7[%c0_99, %c0_100, %c0_101, %c256_102] : memref<1x8x16x384xf32, #tpu.memory_space<vmem>>, vector<1x8x16x128xf32>
    %94 = vector.shape_cast %93 : vector<1x8x16x128xf32> to vector<8x16x128xf32>
    %95 = vector.shape_cast %92 : vector<8x16x128xf32> to vector<1x8x16x128xf32>
    tpu.vector_store %arg7[%c0_99, %c0_100, %c0_101, %c256_102], %95 {strides = array<i32>} : memref<1x8x16x384xf32, #tpu.memory_space<vmem>>, vector<1x8x16x128xf32>,
    return
  }
  func.func @transform_0(%arg0: i32, %arg1: i32) -> (i32, i32, i32, i32) {
    %c0_i32 = arith.constant 0 : i32
    %c0_i32_0 = arith.constant 0 : i32
    %c0_i32_1 = arith.constant 0 : i32
    %c0_i32_2 = arith.constant 0 : i32
    return %arg0, %c0_i32, %c0_i32_0, %c0_i32_1 : i32, i32, i32, i32
  }
  func.func @transform_1(%arg0: i32, %arg1: i32) -> (i32, i32) {
    %c0_i32 = arith.constant 0 : i32
    %c0_i32_0 = arith.constant 0 : i32
    %c0_i32_1 = arith.constant 0 : i32
    return %c0_i32, %c0_i32_0 : i32, i32
  }
  func.func @transform_2(%arg0: i32, %arg1: i32) -> (i32, i32) {
    %c0_i32 = arith.constant 0 : i32
    %c0_i32_0 = arith.constant 0 : i32
    %c0_i32_1 = arith.constant 0 : i32
    return %c0_i32, %c0_i32_0 : i32, i32
  }
  func.func @transform_3(%arg0: i32, %arg1: i32) -> (i32, i32) {
    %c0_i32 = arith.constant 0 : i32
    %c0_i32_0 = arith.constant 0 : i32
    %c0_i32_1 = arith.constant 0 : i32
    return %c0_i32, %c0_i32_0 : i32, i32
  }
  func.func @transform_4(%arg0: i32, %arg1: i32) -> (i32, i32) {
    %c0_i32 = arith.constant 0 : i32
    %c0_i32_0 = arith.constant 0 : i32
    %c0_i32_1 = arith.constant 0 : i32
    return %c0_i32, %c0_i32_0 : i32, i32
  }
  func.func @transform_5(%arg0: i32, %arg1: i32) -> (i32, i32, i32, i32) {
    %c0_i32 = arith.constant 0 : i32
    %c0_i32_0 = arith.constant 0 : i32
    %c0_i32_1 = arith.constant 0 : i32
    return %arg0, %arg1, %c0_i32, %c0_i32_0 : i32, i32, i32, i32
  }
}

</mosaic_0001>

<bundles_post_ra>
// kernel: tpu_custom_call.1
= control target key start
LH: loop header
LB: loop body
LE: loop exit
PB: predicated region body
PF: predicated region fallthrough
CT: control target
= control target key end

     0   :  { %s11097_s0 = inlined_call_operand.hbm [shape: bf16[2,20,32,128], index: 0, kind: input, shape index: {}]   ;;  %s11098_s1 = inlined_call_operand.hbm [shape: bf16[1152,384], index: 1, kind: input, shape index: {}]   ;;  %s11099_s2 = inlined_call_operand.vmem [shape: f32[1,384], index: 2, kind: input, shape index: {}]   ;;  %s11100_s3 = inlined_call_operand.hbm [shape: bf16[1152,128], index: 3, kind: input, shape index: {}]   ;;  %s11101_s4 = inlined_call_operand.vmem [shape: f32[1,128], index: 4, kind: input, shape index: {}]   ;;  %s11102_s5 = inlined_call_operand.hbm [shape: f32[2,16,16,384], index: 5, kind: output, shape index: {}]  }
   0x1   :  { %11122 = sst [smem:[#allocation19_spill]] %s11098_s1 }
   0x2   :  { %11123 = sst [smem:[#allocation20_spill]] %s11100_s3 }
   0x3   :  { %11124 = sst [smem:[#allocation21_spill]] %s11102_s5 }
   0x4   :  { %10 = vsyncpa [#allocation5], 0 }
   0x5   :  { %12 = vsyncpa [#allocation5 + $0x1], 0 }
   0x6   :  { %13 = vsyncpa [#allocation8], 0 }
   0x7   :  { %14 = vsyncpa [#allocation6], 0 }
   0x8   :  { %16 = vsyncpa [#allocation6 + $0x1], 0  ;;  %s9141_s18 = smov 0   ;;  %s9143_s19 = smov 0  }
   0x9   :  { %s9145_s20 = smov 0   ;;  %s9147_s21 = smov 0  }
   0xa   :  { %s9149_s22 = smov 0   ;;  %s9151_s23 = smov 0  }
   0xb   :  { %s9153_s24 = smov 0   ;;  %s9155_s25 = smov 0  }
   0xc   :  { %s9157_s26 = smov 0   ;;  %s9159_s27 = smov 0  }
   0xd   :  { %s9161_s28 = smov 0  }
   0xe LB: > { %11125 = sst [smem:[#allocation14_spill]] %s9056_s18  ;;  %s6911_s29 = sadd.s32 4294967295, %s9096_s28   ;;  %s9096_s28 = sphi %s9161_s28, %s22_s28   ;;  %s9092_s27 = sphi %s9159_s27, %s11167_s27   ;;  %s9088_s26 = sphi %s9157_s26, %s11159_s26   ;;  %s9084_s25 = sphi %s9155_s25, %s11166_s25   ;;  %s9080_s24 = sphi %s9153_s24, %s11158_s24   ;;  %s9076_s23 = sphi %s9151_s23, %s11165_s23   ;;  %s9072_s22 = sphi %s9149_s22, %s11164_s22   ;;  %s9068_s21 = sphi %s9147_s21, %s11163_s21   ;;  %s9064_s20 = sphi %s9145_s20, %s11162_s20   ;;  %s9060_s19 = sphi %s9143_s19, %s11161_s19   ;;  %s9056_s18 = sphi %s9141_s18, %s11160_s18  }
   0xf   : > { %11126 = sst [smem:[#allocation15_spill]] %s9088_s26  ;;  %s6912_s30 = sadd.s32 4294967294, %s9096_s28  }
  0x10   : > { %p54_p0 = scmp.ne.s32.totalorder %s9072_s22, %s9068_s21  ;;  %p9197_p1 = scmp.eq.s32.totalorder %s6911_s29, 0 }
  0x11   : > { %p163_p2 = scmp.ne.s32.totalorder %s9064_s20, %s9060_s19  ;;  %p164_p4 = scmp.eq.s32.totalorder %s6911_s29, 3 }
  0x12   : > { %s11127_s6 = scalar_select %p9197_p1, 1, 0 }
  0x13   : > { %p9206_p3 = por %p9197_p1, %p54_p0  ;;  %p169_p5 = scmp.ne.s32.totalorder %s9060_s19, %s9056_s18 }
  0x14   : > { %p170_p6 = scmp.eq.s32.totalorder %s6912_s30, 3  ;;  %p9212_p7 = por %p164_p4, %p163_p2 }
  0x15   : > { %s11128_s8 = scalar_select %p9206_p3, 1, 0 }
  0x16   : > { %s11129_s9 = scalar_select %p9212_p7, 1, 0 }
  0x17   : > { %p6913_p8 = scmp.ge.s32.totalorder %s9096_s28, 1  ;;  %p9217_p9 = por %p170_p6, %p169_p5 }
  0x18   : > { %11130 = sst [smem:[#allocation16_spill]] %s11129_s9  ;;  %p177_p10 = scmp.lt.s32.totalorder %s9096_s28, 5 }
  0x19   : > { %s11131_s10 = scalar_select %p9217_p9, 1, 0 }
  0x1a   : > { %p9222_p11 = pnand %p6913_p8, %p177_p10  ;;  %s9098_s12 = smov [#allocation7]  }
  0x1b   : > { %11132 = sst [smem:[#allocation17_spill]] %s11131_s10  ;;  %s189_s13 = sshll.u32 %s9098_s12, 4  ;;  %s190_s13 = int_to_ptr.vmem [resolvable:$true] %s189_s13 }
  0x1c   : > { %s11133_s11 = scalar_select %p9222_p11, 1, 0 }
  0x1d   : > { %p8268_p12 = pneg %p9222_p11  ;;  %s9099_s15 = smov [#allocation9]  }
  0x1e   : > { %s205_s16 = sshll.u32 %s9099_s15, 4  ;;  %s11135_s1 = sld [smem:[#allocation19_spill]]  ;;  %s9234_s16 = int_to_ptr.vmem [resolvable:$true] %s205_s16 }
  0x1f   : > { %p9230_p13 = pnand %p8268_p12, %p9197_p1 }
  0x21   : > { %p8886_p2 = pneg %p9230_p13 }
  0x24   : > { %s8884_s29 = scalar_lea.hbm %s11135_s1, 27648 }
  0x25   : > { %p8885_p0 = scmp.ne.s32.totalorder %s11135_s1, %s8884_s29  ;;  %p8891_p6 = scmp.lt.u32.totalorder %s8884_s29, %s11135_s1 }
  0x27   : > { %p8887_p4 = pnand %p8886_p2, %p8885_p0 }
  0x29   : > { %p8888_p5 = pneg %p8887_p4 }
  0x2b   : > { %p8893_p8 = pnand %p8891_p6, %p8888_p5 }
  0x2d   : > { %8896 = shalt.err (!%p8893_p8)
}
  0x2e   : > { %s8897_s15 = scalar_lea.vmem %s190_s13, 27648  ;;  %p8905_p7 = scmp.lt.s32.totalorder %s190_s13, %s190_s13 }
  0x2f   : > { %p8898_p10 = scmp.ne.s32.totalorder %s190_s13, %s8897_s15  ;;  %p8906_p1 = scmp.lt.s32.totalorder %s8897_s15, %s8897_s15 }
  0x31   : > { %p8900_p12 = pnand %p8898_p10, %p8886_p2  ;;  %p8907_p3 = por %p8906_p1, %p8905_p7 }
  0x33   : > { %p8901_p9 = pneg %p8900_p12 }
  0x35   : > { %p8908_p11 = pnand %p8907_p3, %p8901_p9 }
  0x37   : > { %8911 = shalt.err (!%p8908_p11)
}
  0x38   : > { %s9100_s17 = smov 192   ;;  %s9101_s21 = smov 12  }
  0x39   : > { %8271 = dma.hbm_to_vmem [thread:$0]  (!%p9230_p13), %s11135_s1, 27648, %s190_s13, [#allocation8], %s9100_s17, %s9100_s17, %s9101_s21  }
  0x3a   : > { %s11136_s3 = sld [smem:[#allocation20_spill]] }
  0x40   : > { %s8912_s12 = scalar_lea.hbm %s11136_s3, 9216 }
  0x41   : > { %p8913_p0 = scmp.ne.s32.totalorder %s11136_s3, %s8912_s12  ;;  %p8919_p7 = scmp.lt.u32.totalorder %s8912_s12, %s11136_s3 }
  0x43   : > { %p8915_p1 = pnand %p8913_p0, %p8886_p2 }
  0x45   : > { %p8916_p3 = pneg %p8915_p1 }
  0x47   : > { %p8921_p9 = pnand %p8919_p7, %p8916_p3 }
  0x49   : > { %8924 = shalt.err (!%p8921_p9)
}
  0x4a   : > { %s8925_s13 = scalar_lea.vmem %s9234_s16, 9216  ;;  %p8933_p6 = scmp.lt.s32.totalorder %s9234_s16, %s9234_s16 }
  0x4b   : > { %p8926_p11 = scmp.ne.s32.totalorder %s9234_s16, %s8925_s13  ;;  %p8934_p8 = scmp.lt.s32.totalorder %s8925_s13, %s8925_s13 }
  0x4d   : > { %p8928_p4 = pnand %p8926_p11, %p8886_p2  ;;  %p8935_p10 = por %p8934_p8, %p8933_p6 }
  0x4f   : > { %p8929_p5 = pneg %p8928_p4 }
  0x51   : > { %p8936_p12 = pnand %p8935_p10, %p8929_p5 }
  0x53   : > { %8939 = shalt.err (!%p8936_p12)
}
  0x54   : > { %s11113_s5 = smov 64   ;;  %s11114_s18 = smov 4  }
  0x55   : > { %8274 = dma.hbm_to_vmem [thread:$0]  (!%p9230_p13), %s11136_s3, 9216, %s9234_s16, [#allocation8], %s11113_s5, %s11113_s5, %s11114_s18  }
  0x56   : > { %s31_s21 = sadd.s32 1, %s9088_s26  ;;  %s34_s7 = sadd.s32 1, %s9092_s27 }
  0x57   : > { %p32_p2 = scmp.ge.s32.totalorder %s31_s21, 2  ;;  %s41_s10 = sadd.s32 1, %s9076_s23 }
  0x58   : > { %p48_p0 = scmp.ne.s32.totalorder %s9076_s23, %s9072_s22  ;;  %p49_p1 = scmp.eq.s32.totalorder %s9096_s28, 0 }
  0x59   : > { %s11169_s21 = smov (%p32_p2, %s31_s21), 0  ;;  %s11171_s7 = smov (!%p32_p2, %s34_s7), %s9092_s27 }
  0x5a   : > { %11137 = sst [smem:[#allocation18_spill]] %s11169_s21  ;;  %p9295_p3 = por %p49_p1, %p48_p0 }
  0x5b   : > { %s149_s29 = ssub.s32 %s9088_s26, %s11169_s21  ;;  %p36_p13 = scmp.ge.s32.totalorder %s11171_s7, 2 }
  0x5c   : > { %p8285_p7 = scmp.lt.s32.totalorder %s9096_s28, 4  ;;  %s222_s16 = sand.u32 1, %s9076_s23  }
  0x5d   : > { %s8251_s30 = smul.u32 5120, %s9092_s27  ;;  %s11173_s7 = smov (%p36_p13, %s11171_s7), 0 }
  0x5e   : > { %s8250_s12 = smul.u32 320, %s222_s16  ;;  %s38_s15 = ssub.s32 %s9092_s27, %s11173_s7 }
  0x5f   : > { %s9311_s17 = scalar_lea.hbm %s11097_s0, %s8251_s30  ;;  %p39_p9 = scmp.eq.s32.totalorder %s38_s15, 0 }
  0x60   : > { %s150_s5 = sor.u32 %s149_s29, %s38_s15  ;;  %s11139_s1 = sadd.s32 1, %s9064_s20 }
  0x61   : > { %p151_p11 = scmp.eq.s32.totalorder %s150_s5, 0  ;;  %s226_s21 = scalar_lea.vmem [#allocation4], %s8250_s12 }
  0x62   : > { %s9314_s18 = scalar_select %p39_p9, %s9076_s23, %s41_s10  }
  0x63   : > { %s9319_s3 = scalar_select %p151_p11, %s9064_s20, %s11139_s1  }
  0x64   : > { %s233_s26 = sshll.u32 %s226_s21, 4  ;;  %p9325_p4 = pnand %p8285_p7, %p9295_p3  ;;  %s9329_s26 = int_to_ptr.vmem [resolvable:$true] %s233_s26 }
  0x65   : > { %s9331_s29 = scalar_lea.sflag [#allocation5], %s222_s16  ;;  %s8940_s5 = scalar_lea.hbm %s9311_s17, 5120 }
  0x66   : > { %p8941_p5 = scmp.ne.s32.totalorder %s9311_s17, %s8940_s5  ;;  %p8942_p6 = pneg %p9325_p4 }
  0x67   : > { %s8945_s10 = scalar_lea.hbm %s11097_s0, 10240  ;;  %p8946_p12 = scmp.lt.u32.totalorder %s9311_s17, %s11097_s0 }
  0x68   : > { %p8943_p8 = pnand %p8942_p6, %p8941_p5  ;;  %p8947_p2 = scmp.lt.u32.totalorder %s8945_s10, %s8940_s5 }
  0x69   : > { %p8949_p1 = scmp.lt.u32.totalorder %s8940_s5, %s9311_s17 }
  0x6a   : > { %p8944_p10 = pneg %p8943_p8  ;;  %p8948_p0 = por %p8947_p2, %p8946_p12 }
  0x6c   : > { %p8950_p3 = por %p8949_p1, %p8948_p0 }
  0x6e   : > { %p8951_p13 = pnand %p8950_p3, %p8944_p10 }
  0x70   : > { %8954 = shalt.err (!%p8951_p13)
}
  0x71   : > { %s8955_s16 = scalar_lea.vmem %s9329_s26, 5120  ;;  %s9104_s12 = smov [#allocation4]  }
  0x72   : > { %p8956_p7 = scmp.ne.s32.totalorder %s9329_s26, %s8955_s16  ;;  %s8960_s15 = sshll.u32 %s9104_s12, 4  ;;  %s8961_s15 = int_to_ptr.vmem [resolvable:$false] %s8960_s15 }
  0x73   : > { %s8962_s9 = scalar_lea.vmem %s8961_s15, 10240  ;;  %p8963_p5 = scmp.lt.s32.totalorder %s9329_s26, %s8961_s15 }
  0x74   : > { %p8958_p9 = pnand %p8956_p7, %p8942_p6  ;;  %p8964_p8 = scmp.lt.s32.totalorder %s8962_s9, %s8955_s16 }
  0x76   : > { %p8959_p11 = pneg %p8958_p9  ;;  %p8965_p12 = por %p8964_p8, %p8963_p5 }
  0x78   : > { %p8966_p2 = pnand %p8965_p12, %p8959_p11 }
  0x7a   : > { %8969 = shalt.err (!%p8966_p2)
}
  0x7b   : > { %s11141_s5 = smov 4   ;;  %s11142_s1 = smov 64  }
  0x7c   : > { %8278 = dma.hbm_to_vmem [thread:$0]  (!%p9325_p4), %s9311_s17, 5120, %s9329_s26, %s9331_s29, %s11142_s1, %s11142_s1, %s11141_s5  }
  0x7d   : > { %p11143_p6 = scmp.ne.s32.totalorder %s11133_s11, 0 }
  0x7e   : > { %s247_s21 = sand.u32 (!%p11143_p6), 1, %s9072_s22   ;;  %p11144_p10 = scmp.ne.s32.totalorder (!%p11143_p6), %s11128_s8, 0 }
  0x7f   : > { %245 = sbr.rel (%p11143_p6) target bundleno = 1272 (0x4f8), region = 40  ;;  %s248_s14 = scalar_lea.sflag (!%p11143_p6), [#allocation5], %s247_s21 }
  0x80   : > { %s9365_s10 = smul.u32 (!%p11143_p6), 320, %s247_s21 }
  0x82   : > { %s251_s30 = scalar_lea.vmem (!%p11143_p6), [#allocation4], %s9365_s10 }
  0x86   : > { %9043 = dma.done.wait (%p11144_p10), %s248_s14, 5120  }
  0x87   : > { %9045 = vsyncadd (%p11144_p10), %s248_s14, 4294962176  ;;  %p11145_p0 = scmp.ne.s32.totalorder %s11127_s6, 0 }
  0x89   : > { %9047 = dma.done.wait (%p11145_p0), [#allocation8], 36864  }
  0x8a   : > { %9049 = vsyncadd (%p11145_p0), [#allocation8], 4294930432  ;;  %v8388_v0 = vld [vmem:[#allocation7 + $0x4] ss:$12 sps:$4 sm:$0xff]   ;;  %v8390_v1 = vld [vmem:[#allocation7 + $0xc8] ss:$12 sps:$4 sm:$0xff]  }
  0x8b   : > { %3379 = vmatprep.subr.bf16.mxu0 %v8388_v0  ;;  %v8391_v2 = vld [vmem:[#allocation7] ss:$12 sps:$4 sm:$0xff]   ;;  %7428 = vmatprep.subr.bf16.mxu1 %v8390_v1  ;;  %v8392_v3 = vld [vmem:[#allocation7 + $0x8] ss:$12 sps:$4 sm:$0xff]   ;;  %v8396_v6 = vld [vmem:[#allocation7 + $0x18] ss:$12 sps:$4 sm:$0xff]  }
  0x8c   : > { %3380 = vmatpush1.bf16.msra.mxu0 %v8391_v2  ;;  %v8393_v4 = vld [vmem:[#allocation7 + $0x1c] ss:$12 sps:$4 sm:$0xff]   ;;  %7429 = vmatpush3.bf16.msra.mxu1 %v8392_v3  ;;  %v8395_v5 = vld [vmem:[#allocation7 + $0xe0] ss:$12 sps:$4 sm:$0xff]   ;;  %v8400_v9 = vld [vmem:[#allocation7 + $0xf8] ss:$12 sps:$4 sm:$0xff]  }
  0x8d   : > { %3381 = vmatprep.subr.bf16.mxu0 %v8393_v4  ;;  %v8397_v7 = vld [vmem:[#allocation7 + $0x20] ss:$12 sps:$4 sm:$0xff]   ;;  %7430 = vmatprep.subr.bf16.mxu1 %v8395_v5  ;;  %v8401_v10 = vld [vmem:[#allocation7 + $0x30] ss:$12 sps:$4 sm:$0xff]   ;;  %v8402_v11 = vld [vmem:[#allocation7 + $0x38] ss:$12 sps:$4 sm:$0xff]  }
  0x8e   : > { %v8398_v8 = vld [vmem:[#allocation7 + $0x34] ss:$12 sps:$4 sm:$0xff]   ;;  %v8403_v12 = vld [vmem:[#allocation7 + $0x4c] ss:$12 sps:$4 sm:$0xff]   ;;  %v8405_v13 = vld [vmem:[#allocation7 + $0x110] ss:$12 sps:$4 sm:$0xff]  }
  0x8f   : > { %v8406_v14 = vld [vmem:[#allocation7 + $0x48] ss:$12 sps:$4 sm:$0xff]   ;;  %v8407_v15 = vld [vmem:[#allocation7 + $0x50] ss:$12 sps:$4 sm:$0xff]   ;;  %v8411_v18 = vld [vmem:[#allocation7 + $0x60] ss:$12 sps:$4 sm:$0xff]  }
  0x90   : > { %3382 = vmatpush1.bf16.msra.mxu0 %v8396_v6  ;;  %7431 = vmatpush3.bf16.msra.mxu1 %v8397_v7  ;;  %v8408_v16 = vld [vmem:[#allocation7 + $0x64] ss:$12 sps:$4 sm:$0xff]   ;;  %v8410_v17 = vld [vmem:[#allocation7 + $0x128] ss:$12 sps:$4 sm:$0xff]   ;;  %v8415_v21 = vld [vmem:[#allocation7 + $0x140] ss:$12 sps:$4 sm:$0xff]  }
  0x91   : > { %3383 = vmatprep.subr.bf16.mxu0 %v8398_v8  ;;  %7432 = vmatprep.subr.bf16.mxu1 %v8400_v9  ;;  %v8412_v19 = vld [vmem:[#allocation7 + $0x68] ss:$12 sps:$4 sm:$0xff]   ;;  %v8416_v22 = vld [vmem:[#allocation7 + $0x78] ss:$12 sps:$4 sm:$0xff]   ;;  %v8417_v23 = vld [vmem:[#allocation7 + $0x80] ss:$12 sps:$4 sm:$0xff]  }
  0x92   : > { %v8413_v20 = vld [vmem:[#allocation7 + $0x7c] ss:$12 sps:$4 sm:$0xff]   ;;  %s7425_s26 = sshll.u32 %s9080_s24, 7  ;;  %v8418_v24 = vld [vmem:[#allocation7 + $0x94] ss:$12 sps:$4 sm:$0xff]   ;;  %s283_s17 = sand.u32 1, %s9060_s19  }
  0x93   : > { %v8420_v25 = vld [vmem:[#allocation7 + $0x158] ss:$12 sps:$4 sm:$0xff]   ;;  %s9379_s6 = scalar_lea.vmem %s251_s30, %s7425_s26 [#allocation4]  ;;  %v8421_v26 = vld [vmem:[#allocation7 + $0x90] ss:$12 sps:$4 sm:$0xff]   ;;  %v8426_v33 = vld [vmem:[#allocation7 + $0xa8] ss:$12 sps:$4 sm:$0xff]  }
  0x94   : > { %3384 = vmatpush1.bf16.msra.mxu0 %v8401_v10  ;;  %7433 = vmatpush3.bf16.msra.mxu1 %v8402_v11  ;;  %v8422_v27 = vld [vmem:[#allocation7 + $0x98] ss:$12 sps:$4 sm:$0xff]   ;;  %v8425_v29 = vld [vmem:[#allocation7 + $0x170] ss:$12 sps:$4 sm:$0xff]   ;;  %v293_v31 = vld [vmem:[%s9379_s6 + $0x4] sm:$0xf] }
  0x95   : > { %3385 = vmatprep.subr.bf16.mxu0 %v8403_v12  ;;  %7434 = vmatprep.subr.bf16.mxu1 %v8405_v13  ;;  %v8423_v28 = vld [vmem:[#allocation7 + $0xac] ss:$12 sps:$4 sm:$0xff]   ;;  %v292_v30 = vld [vmem:[%s9379_s6] sm:$0xf]  ;;  %v296_v44 = vld [vmem:[%s9379_s6 + $0x10] sm:$0xf] }
  0x96   : > { %v294_v32 = vld [vmem:[%s9379_s6 + $0x8] sm:$0xf]  ;;  %v8427_v34 = vld [vmem:[#allocation7 + $0xb0] ss:$12 sps:$4 sm:$0xff]   ;;  %v6924_v35 = vcombine.low %v292_v30, %v293_v31  ;;  %v8433_v43 = vld [vmem:[#allocation7 + $0xc0] ss:$12 sps:$4 sm:$0xff]  }
  0x97   : > { %v6925_v36 = vcombine.low %v294_v32, %v294_v32  ;;  %v9384_v37 = vcombine.low %v293_v31, %v294_v32  ;;  %v8431_v38 = vld [vmem:[#allocation7 + $0xc4] ss:$12 sps:$4 sm:$0xff]   ;;  %v298_v50 = vld [vmem:[%s9379_s6 + $0x18] sm:$0xf]  ;;  %vm412_vm0 = vsmask.f32 4352 }
  0x98   : > { %3386 = vmatpush1.bf16.msra.mxu0 %v8406_v14  ;;  %7435 = vmatpush3.bf16.msra.mxu1 %v8407_v15  ;;  %v414_v39 = vshrl.u32 %v6924_v35, 16  ;;  %v417_v40 = vshll.u32 %v6924_v35, 16  ;;  %v297_v45 = vld [vmem:[%s9379_s6 + $0x14] sm:$0xf]  ;;  %v8434_v51 = vld [vmem:[#allocation7 + $0xdc] ss:$12 sps:$4 sm:$0xff]   ;;  %v6927_v53 = vcombine.low %v298_v50, %v298_v50 }
  0x99   : > { %3387 = vmatprep.subr.bf16.mxu0 %v8408_v16  ;;  %7436 = vmatprep.subr.bf16.mxu1 %v8410_v17  ;;  %v422_v41 = vshrl.u32 %v6925_v36, 16  ;;  %v425_v42 = vshll.u32 %v6925_v36, 16  ;;  %v6926_v52 = vcombine.low %v296_v44, %v297_v45  ;;  %v9391_v54 = vcombine.low %v297_v45, %v298_v50  ;;  %v8436_v57 = vld [vmem:[#allocation7 + $0xd8] ss:$12 sps:$4 sm:$0xff]   ;;  %v8440_v63 = vld [vmem:[#allocation7 + $0xf4] ss:$12 sps:$4 sm:$0xff]  }
  0x9a   : > { %4036 = vmatprep.mubr.bf16.mxu1 %v9384_v37  ;;  %3411 = vmatprep.mubr.bf16.mxu0 %v9384_v37  ;;  %v416_v46 = vrot.slane %v414_v39, 3  ;;  %v419_v47 = vrot.slane %v417_v40, 4  ;;  %v439_v60 = vshrl.u32 %v6927_v53, 16  ;;  %v442_v61 = vshll.u32 %v6927_v53, 16  ;;  %v300_v0 = vld [vmem:[%s9379_s6 + $0x20] sm:$0xf] }
  0x9b   : > { %v424_v48 = vrot.slane %v422_v41, 3  ;;  %v427_v49 = vrot.slane %v425_v42, 4  ;;  %v431_v58 = vshrl.u32 %v6926_v52, 16  ;;  %v434_v59 = vshll.u32 %v6926_v52, 16  ;;  %v301_v1 = vld [vmem:[%s9379_s6 + $0x24] sm:$0xf] }
  0x9c   : > { %3388 = vmatpush1.bf16.msra.mxu0 %v8411_v18  ;;  %7437 = vmatpush3.bf16.msra.mxu1 %v8412_v19  ;;  %v420_v55 = vor.u32 %v419_v47, %v416_v46  ;;  %v441_v4 = vrot.slane %v439_v60, 3  ;;  %v444_v5 = vrot.slane %v442_v61, 4  ;;  %v302_v6 = vld [vmem:[%s9379_s6 + $0x28] sm:$0xf]  ;;  %v6928_v7 = vcombine.low %v300_v0, %v301_v1  ;;  %v8442_v12 = vld [vmem:[#allocation7 + $0xf0] ss:$12 sps:$4 sm:$0xff]  }
  0x9d   : > { %3389 = vmatprep.subr.bf16.mxu0 %v8413_v20  ;;  %7438 = vmatprep.subr.bf16.mxu1 %v8415_v21  ;;  %v428_v56 = vor.u32 %v427_v49, %v424_v48  ;;  %v433_v2 = vrot.slane %v431_v58, 3  ;;  %v436_v3 = vrot.slane %v434_v59, 4  ;;  %v6929_v8 = vcombine.low %v302_v6, %v302_v6  ;;  %v8443_v18 = vld [vmem:[#allocation7 + $0x10c] ss:$12 sps:$4 sm:$0xff]   ;;  %v304_v19 = vld [vmem:[%s9379_s6 + $0x30] sm:$0xf] }
  0x9e   : > { %v9401_v9 = vcombine.low %v301_v1, %v302_v6  ;;  %v445_v11 = vor.u32 %v444_v5, %v441_v4  ;;  %v448_v13 = vshrl.u32 %v6928_v7, 16  ;;  %v451_v14 = vshll.u32 %v6928_v7, 16  ;;  %v305_v20 = vld [vmem:[%s9379_s6 + $0x34] sm:$0xf]  ;;  %v308_v39 = vld [vmem:[%s9379_s6 + $0x40] sm:$0xf] }
  0x9f   : > { %v9394_v62 = vsel %vm412_vm0, %v420_v55, %v428_v56  ;;  %v437_v10 = vor.u32 %v436_v3, %v433_v2  ;;  %v456_v15 = vshrl.u32 %v6929_v8, 16  ;;  %v459_v16 = vshll.u32 %v6929_v8, 16  ;;  %v8449_v32 = vld [vmem:[#allocation7 + $0x124] ss:$12 sps:$4 sm:$0xff]   ;;  %v309_v40 = vld [vmem:[%s9379_s6 + $0x44] sm:$0xf] }
  0xa0   : > { %3390 = vmatpush1.bf16.msra.mxu0 %v8416_v22  ;;  %7439 = vmatpush3.bf16.msra.mxu1 %v8417_v23  ;;  %v450_v21 = vrot.slane %v448_v13, 3  ;;  %v453_v22 = vrot.slane %v451_v14, 4  ;;  %v310_v45 = vld [vmem:[%s9379_s6 + $0x48] sm:$0xf]  ;;  %v8451_v46 = vld [vmem:[#allocation7 + $0x120] ss:$12 sps:$4 sm:$0xff]   ;;  %v6932_v47 = vcombine.low %v308_v39, %v309_v40 }
  0xa1   : > { %3391 = vmatprep.subr.bf16.mxu0 %v8418_v24  ;;  %7440 = vmatprep.subr.bf16.mxu1 %v8420_v25  ;;  %v9404_v17 = vsel %vm412_vm0, %v437_v10, %v445_v11  ;;  %v458_v23 = vrot.slane %v456_v15, 3  ;;  %v461_v24 = vrot.slane %v459_v16, 4  ;;  %v306_v25 = vld [vmem:[%s9379_s6 + $0x38] sm:$0xf]  ;;  %v6933_v48 = vcombine.low %v310_v45, %v310_v45  ;;  %v8454_v58 = vld [vmem:[#allocation7 + $0x138] ss:$12 sps:$4 sm:$0xff]  }
  0xa2   : > { %v454_v30 = vor.u32 %v453_v22, %v450_v21  ;;  %v9419_v49 = vcombine.low %v309_v40, %v310_v45  ;;  %v8452_v50 = vld [vmem:[#allocation7 + $0x13c] ss:$12 sps:$4 sm:$0xff]   ;;  %v482_v53 = vshrl.u32 %v6932_v47, 16  ;;  %v485_v55 = vshll.u32 %v6932_v47, 16  ;;  %v312_v60 = vld [vmem:[%s9379_s6 + $0x50] sm:$0xf] }
  0xa3   : > { %v462_v31 = vor.u32 %v461_v24, %v458_v23  ;;  %v490_v56 = vshrl.u32 %v6933_v48, 16  ;;  %v313_v61 = vld [vmem:[%s9379_s6 + $0x54] sm:$0xf]  ;;  %v314_v3 = vld [vmem:[%s9379_s6 + $0x58] sm:$0xf]  ;;  %v667_v8 = vshll.u32 %v9384_v37, 16 }
  0xa4   : > { %3392 = vmatpush1.bf16.msra.mxu0 %v8421_v26  ;;  %7441 = vmatpush3.bf16.msra.mxu1 %v8422_v27  ;;  %v6930_v26 = vcombine.low %v304_v19, %v305_v20  ;;  %v6931_v27 = vcombine.low %v306_v25, %v306_v25  ;;  %v487_v0 = vrot.slane %v485_v55, 4  ;;  %v8458_v4 = vld [vmem:[#allocation7 + $0x154] ss:$12 sps:$4 sm:$0xff]   ;;  %v6934_v5 = vcombine.low %v312_v60, %v313_v61  ;;  %v321_v60 = vld [vmem:[%s9379_s6 + $0x74] sm:$0xf]  ;;  %s8253_s13 = smul.u32 384, %s283_s17 }
  0xa5   : > { %3393 = vmatprep.subr.bf16.mxu0 %v8423_v28  ;;  %7442 = vmatprep.subr.bf16.mxu1 %v8425_v29  ;;  %v9409_v28 = vcombine.low %v305_v20, %v306_v25  ;;  %v8445_v29 = vld [vmem:[#allocation7 + $0x108] ss:$12 sps:$4 sm:$0xff]   ;;  %v492_v1 = vrot.slane %v490_v56, 3  ;;  %v6935_v6 = vcombine.low %v314_v3, %v314_v3  ;;  %v9428_v7 = vcombine.low %v313_v61, %v314_v3  ;;  %v316_v20 = vld [vmem:[%s9379_s6 + $0x60] sm:$0xf]  ;;  %p7344_p4 = scmp.ne.s32.totalorder %s9080_s24, 0 }
  0xa6   : > { %v473_v35 = vshrl.u32 %v6931_v27, 16  ;;  %v476_v36 = vshll.u32 %v6931_v27, 16  ;;  %v499_v13 = vshrl.u32 %v6934_v5, 16  ;;  %v502_v14 = vshll.u32 %v6934_v5, 16  ;;  %v317_v21 = vld [vmem:[%s9379_s6 + $0x64] sm:$0xf] }
  0xa7   : > { %v507_v15 = vshrl.u32 %v6935_v6, 16  ;;  %v510_v16 = vshll.u32 %v6935_v6, 16  ;;  %v8463_v27 = vld [vmem:[#allocation7 + $0x168] ss:$12 sps:$4 sm:$0xff]   ;;  %v8495_v3 = vld [vmem:[#allocation7 + $0x278] ss:$12 sps:$4 sm:$0xff]  }
  0xa8   : > { %3394 = vmatpush1.bf16.msra.mxu0 %v8426_v33  ;;  %7443 = vmatpush3.bf16.msra.mxu1 %v8427_v34  ;;  %v465_v33 = vshrl.u32 %v6930_v26, 16  ;;  %v468_v34 = vshll.u32 %v6930_v26, 16  ;;  %v478_v44 = vrot.slane %v476_v36, 4  ;;  %v501_v22 = vrot.slane %v499_v13, 3  ;;  %v318_v26 = vld [vmem:[%s9379_s6 + $0x68] sm:$0xf] }
  0xa9   : > { %3395 = vmatprep.subr.bf16.mxu0 %v8431_v38  ;;  %v9414_v38 = vsel %vm412_vm0, %v454_v30, %v462_v31  ;;  %v504_v23 = vrot.slane %v502_v14, 4  ;;  %v509_v24 = vrot.slane %v507_v15, 3  ;;  %v512_v25 = vrot.slane %v510_v16, 4  ;;  %v322_v61 = vld [vmem:[%s9379_s6 + $0x78] sm:$0xf]  ;;  %s10363_s29 = scalar_lea.vmem [#allocation10], %s8253_s13 }
  0xaa   : > { %v467_v41 = vrot.slane %v465_v33, 3  ;;  %v470_v42 = vrot.slane %v468_v34, 4  ;;  %v6937_v30 = vcombine.low %v318_v26, %v318_v26  ;;  %v9438_v31 = vcombine.low %v317_v21, %v318_v26  ;;  %v8470_v5 = vld [vmem:[#allocation7 + $0x198] ss:$12 sps:$4 sm:$0xff]   ;;  %v8478_v6 = vld [vmem:[#allocation7 + $0x1b4] ss:$12 sps:$4 sm:$0xff]  }
  0xab   : > { %4037 = vmatmul.mubr.bf16.vlgmr.msra.gmra.mrb[0].mxu1 %v9394_v62  ;;  %v505_v33 = vor.u32 %v504_v23, %v501_v22  ;;  %v513_v34 = vor.u32 %v512_v25, %v509_v24  ;;  %v8499_v15 = vld [vmem:[#allocation7 + $0x1b8] ss:$12 sps:$4 sm:$0xff]   ;;  %v8476_v22 = vld [vmem:[#allocation7 + $0x1b0] ss:$12 sps:$4 sm:$0xff]   ;;  %v677_v24 = vshrl.u32 %v9391_v54, 16 }
  0xac   : > { %3396 = vmatpush1.bf16.msra.mxu0 %v8433_v43  ;;  %4044 = vmatprep.mubr.bf16.mxu1 %v9391_v54  ;;  %v475_v43 = vrot.slane %v473_v35, 3  ;;  %v8486_v35 = vld [vmem:[#allocation7 + $0x188] ss:$12 sps:$4 sm:$0xff]   ;;  %v524_v40 = vshrl.u32 %v6937_v30, 16  ;;  %v8481_v26 = vld [vmem:[#allocation7 + $0x1cc] ss:$12 sps:$4 sm:$0xff]  }
  0xad   : > { %3397 = vmatprep.subr.bf16.mxu0 %v8434_v51  ;;  %v471_v51 = vor.u32 %v470_v42, %v467_v41  ;;  %v527_v41 = vshll.u32 %v6937_v30, 16  ;;  %v665_v42 = vshrl.u32 %v9384_v37, 16  ;;  %v9445_v45 = vsel %vm412_vm0, %v505_v33, %v513_v34  ;;  %v8479_v30 = vld [vmem:[#allocation7 + $0x1c8] ss:$12 sps:$4 sm:$0xff]   ;;  %v326_v33 = vld [vmem:[%s9379_s6 + $0x88] sm:$0xf] }
  0xae   : > { %v479_v52 = vor.u32 %v478_v44, %v475_v43  ;;  %v9441_v43 = vrot.slane %v667_v8, 1  ;;  %v8469_v44 = vld [vmem:[#allocation7 + $0x184] ss:$12 sps:$4 sm:$0xff]   ;;  %vm663_vm1 = vsmask.f32 7424 }
  0xaf   : > { %v6971_v37 = vld [vmem:[%s9379_s6 + $0x24] sm:$0xf] }
  0xb0   : > { %3398 = vmatpush1.bf16.msra.mxu0 %v8436_v57  ;;  %v493_v57 = vshll.u32 %v6933_v48, 16  ;;  %v9422_v59 = vsel %vm412_vm0, %v471_v51, %v479_v52  ;;  %v529_v51 = vrot.slane %v527_v41, 4  ;;  %v8472_v52 = vld [vmem:[#allocation7 + $0x19c] ss:$12 sps:$4 sm:$0xff]  }
  0xb1   : > { %3399 = vmatprep.subr.bf16.mxu0 %v8440_v63  ;;  %v484_v63 = vrot.slane %v482_v53, 3  ;;  %v8490_v53 = vld [vmem:[#allocation7 + $0x260] ss:$12 sps:$4 sm:$0xff]  }
  0xb2   : > { %v495_v2 = vrot.slane %v493_v57, 4  ;;  %v8491_v57 = vld [vmem:[#allocation7 + $0x1a0] ss:$12 sps:$4 sm:$0xff]  }
  0xb3   : > { %4045 = vmatmul.mubr.bf16.gmra.mrb[4].mxu1 %v9404_v17  ;;  %v488_v10 = vor.u32 %v487_v0, %v484_v63 }
  0xb4   : > { %3400 = vmatpush1.bf16.msra.mxu0 %v8442_v12  ;;  %4052 = vmatprep.mubr.bf16.mxu1 %v9401_v9  ;;  %v496_v11 = vor.u32 %v495_v2, %v492_v1  ;;  %v8460_v12 = vld [vmem:[#allocation7 + $0x150] ss:$12 sps:$4 sm:$0xff]   ;;  %v6939_v1 = vcombine.low %v322_v61, %v322_v61  ;;  %v9454_v2 = vcombine.low %v321_v60, %v322_v61  ;;  %v8514_v61 = vld [vmem:[#allocation7 + $0x200] ss:$12 sps:$4 sm:$0xff]  }
  0xb5   : > { %3401 = vmatprep.subr.bf16.mxu0 %v8443_v18  ;;  %v8461_v18 = vld [vmem:[#allocation7 + $0x16c] ss:$12 sps:$4 sm:$0xff]  }
  0xb6   : > { %v9433_v19 = vsel %vm412_vm0, %v488_v10, %v496_v11  ;;  %v541_v11 = vshrl.u32 %v6939_v1, 16 }
  0xb8   : > { %3402 = vmatpush1.bf16.msra.mxu0 %v8445_v29  ;;  %v6936_v29 = vcombine.low %v316_v20, %v317_v21  ;;  %v543_v16 = vrot.slane %v541_v11, 3  ;;  %v8501_v21 = vld [vmem:[#allocation7 + $0x1d0] ss:$12 sps:$4 sm:$0xff]  }
  0xb9   : > { %3403 = vmatprep.subr.bf16.mxu0 %v8449_v32  ;;  %v8485_v32 = vld [vmem:[#allocation7 + $0x248] ss:$12 sps:$4 sm:$0xff]  }
  0xba   : > { %v516_v36 = vshrl.u32 %v6936_v29, 16  ;;  %v519_v39 = vshll.u32 %v6936_v29, 16  ;;  %7504 = vmatprep.subr.bf16.mxu1 %v8485_v32  ;;  %v325_v29 = vld [vmem:[%s9379_s6 + $0x84] sm:$0xf] }
  0xbb   : > { %4053 = vmatmul.mubr.bf16.gmra.mrb[8].mxu1 %v9414_v38 }
  0xbc   : > { %3404 = vmatpush1.bf16.msra.mxu0 %v8451_v46  ;;  %4060 = vmatprep.mubr.bf16.mxu1 %v9409_v28  ;;  %v8467_v46 = vld [vmem:[#allocation7 + $0x180] ss:$12 sps:$4 sm:$0xff]   ;;  %v518_v47 = vrot.slane %v516_v36, 3  ;;  %v521_v48 = vrot.slane %v519_v39, 4  ;;  %v9471_v36 = vcombine.low %v325_v29, %v326_v33  ;;  %v8508_v39 = vld [vmem:[#allocation7 + $0x2a8] ss:$12 sps:$4 sm:$0xff]  }
  0xbd   : > { %3405 = vmatprep.subr.bf16.mxu0 %v8452_v50  ;;  %v526_v50 = vrot.slane %v524_v40, 3  ;;  %7505 = vmatpush3.bf16.msra.mxu1 %v8486_v35  ;;  %v6941_v35 = vcombine.low %v326_v33, %v326_v33  ;;  %v715_v33 = vshll.u32 %v9419_v49, 16 }
  0xbe   : > { %v522_v55 = vor.u32 %v521_v48, %v518_v47  ;;  %7506 = vmatprep.subr.bf16.mxu1 %v8490_v53 }
  0xbf   : > { %v530_v56 = vor.u32 %v529_v51, %v526_v50  ;;  %v558_v47 = vshrl.u32 %v6941_v35, 16  ;;  %v561_v48 = vshll.u32 %v6941_v35, 16  ;;  %v691_v50 = vshll.u32 %v9401_v9, 16  ;;  %v8487_v51 = vld [vmem:[#allocation7 + $0x1e0] ss:$12 sps:$4 sm:$0xff]  }
  0xc0   : > { %3406 = vmatpush1.bf16.msra.mxu0 %v8454_v58  ;;  %v320_v58 = vld [vmem:[%s9379_s6 + $0x70] sm:$0xf] }
  0xc1   : > { %3407 = vmatprep.subr.bf16.mxu0 %v8458_v4  ;;  %v6938_v63 = vcombine.low %v320_v58, %v321_v60  ;;  %v9452_v0 = vsel %vm412_vm0, %v522_v55, %v530_v56  ;;  %7507 = vmatpush3.bf16.msra.mxu1 %v8491_v57  ;;  %v679_v4 = vshll.u32 %v9391_v54, 16  ;;  %v8498_v55 = vld [vmem:[#allocation7 + $0x1fc] ss:$12 sps:$4 sm:$0xff]   ;;  %v560_v56 = vrot.slane %v558_v47, 3  ;;  %v8513_v58 = vld [vmem:[#allocation7 + $0x2c0] ss:$12 sps:$4 sm:$0xff]  }
  0xc2   : > { %7508 = vmatprep.subr.bf16.mxu1 %v8495_v3  ;;  %v563_v57 = vrot.slane %v561_v48, 4  ;;  %v329_v3 = vld [vmem:[%s9379_s6 + $0x94] sm:$0xf] }
  0xc3   : > { %4061 = vmatmul.mubr.bf16.gmra.mrb[12].mxu1 %v9422_v59  ;;  %v533_v8 = vshrl.u32 %v6938_v63, 16  ;;  %v536_v10 = vshll.u32 %v6938_v63, 16  ;;  %v9462_v25 = vrot.slane %v679_v4, 1  ;;  %v328_v63 = vld [vmem:[%s9379_s6 + $0x90] sm:$0xf] }
  0xc4   : > { %3408 = vmatpush1.bf16.msra.mxu0 %v8460_v12  ;;  %4068 = vmatprep.mubr.bf16.mxu1 %v9419_v49  ;;  %v544_v12 = vshll.u32 %v6939_v1, 16  ;;  %v564_v1 = vor.u32 %v563_v57, %v560_v56  ;;  %v330_v4 = vld [vmem:[%s9379_s6 + $0x98] sm:$0xf]  ;;  %v6967_v48 = vld [vmem:[%s9379_s6 + $0x14] sm:$0xf]  ;;  %v9507_v56 = vrot.slane %v715_v33, 1 }
  0xc5   : > { %3409 = vmatprep.subr.bf16.mxu0 %v8461_v18  ;;  %v535_v13 = vrot.slane %v533_v8, 3  ;;  %v538_v14 = vrot.slane %v536_v10, 4  ;;  %v8500_v18 = vld [vmem:[#allocation7 + $0x290] ss:$12 sps:$4 sm:$0xff]   ;;  %7509 = vmatpush3.bf16.msra.mxu1 %v8499_v15  ;;  %v6942_v8 = vcombine.low %v328_v63, %v329_v3  ;;  %v6943_v10 = vcombine.low %v330_v4, %v330_v4  ;;  %v8521_v15 = vld [vmem:[#allocation7 + $0x2d8] ss:$12 sps:$4 sm:$0xff]  }
  0xc6   : > { %7510 = vmatprep.subr.bf16.mxu1 %v8500_v18  ;;  %v9483_v11 = vcombine.low %v329_v3, %v330_v4  ;;  %v8510_v57 = vld [vmem:[#allocation7 + $0x228] ss:$12 sps:$4 sm:$0xff]   ;;  %v8518_v4 = vld [vmem:[#allocation7 + $0x240] ss:$12 sps:$4 sm:$0xff]   ;;  %v682_v33 = vor.u32 %v9462_v25, %v677_v24 }
  0xc7   : > { %v539_v20 = vor.u32 %v538_v14, %v535_v13  ;;  %v8504_v13 = vld [vmem:[#allocation7 + $0x214] ss:$12 sps:$4 sm:$0xff]   ;;  %v575_v18 = vshrl.u32 %v6943_v10, 16 }
  0xc8   : > { %3410 = vmatpush1.bf16.msra.mxu0 %v8463_v27  ;;  %v324_v27 = vld [vmem:[%s9379_s6 + $0x80] sm:$0xf] }
  0xc9   : > { %3504 = vmatprep.subr.bf16.mxu0 %v8469_v44  ;;  %v6940_v34 = vcombine.low %v324_v27, %v325_v29  ;;  %7511 = vmatpush3.bf16.msra.mxu1 %v8501_v21  ;;  %v8509_v44 = vld [vmem:[#allocation7 + $0x1e8] ss:$12 sps:$4 sm:$0xff]   ;;  %v8522_v21 = vld [vmem:[#allocation7 + $0x218] ss:$12 sps:$4 sm:$0xff]   ;;  %v8523_v29 = vld [vmem:[#allocation7 + $0x2f0] ss:$12 sps:$4 sm:$0xff]  }
  0xca   : > { %7512 = vmatprep.subr.bf16.mxu1 %v8508_v39 }
  0xcb   : > { %3412 = vmatmul.mubr.bf16.vlgmr.msra.gmra.mrb[0].mxu0 %v9394_v62  ;;  %4069 = vmatmul.mubr.bf16.gmra.mrb[16].mxu1 %v9433_v19  ;;  %v546_v62 = vrot.slane %v544_v12, 4  ;;  %v550_v40 = vshrl.u32 %v6940_v34, 16  ;;  %v553_v41 = vshll.u32 %v6940_v34, 16  ;;  %v703_v12 = vshll.u32 %v9409_v28, 16  ;;  %v8512_v34 = vld [vmem:[#allocation7 + $0x22c] ss:$12 sps:$4 sm:$0xff]  }
  0xcc   : > { %3505 = vmatpush1.bf16.msra.mxu0 %v8467_v46  ;;  %3417 = vmatprep.mubr.bf16.mxu0 %v9391_v54  ;;  %v8489_v46 = vld [vmem:[#allocation7 + $0x1e4] ss:$12 sps:$4 sm:$0xff]   ;;  %v6976_v54 = vld [vmem:[%s9379_s6 + $0x38] sm:$0xf] }
  0xcd   : > { %3506 = vmatprep.subr.bf16.mxu0 %v8472_v52  ;;  %4076 = vmatprep.mubr.bf16.mxu1 %v9428_v7  ;;  %v547_v23 = vor.u32 %v546_v62, %v543_v16  ;;  %v552_v52 = vrot.slane %v550_v40, 3  ;;  %v555_v53 = vrot.slane %v553_v41, 4  ;;  %v567_v16 = vshrl.u32 %v6942_v8, 16 }
  0xce   : > { %7513 = vmatpush3.bf16.msra.mxu1 %v8509_v44  ;;  %v570_v62 = vshll.u32 %v6942_v8, 16  ;;  %v9495_v40 = vrot.slane %v703_v12, 1  ;;  %v727_v41 = vshll.u32 %v9428_v7, 16  ;;  %v8527_v44 = vld [vmem:[#allocation7 + $0x230] ss:$12 sps:$4 sm:$0xff]   ;;  %v737_v12 = vshrl.u32 %v9438_v31, 16 }
  0xcf   : > { %v9467_v32 = vsel %vm412_vm0, %v539_v20, %v547_v23  ;;  %v556_v60 = vor.u32 %v555_v53, %v552_v52  ;;  %7514 = vmatprep.subr.bf16.mxu1 %v8513_v58  ;;  %v578_v20 = vshll.u32 %v6943_v10, 16  ;;  %v8530_v53 = vld [vmem:[%s9379_s6 + $0xc] ss:$0 sps:$4 sm:$0xff]   ;;  %v8520_v58 = vld [vmem:[#allocation7 + $0x244] ss:$12 sps:$4 sm:$0xff]  }
  0xd0   : > { %3507 = vmatpush1.bf16.msra.mxu0 %v8470_v5  ;;  %v9481_v5 = vrot.slane %v691_v50, 1  ;;  %v572_v23 = vrot.slane %v570_v62, 4  ;;  %v6968_v50 = vld [vmem:[%s9379_s6 + $0x18] sm:$0xf]  ;;  %v672_v8 = vshll.u32 %v8530_v53, 16  ;;  %v9518_v10 = vrot.slane %v727_v41, 1 }
  0xd1   : > { %3508 = vmatprep.subr.bf16.mxu0 %v8478_v6  ;;  %v8496_v6 = vld [vmem:[#allocation7 + $0x1f8] ss:$12 sps:$4 sm:$0xff]   ;;  %v9488_v14 = vsel %vm412_vm0, %v556_v60, %v564_v1  ;;  %v580_v27 = vrot.slane %v578_v20, 4  ;;  %v7007_v52 = vcombine.low %v6968_v50, %v6968_v50  ;;  %v725_v60 = vshrl.u32 %v9428_v7, 16 }
  0xd2   : > { %7515 = vmatpush3.bf16.msra.mxu1 %v8514_v61  ;;  %v9511_v61 = vcombine.low %v6967_v48, %v6968_v50  ;;  %v674_v20 = vrot.slane %v672_v8, 1 }
  0xd3   : > { %3418 = vmatmul.mubr.bf16.gmra.mrb[4].mxu0 %v9404_v17  ;;  %4077 = vmatmul.mubr.bf16.gmra.mrb[20].mxu1 %v9445_v45  ;;  %v689_v17 = vshrl.u32 %v9401_v9, 16  ;;  %v937_v1 = vshrl.u32 %v7007_v52, 16  ;;  %v940_v3 = vshll.u32 %v7007_v52, 16  ;;  %v8545_v52 = vld [vmem:[%s9379_s6 + $0x2c] ss:$0 sps:$4 sm:$0xff]  }
  0xd4   : > { %3509 = vmatpush1.bf16.msra.mxu0 %v8476_v22  ;;  %3427 = vmatprep.mubr.bf16.mxu0 %v9401_v9  ;;  %v569_v22 = vrot.slane %v567_v16, 3  ;;  %1138 = vst [vmem:[#allocation2 + $0x20] sm:$0xff] %v9511_v61  ;;  %v7011_v9 = vcombine.low %v6976_v54, %v6976_v54 }
  0xd5   : > { %3510 = vmatprep.subr.bf16.mxu0 %v8481_v26  ;;  %4084 = vmatprep.mubr.bf16.mxu1 %v9438_v31  ;;  %v577_v26 = vrot.slane %v575_v18, 3  ;;  %v939_v16 = vrot.slane %v937_v1, 3  ;;  %v942_v62 = vrot.slane %v940_v3, 4  ;;  %v6970_v18 = vld [vmem:[%s9379_s6 + $0x20] sm:$0xf] }
  0xd6   : > { %7516 = vmatprep.subr.bf16.mxu1 %v8521_v15  ;;  %v573_v35 = vor.u32 %v572_v23, %v569_v22  ;;  %v7008_v22 = vcombine.low %v6970_v18, %v6971_v37  ;;  %v8531_v3 = vld [vmem:[#allocation7 + $0x270] ss:$12 sps:$4 sm:$0xff]   ;;  %v974_v8 = vshll.u32 %v7011_v9, 16 }
  0xd7   : > { %7517 = vmatpush3.bf16.msra.mxu1 %v8522_v21  ;;  %v581_v39 = vor.u32 %v580_v27, %v577_v26  ;;  %v6972_v21 = vld [vmem:[%s9379_s6 + $0x28] sm:$0xf]  ;;  %v8539_v26 = vld [vmem:[%s9379_s6 + $0x1c] ss:$0 sps:$4 sm:$0xff]  }
  0xd8   : > { %3511 = vmatpush1.bf16.msra.mxu0 %v8479_v30  ;;  %v701_v30 = vshrl.u32 %v9409_v28, 16  ;;  %7518 = vmatprep.subr.bf16.mxu1 %v8523_v29  ;;  %v7009_v23 = vcombine.low %v6972_v21, %v6972_v21  ;;  %v8524_v27 = vld [vmem:[#allocation7 + $0x258] ss:$12 sps:$4 sm:$0xff]   ;;  %v9537_v41 = vcombine.low %v6971_v37, %v6972_v21  ;;  %v684_v25 = vshll.u32 %v8539_v26, 16  ;;  %v6978_v37 = vld [vmem:[%s9379_s6 + $0x40] sm:$0xf] }
  0xd9   : > { %3512 = vmatprep.subr.bf16.mxu0 %v8489_v46  ;;  %v6966_v46 = vld [vmem:[%s9379_s6 + $0x10] sm:$0xf]  ;;  %v9500_v47 = vsel %vm412_vm0, %v573_v35, %v581_v39  ;;  %v6975_v35 = vld [vmem:[%s9379_s6 + $0x34] sm:$0xf]  ;;  %v694_v39 = vor.u32 %v9481_v5, %v689_v17  ;;  %v6980_v26 = vld [vmem:[%s9379_s6 + $0x48] sm:$0xf] }
  0xda   : > { %v954_v50 = vshrl.u32 %v7009_v23, 16  ;;  %v957_v24 = vshll.u32 %v7009_v23, 16  ;;  %1139 = vst [vmem:[#allocation2 + $0x68] sm:$0xff] %v9537_v41 }
  0xdb   : > { %3428 = vmatmul.mubr.bf16.gmra.mrb[8].mxu0 %v9414_v38  ;;  %4085 = vmatmul.mubr.bf16.gmra.mrb[24].mxu1 %v9452_v0  ;;  %v8502_v38 = vld [vmem:[#allocation7 + $0x210] ss:$12 sps:$4 sm:$0xff]  }
  0xdc   : > { %3513 = vmatpush1.bf16.msra.mxu0 %v8487_v51  ;;  %3437 = vmatprep.mubr.bf16.mxu0 %v9409_v28  ;;  %v7006_v51 = vcombine.low %v6966_v46, %v6967_v48  ;;  %v946_v46 = vshrl.u32 %v7008_v22, 16  ;;  %v949_v48 = vshll.u32 %v7008_v22, 16  ;;  %v956_v53 = vrot.slane %v954_v50, 3 }
  0xdd   : > { %3514 = vmatprep.subr.bf16.mxu0 %v8498_v55  ;;  %4092 = vmatprep.mubr.bf16.mxu1 %v9454_v2  ;;  %v713_v55 = vshrl.u32 %v9419_v49, 16 }
  0xde   : > { %7519 = vmatpush3.bf16.msra.mxu1 %v8527_v44  ;;  %v932_v63 = vshll.u32 %v7006_v51, 16  ;;  %v948_v17 = vrot.slane %v946_v46, 3  ;;  %v951_v5 = vrot.slane %v949_v48, 4  ;;  %v8542_v46 = vld [vmem:[#allocation7 + $0x2a4] ss:$12 sps:$4 sm:$0xff]  }
  0xe0   : > { %3515 = vmatpush1.bf16.msra.mxu0 %v8496_v6  ;;  %v670_v6 = vor.u32 %v9441_v43, %v665_v42  ;;  %v934_v15 = vrot.slane %v932_v63, 4  ;;  %v8526_v42 = vld [vmem:[#allocation7 + $0x25c] ss:$12 sps:$4 sm:$0xff]  }
  0xe1   : > { %3516 = vmatprep.subr.bf16.mxu0 %v8504_v13 }
  0xe2   : > { %v9527_v29 = vsel %vm663_vm1, %v670_v6, %v674_v20  ;;  %v971_v6 = vshrl.u32 %v7011_v9, 16 }
  0xe3   : > { %3438 = vmatmul.mubr.bf16.gmra.mrb[12].mxu0 %v9422_v59  ;;  %4093 = vmatmul.mubr.bf16.gmra.mrb[28].mxu1 %v9467_v32  ;;  %v929_v59 = vshrl.u32 %v7006_v51, 16 }
  0xe4   : > { %3447 = vmatprep.mubr.bf16.mxu0 %v9419_v49  ;;  %3517 = vmatpush1.bf16.msra.mxu0 %v8502_v38  ;;  %v943_v38 = vor.u32 %v942_v62, %v939_v16  ;;  %v973_v21 = vrot.slane %v971_v6, 3 }
  0xe5   : > { %3518 = vmatprep.subr.bf16.mxu0 %v8512_v34  ;;  %4100 = vmatprep.mubr.bf16.mxu1 %v9471_v36  ;;  %v931_v13 = vrot.slane %v929_v59, 3  ;;  %v6974_v34 = vld [vmem:[%s9379_s6 + $0x30] sm:$0xf]  ;;  %v686_v59 = vrot.slane %v684_v25, 1 }
  0xe6   : > { %v7010_v51 = vcombine.low %v6974_v34, %v6975_v35  ;;  %v8554_v34 = vld [vmem:[%s9379_s6 + $0x3c] ss:$0 sps:$4 sm:$0xff]  }
  0xe7   : > { %v935_v43 = vor.u32 %v934_v15, %v931_v13  ;;  %v696_v13 = vshll.u32 %v8545_v52, 16  ;;  %v8536_v15 = vld [vmem:[#allocation7 + $0x28c] ss:$12 sps:$4 sm:$0xff]   ;;  %v9553_v62 = vsel %vm663_vm1, %v682_v33, %v686_v59  ;;  %v706_v33 = vor.u32 %v9495_v40, %v701_v30  ;;  %v6982_v30 = vld [vmem:[%s9379_s6 + $0x50] sm:$0xf] }
  0xe8   : > { %3519 = vmatpush1.bf16.msra.mxu0 %v8510_v57  ;;  %v9548_v57 = vcombine.low %v6975_v35, %v6976_v54  ;;  %v963_v63 = vshrl.u32 %v7010_v51, 16  ;;  %v966_v1 = vshll.u32 %v7010_v51, 16  ;;  %v8534_v35 = vld [vmem:[#allocation7 + $0x288] ss:$12 sps:$4 sm:$0xff]   ;;  %v7013_v54 = vcombine.low %v6980_v26, %v6980_v26  ;;  %v6983_v52 = vld [vmem:[%s9379_s6 + $0x54] sm:$0xf] }
  0xe9   : > { %3520 = vmatprep.subr.bf16.mxu0 %v8520_v58  ;;  %v9541_v44 = vsel %vm412_vm0, %v935_v43, %v943_v38  ;;  %v959_v58 = vrot.slane %v957_v24, 4  ;;  %v698_v43 = vrot.slane %v696_v13, 1  ;;  %v6979_v38 = vld [vmem:[%s9379_s6 + $0x44] sm:$0xf]  ;;  %v739_v24 = vshll.u32 %v9438_v31, 16 }
  0xea   : > { %1140 = vst [vmem:[#allocation2 + $0xb0] sm:$0xff] %v9548_v57  ;;  %v965_v18 = vrot.slane %v963_v63, 3  ;;  %v968_v20 = vrot.slane %v966_v1, 4  ;;  %v708_v51 = vshll.u32 %v8554_v34, 16  ;;  %v9572_v40 = vcombine.low %v6979_v38, %v6980_v26  ;;  %v8540_v59 = vld [vmem:[#allocation7 + $0x2a0] ss:$12 sps:$4 sm:$0xff]  }
  0xeb   : > { %3448 = vmatmul.mubr.bf16.gmra.mrb[16].mxu0 %v9433_v19  ;;  %4101 = vmatmul.mubr.bf16.gmra.mrb[32].mxu1 %v9488_v14  ;;  %v8533_v19 = vld [vmem:[#allocation7 + $0x274] ss:$12 sps:$4 sm:$0xff]   ;;  %v960_v16 = vor.u32 %v959_v58, %v956_v53  ;;  %v9567_v50 = vsel %vm663_vm1, %v694_v39, %v698_v43  ;;  %v988_v39 = vshrl.u32 %v7013_v54, 16  ;;  %v991_v9 = vshll.u32 %v7013_v54, 16  ;;  %v8546_v43 = vld [vmem:[#allocation7 + $0x2b8] ss:$12 sps:$4 sm:$0xff]  }
  0xec   : > { %3457 = vmatprep.mubr.bf16.mxu0 %v9428_v7  ;;  %3521 = vmatpush1.bf16.msra.mxu0 %v8518_v4  ;;  %v952_v4 = vor.u32 %v951_v5, %v948_v17  ;;  %v969_v23 = vor.u32 %v968_v20, %v965_v18  ;;  %v710_v53 = vrot.slane %v708_v51, 1  ;;  %v7014_v58 = vcombine.low %v6982_v30, %v6983_v52  ;;  %v8548_v18 = vld [vmem:[#allocation7 + $0x2bc] ss:$12 sps:$4 sm:$0xff]   ;;  %v6986_v34 = vld [vmem:[%s9379_s6 + $0x60] sm:$0xf] }
  0xed   : > { %3522 = vmatprep.subr.bf16.mxu0 %v8526_v42  ;;  %4108 = vmatprep.mubr.bf16.mxu1 %v9483_v11  ;;  %v976_v42 = vrot.slane %v974_v8, 4  ;;  %1141 = vst [vmem:[#allocation2 + $0xf8] sm:$0xff] %v9572_v40  ;;  %v990_v63 = vrot.slane %v988_v39, 3  ;;  %v993_v1 = vrot.slane %v991_v9, 4  ;;  %v718_v26 = vor.u32 %v9507_v56, %v713_v55  ;;  %v6988_v54 = vld [vmem:[%s9379_s6 + $0x68] sm:$0xf] }
  0xee   : > { %v9558_v22 = vsel %vm412_vm0, %v952_v4, %v960_v16  ;;  %v9585_v8 = vsel %vm663_vm1, %v706_v33, %v710_v53  ;;  %v997_v13 = vshrl.u32 %v7014_v58, 16  ;;  %v8563_v16 = vld [vmem:[%s9379_s6 + $0x4c] ss:$0 sps:$4 sm:$0xff]   ;;  %v7017_v51 = vcombine.low %v6988_v54, %v6988_v54  ;;  %v8569_v30 = vld [vmem:[%s9379_s6 + $0x5c] ss:$0 sps:$4 sm:$0xff]  }
  0xef   : > { %v977_v48 = vor.u32 %v976_v42, %v973_v21  ;;  %v994_v20 = vor.u32 %v993_v1, %v990_v63  ;;  %v749_v42 = vshrl.u32 %v9454_v2, 16  ;;  %v8551_v55 = vld [vmem:[#allocation7 + $0x2d4] ss:$12 sps:$4 sm:$0xff]   ;;  %v741_v56 = vrot.slane %v739_v24, 1 }
  0xf0   : > { %3523 = vmatpush1.bf16.msra.mxu0 %v8524_v27  ;;  %v7012_v27 = vcombine.low %v6978_v37, %v6979_v38  ;;  %v999_v38 = vrot.slane %v997_v13, 3  ;;  %v751_v39 = vshll.u32 %v9454_v2, 16  ;;  %v1022_v53 = vshrl.u32 %v7017_v51, 16 }
  0xf1   : > { %3524 = vmatprep.subr.bf16.mxu0 %v8533_v19  ;;  %v6984_v19 = vld [vmem:[%s9379_s6 + $0x58] sm:$0xf]  ;;  %v1025_v24 = vshll.u32 %v7017_v51, 16  ;;  %v730_v63 = vor.u32 %v9518_v10, %v725_v60  ;;  %v732_v1 = vshll.u32 %v8569_v30, 16 }
  0xf2   : > { %v980_v25 = vshrl.u32 %v7012_v27, 16  ;;  %v983_v28 = vshll.u32 %v7012_v27, 16  ;;  %v9582_v4 = vcombine.low %v6983_v52, %v6984_v19  ;;  %v720_v27 = vshll.u32 %v8563_v16, 16  ;;  %v8549_v52 = vld [vmem:[#allocation7 + $0x2d0] ss:$12 sps:$4 sm:$0xff]  }
  0xf3   : > { %3458 = vmatmul.mubr.bf16.gmra.mrb[20].mxu0 %v9445_v45  ;;  %4109 = vmatmul.mubr.bf16.gmra.mrb[36].mxu1 %v9500_v47  ;;  %v9576_v45 = vsel %vm412_vm0, %v969_v23, %v977_v48  ;;  %v6987_v48 = vld [vmem:[%s9379_s6 + $0x64] sm:$0xf]  ;;  %v6991_v16 = vld [vmem:[%s9379_s6 + $0x74] sm:$0xf] }
  0xf4   : > { %3467 = vmatprep.mubr.bf16.mxu0 %v9438_v31  ;;  %3525 = vmatpush1.bf16.msra.mxu0 %v8531_v3  ;;  %v982_v17 = vrot.slane %v980_v25, 3  ;;  %v985_v5 = vrot.slane %v983_v28, 4  ;;  %v7015_v3 = vcombine.low %v6984_v19, %v6984_v19  ;;  %1142 = vst [vmem:[#allocation2 + $0x140] sm:$0xff] %v9582_v4  ;;  %v722_v28 = vrot.slane %v720_v27, 1  ;;  %v8580_v30 = vld [vmem:[#allocation7 + $0x308] ss:$12 sps:$4 sm:$0xff]  }
  0xf5   : > { %3526 = vmatprep.subr.bf16.mxu0 %v8536_v15  ;;  %4149 = vmatprep.mubr.bf16.mxu1 %v9541_v44  ;;  %v1000_v15 = vshll.u32 %v7014_v58, 16  ;;  %v7016_v49 = vcombine.low %v6986_v34, %v6987_v48  ;;  %v9604_v9 = vcombine.low %v6987_v48, %v6988_v54  ;;  %v8557_v58 = vld [vmem:[#allocation7 + $0x2ec] ss:$12 sps:$4 sm:$0xff]   ;;  %v742_v54 = vor.u32 %v741_v56, %v737_v12 }
  0xf6   : > { %v986_v6 = vor.u32 %v985_v5, %v982_v17  ;;  %v1005_v37 = vshrl.u32 %v7015_v3, 16  ;;  %v1008_v21 = vshll.u32 %v7015_v3, 16  ;;  %v9608_v19 = vsel %vm663_vm1, %v718_v26, %v722_v28  ;;  %v6990_v3 = vld [vmem:[%s9379_s6 + $0x70] sm:$0xf]  ;;  %v8578_v26 = vld [vmem:[%s9379_s6 + $0x6c] ss:$0 sps:$4 sm:$0xff]  }
  0xf7   : > { %v1002_v23 = vrot.slane %v1000_v15, 4  ;;  %v1014_v17 = vshrl.u32 %v7016_v49, 16  ;;  %v1017_v5 = vshll.u32 %v7016_v49, 16  ;;  %1143 = vst [vmem:[#allocation2 + $0x188] sm:$0xff] %v9604_v9  ;;  %v1024_v15 = vrot.slane %v1022_v53, 3 }
  0xf8   : > { %3527 = vmatpush1.bf16.msra.mxu0 %v8534_v35  ;;  %v9596_v33 = vsel %vm412_vm0, %v986_v6, %v994_v20  ;;  %v1007_v35 = vrot.slane %v1005_v37, 3  ;;  %v734_v20 = vrot.slane %v732_v1, 1  ;;  %v6992_v37 = vld [vmem:[%s9379_s6 + $0x78] sm:$0xf]  ;;  %v8585_v53 = vld [vmem:[#allocation7 + $0x320] ss:$12 sps:$4 sm:$0xff]  }
  0xf9   : > { %3528 = vmatprep.subr.bf16.mxu0 %v8542_v46  ;;  %v1010_v46 = vrot.slane %v1008_v21, 4  ;;  %v1003_v25 = vor.u32 %v1002_v23, %v999_v38  ;;  %v1016_v6 = vrot.slane %v1014_v17, 3  ;;  %v1019_v13 = vrot.slane %v1017_v5, 4  ;;  %v8555_v38 = vld [vmem:[#allocation7 + $0x2e8] ss:$12 sps:$4 sm:$0xff]  }
  0xfa   : > { %v7018_v21 = vcombine.low %v6990_v3, %v6991_v16  ;;  %v7019_v7 = vcombine.low %v6992_v37, %v6992_v37  ;;  %v9621_v60 = vcombine.low %v6991_v16, %v6992_v37 }
  0xfb   : > { %3468 = vmatmul.mubr.bf16.gmra.mrb[24].mxu0 %v9452_v0  ;;  %4150 = vmatmul.mubr.bf16.vlgmr.msra.gmra.mrb[40].mxu1 %v9527_v29  ;;  %v1011_v0 = vor.u32 %v1010_v46, %v1007_v35  ;;  %v1020_v23 = vor.u32 %v1019_v13, %v1016_v6  ;;  %v8579_v35 = vld [vmem:[#allocation7 + $0x3c8] ss:$12 sps:$4 sm:$0xff]   ;;  %v8588_v6 = vld [vmem:[%s9379_s6 + $0x7c] ss:$0 sps:$4 sm:$0xff]  }
  0xfc   : > { %3477 = vmatprep.mubr.bf16.mxu0 %v9454_v2  ;;  %3529 = vmatpush1.bf16.msra.mxu0 %v8540_v59  ;;  %v1031_v27 = vshrl.u32 %v7018_v21, 16  ;;  %v1034_v34 = vshll.u32 %v7018_v21, 16  ;;  %v1039_v46 = vshrl.u32 %v7019_v7, 16  ;;  %v1042_v48 = vshll.u32 %v7019_v7, 16  ;;  %1144 = vst [vmem:[#allocation2 + $0x1d0] sm:$0xff] %v9621_v60 }
  0xfd   : > { %3530 = vmatprep.subr.bf16.mxu0 %v8548_v18  ;;  %4157 = vmatprep.mubr.bf16.mxu1 %v9558_v22  ;;  %v9611_v59 = vsel %vm412_vm0, %v1003_v25, %v1011_v0  ;;  %v1027_v18 = vrot.slane %v1025_v24, 4  ;;  %v744_v25 = vshll.u32 %v8578_v26, 16  ;;  %v753_v0 = vrot.slane %v751_v39, 1  ;;  %v6995_v24 = vld [vmem:[%s9379_s6 + $0x84] sm:$0xf] }
  0xfe   : > { %v1033_v49 = vrot.slane %v1031_v27, 3  ;;  %v1036_v51 = vrot.slane %v1034_v34, 4  ;;  %v1044_v31 = vrot.slane %v1042_v48, 4  ;;  %7580 = vmatprep.subr.bf16.mxu1 %v8579_v35  ;;  %v8593_v34 = vld [vmem:[#allocation7 + $0x338] ss:$12 sps:$4 sm:$0xff]   ;;  %v761_v48 = vshrl.u32 %v9471_v36, 16 }
  0xff   : > { %v1028_v10 = vor.u32 %v1027_v18, %v1024_v15  ;;  %v746_v12 = vrot.slane %v744_v25, 1  ;;  %7581 = vmatpush3.bf16.msra.mxu1 %v8580_v30  ;;  %v8589_v15 = vld [vmem:[#allocation7 + $0x3f8] ss:$12 sps:$4 sm:$0xff]   ;;  %v754_v21 = vor.u32 %v753_v0, %v749_v42  ;;  %v8594_v2 = vld [vmem:[#allocation7 + $0x410] ss:$12 sps:$4 sm:$0xff]  }
 0x100   : > { %3531 = vmatpush1.bf16.msra.mxu0 %v8546_v43  ;;  %v9625_v43 = vsel %vm663_vm1, %v730_v63, %v734_v20  ;;  %v1037_v56 = vor.u32 %v1036_v51, %v1033_v49  ;;  %v6996_v63 = vld [vmem:[%s9379_s6 + $0x88] sm:$0xf]  ;;  %v6998_v49 = vld [vmem:[%s9379_s6 + $0x90] sm:$0xf]  ;;  %v6999_v51 = vld [vmem:[%s9379_s6 + $0x94] sm:$0xf] }
 0x101   : > { %3532 = vmatprep.subr.bf16.mxu0 %v8551_v55  ;;  %v9633_v28 = vsel %vm412_vm0, %v1020_v23, %v1028_v10  ;;  %v1041_v55 = vrot.slane %v1039_v46, 3  ;;  %v9637_v5 = vsel %vm663_vm1, %v742_v54, %v746_v12  ;;  %v7021_v39 = vcombine.low %v6996_v63, %v6996_v63  ;;  %v7000_v30 = vld [vmem:[%s9379_s6 + $0x98] sm:$0xf] }
 0x102   : > { %v9646_v13 = vcombine.low %v6995_v24, %v6996_v63  ;;  %v763_v23 = vshll.u32 %v9471_v36, 16  ;;  %v7023_v12 = vcombine.low %v7000_v30, %v7000_v30  ;;  %v8602_v0 = vld [vmem:[#allocation7 + $0x428] ss:$12 sps:$4 sm:$0xff]  }
 0x103   : > { %3478 = vmatmul.mubr.bf16.gmra.mrb[28].mxu0 %v9467_v32  ;;  %4158 = vmatmul.mubr.bf16.gmra.mrb[44].mxu1 %v9553_v62  ;;  %v8562_v32 = vld [vmem:[#allocation7 + $0x304] ss:$12 sps:$4 sm:$0xff]   ;;  %v1045_v17 = vor.u32 %v1044_v31, %v1041_v55  ;;  %v1056_v20 = vshrl.u32 %v7021_v39, 16  ;;  %v1059_v37 = vshll.u32 %v7021_v39, 16  ;;  %v7022_v55 = vcombine.low %v6998_v49, %v6999_v51  ;;  %v8601_v31 = vld [vmem:[%s9379_s6 + $0x8c] ss:$0 sps:$4 sm:$0xff]  }
 0x104   : > { %3487 = vmatprep.mubr.bf16.mxu0 %v9471_v36  ;;  %3533 = vmatpush1.bf16.msra.mxu0 %v8549_v52  ;;  %v8584_v52 = vld [vmem:[#allocation7 + $0x3e0] ss:$12 sps:$4 sm:$0xff]   ;;  %1145 = vst [vmem:[#allocation2 + $0x218] sm:$0xff] %v9646_v13  ;;  %v765_v54 = vrot.slane %v763_v23, 1  ;;  %v7002_v23 = vld [vmem:[%s9379_s6 + $0xa0] sm:$0xf] }
 0x105   : > { %3534 = vmatprep.subr.bf16.mxu0 %v8557_v58  ;;  %4165 = vmatprep.mubr.bf16.mxu1 %v9576_v45  ;;  %v6994_v58 = vld [vmem:[%s9379_s6 + $0x80] sm:$0xf]  ;;  %v9643_v1 = vsel %vm412_vm0, %v1037_v56, %v1045_v17  ;;  %v1058_v26 = vrot.slane %v1056_v20, 3  ;;  %v1061_v10 = vrot.slane %v1059_v37, 4  ;;  %v9669_v56 = vcombine.low %v6999_v51, %v7000_v30  ;;  %v8607_v37 = vld [vmem:[#allocation7 + $0x440] ss:$12 sps:$4 sm:$0xff]  }
 0x106   : > { %7582 = vmatprep.subr.bf16.mxu1 %v8584_v52  ;;  %v7020_v3 = vcombine.low %v6994_v58, %v6995_v24  ;;  %v1065_v36 = vshrl.u32 %v7022_v55, 16  ;;  %v1068_v52 = vshll.u32 %v7022_v55, 16  ;;  %v766_v17 = vor.u32 %v765_v54, %v761_v48  ;;  %v8603_v24 = vld [vmem:[#allocation7 + $0x368] ss:$12 sps:$4 sm:$0xff]   ;;  %v8570_v54 = vld [vmem:[#allocation7 + $0x330] ss:$12 sps:$4 sm:$0xff]  }
 0x107   : > { %7583 = vmatpush3.bf16.msra.mxu1 %v8585_v53  ;;  %v1062_v46 = vor.u32 %v1061_v10, %v1058_v26  ;;  %v768_v53 = vshll.u32 %v8601_v31, 16  ;;  %v1073_v58 = vshrl.u32 %v7023_v12, 16  ;;  %1146 = vst [vmem:[#allocation2 + $0x260] sm:$0xff] %v9669_v56  ;;  %v773_v26 = vshrl.u32 %v9483_v11, 16  ;;  %v8564_v10 = vld [vmem:[#allocation7 + $0x318] ss:$12 sps:$4 sm:$0xff]  }
 0x108   : > { %3535 = vmatpush1.bf16.msra.mxu0 %v8555_v38  ;;  %v1048_v16 = vshrl.u32 %v7020_v3, 16  ;;  %v1051_v18 = vshll.u32 %v7020_v3, 16  ;;  %v756_v38 = vshll.u32 %v8588_v6, 16  ;;  %7584 = vmatprep.subr.bf16.mxu1 %v8589_v15  ;;  %v1067_v63 = vrot.slane %v1065_v36, 3  ;;  %v8566_v6 = vld [vmem:[#allocation7 + $0x31c] ss:$12 sps:$4 sm:$0xff]  }
 0x109   : > { %3629 = vmatprep.subr.bf16.mxu0 %v8562_v32  ;;  %v8595_v32 = vld [vmem:[#allocation7 + $0x350] ss:$12 sps:$4 sm:$0xff]   ;;  %v1070_v3 = vrot.slane %v1068_v52, 4  ;;  %v770_v39 = vrot.slane %v768_v53, 1  ;;  %v1075_v15 = vrot.slane %v1073_v58, 3 }
 0x10a   : > { %v1053_v7 = vrot.slane %v1051_v18, 4  ;;  %v758_v27 = vrot.slane %v756_v38, 1  ;;  %v8608_v38 = vld [vmem:[#allocation7 + $0x380] ss:$12 sps:$4 sm:$0xff]   ;;  %v8616_v58 = vld [vmem:[#allocation7 + $0x398] ss:$12 sps:$4 sm:$0xff]  }
 0x10b   : > { %3488 = vmatmul.mubr.bf16.gmra.mrb[32].mxu0 %v9488_v14  ;;  %4166 = vmatmul.mubr.bf16.gmra.mrb[48].mxu1 %v9567_v50  ;;  %v1050_v14 = vrot.slane %v1048_v16, 3  ;;  %v1071_v18 = vor.u32 %v1070_v3, %v1067_v63  ;;  %v9675_v20 = vsel %vm663_vm1, %v766_v17, %v770_v39  ;;  %v8575_v30 = vld [vmem:[#allocation7 + $0x34c] ss:$12 sps:$4 sm:$0xff]   ;;  %v8573_v63 = vld [vmem:[#allocation7 + $0x348] ss:$12 sps:$4 sm:$0xff]  }
 0x10c   : > { %3497 = vmatprep.mubr.bf16.mxu0 %v9483_v11  ;;  %4173 = vmatprep.mubr.bf16.mxu1 %v9596_v33  ;;  %v9657_v42 = vsel %vm663_vm1, %v754_v21, %v758_v27  ;;  %v8572_v27 = vld [vmem:[#allocation7 + $0x334] ss:$12 sps:$4 sm:$0xff]   ;;  %v8583_v3 = vld [vmem:[#allocation7 + $0x364] ss:$12 sps:$4 sm:$0xff]  }
 0x10d   : > { %v1054_v35 = vor.u32 %v1053_v7, %v1050_v14  ;;  %7585 = vmatpush3.bf16.msra.mxu1 %v8593_v34  ;;  %v7003_v14 = vld [vmem:[%s9379_s6 + $0xa4] sm:$0xf]  ;;  %v7004_v7 = vld [vmem:[%s9379_s6 + $0xa8] sm:$0xf] }
 0x10e   : > { %7586 = vmatprep.subr.bf16.mxu1 %v8594_v2  ;;  %v775_v2 = vshll.u32 %v9483_v11, 16  ;;  %v9689_v48 = vcombine.low %v7003_v14, %v7004_v7 }
 0x10f   : > { %v9661_v25 = vsel %vm412_vm0, %v1054_v35, %v1062_v46  ;;  %v7024_v35 = vcombine.low %v7002_v23, %v7003_v14  ;;  %v7025_v46 = vcombine.low %v7004_v7, %v7004_v7  ;;  %v8581_v23 = vld [vmem:[#allocation7 + $0x360] ss:$12 sps:$4 sm:$0xff]   ;;  %v8631_v14 = vld [vmem:[%s9379_s6 + $0x2c] ss:$0 sps:$4 sm:$0xff]  }
 0x110   : > { %v777_v55 = vrot.slane %v775_v2, 1  ;;  %1147 = vst [vmem:[#allocation2 + $0x2a8] sm:$0xff] %v9689_v48  ;;  %v8592_v7 = vld [vmem:[#allocation7 + $0x37c] ss:$12 sps:$4 sm:$0xff]  }
 0x111   : > { %7587 = vmatpush3.bf16.msra.mxu1 %v8595_v32  ;;  %v1082_v32 = vshrl.u32 %v7024_v35, 16  ;;  %v1090_v49 = vshrl.u32 %v7025_v46, 16  ;;  %v1093_v51 = vshll.u32 %v7025_v46, 16  ;;  %v1205_v46 = vshll.u32 %v9548_v57, 16 }
 0x112   : > { %7588 = vmatprep.subr.bf16.mxu1 %v8602_v0  ;;  %v778_v17 = vor.u32 %v777_v55, %v773_v26  ;;  %v8596_v55 = vld [vmem:[#allocation7 + $0x390] ss:$12 sps:$4 sm:$0xff]  }
 0x113   : > { %3498 = vmatmul.mubr.bf16.gmra.mrb[36].mxu0 %v9500_v47  ;;  %4174 = vmatmul.mubr.bf16.gmra.mrb[52].mxu1 %v9585_v8  ;;  %v1076_v47 = vshll.u32 %v7023_v12, 16  ;;  %v8615_v12 = vld [vmem:[#allocation7 + $0x458] ss:$12 sps:$4 sm:$0xff]   ;;  %v1084_v11 = vrot.slane %v1082_v32, 3  ;;  %v1092_v36 = vrot.slane %v1090_v49, 3  ;;  %v1095_v52 = vrot.slane %v1093_v51, 4 }
 0x114   : > { %3536 = vmatprep.mubr.bf16.mxu0 %v9541_v44  ;;  %4181 = vmatprep.mubr.bf16.mxu1 %v9611_v59  ;;  %v8560_v44 = vld [vmem:[#allocation7 + $0x300] ss:$12 sps:$4 sm:$0xff]   ;;  %v8590_v32 = vld [vmem:[#allocation7 + $0x378] ss:$12 sps:$4 sm:$0xff]   ;;  %v1207_v49 = vrot.slane %v1205_v46, 1  ;;  %v1215_v51 = vshrl.u32 %v9572_v40, 16 }
 0x115   : > { %v1078_v16 = vrot.slane %v1076_v47, 4  ;;  %7589 = vmatpush3.bf16.msra.mxu1 %v8603_v24  ;;  %v1096_v24 = vor.u32 %v1095_v52, %v1092_v36  ;;  %v1227_v52 = vshrl.u32 %v9582_v4, 16 }
 0x116   : > { %7590 = vmatprep.subr.bf16.mxu1 %v8607_v37  ;;  %v1193_v37 = vshll.u32 %v9537_v41, 16 }
 0x117   : > { %v1079_v21 = vor.u32 %v1078_v16, %v1075_v15  ;;  %v8621_v15 = vld [vmem:[#allocation7 + $0x3b0] ss:$12 sps:$4 sm:$0xff]   ;;  %v8623_v16 = vld [vmem:[%s9379_s6 + $0x1c] ss:$0 sps:$4 sm:$0xff]  }
 0x119   : > { %v9684_v34 = vsel %vm412_vm0, %v1071_v18, %v1079_v21  ;;  %7591 = vmatpush3.bf16.msra.mxu1 %v8608_v38  ;;  %v1181_v18 = vshll.u32 %v9511_v61, 16  ;;  %v1186_v21 = vshll.u32 %v8623_v16, 16  ;;  %v1191_v38 = vshrl.u32 %v9537_v41, 16  ;;  %v8636_v41 = vld [vmem:[%s9379_s6 + $0x3c] ss:$0 sps:$4 sm:$0xff]  }
 0x11a   : > { %7592 = vmatprep.subr.bf16.mxu1 %v8615_v12 }
 0x11b   : > { %3537 = vmatmul.mubr.bf16.vlgmr.msra.gmra.mrb[40].mxu0 %v9527_v29  ;;  %4182 = vmatmul.mubr.bf16.gmra.mrb[56].mxu1 %v9608_v19  ;;  %v8614_v29 = vld [vmem:[%s9379_s6 + $0x9c] ss:$0 sps:$4 sm:$0xff]  }
 0x11c   : > { %3630 = vmatpush1.bf16.msra.mxu0 %v8560_v44  ;;  %3542 = vmatprep.mubr.bf16.mxu0 %v9558_v22  ;;  %v1085_v22 = vshll.u32 %v7024_v35, 16  ;;  %v780_v31 = vshll.u32 %v8614_v29, 16  ;;  %v8617_v44 = vld [vmem:[#allocation7 + $0x470] ss:$12 sps:$4 sm:$0xff]   ;;  %v1203_v35 = vshrl.u32 %v9548_v57, 16 }
 0x11d   : > { %3631 = vmatprep.subr.bf16.mxu0 %v8566_v6  ;;  %4189 = vmatprep.mubr.bf16.mxu1 %v9633_v28  ;;  %v8598_v57 = vld [vmem:[#allocation7 + $0x394] ss:$12 sps:$4 sm:$0xff]  }
 0x11e   : > { %v1087_v0 = vrot.slane %v1085_v22, 4  ;;  %v782_v53 = vrot.slane %v780_v31, 1  ;;  %7593 = vmatpush3.bf16.msra.mxu1 %v8616_v58  ;;  %v1208_v12 = vor.u32 %v1207_v49, %v1203_v35  ;;  %v8649_v58 = vld [vmem:[%s9379_s6 + $0x5c] ss:$0 sps:$4 sm:$0xff]  }
 0x11f   : > { %7594 = vmatprep.subr.bf16.mxu1 %v8617_v44 }
 0x120   : > { %3632 = vmatpush1.bf16.msra.mxu0 %v8564_v10  ;;  %v1088_v47 = vor.u32 %v1087_v0, %v1084_v11  ;;  %v9695_v39 = vsel %vm663_vm1, %v778_v17, %v782_v53  ;;  %v1188_v10 = vrot.slane %v1186_v21, 1  ;;  %v8606_v11 = vld [vmem:[#allocation7 + $0x3ac] ss:$12 sps:$4 sm:$0xff]   ;;  %v1229_v17 = vshll.u32 %v9582_v4, 16  ;;  %v8604_v4 = vld [vmem:[#allocation7 + $0x3a8] ss:$12 sps:$4 sm:$0xff]  }
 0x121   : > { %3633 = vmatprep.subr.bf16.mxu0 %v8572_v27  ;;  %v1195_v27 = vrot.slane %v1193_v37, 1  ;;  %v8613_v37 = vld [vmem:[#allocation7 + $0x3c4] ss:$12 sps:$4 sm:$0xff]   ;;  %v1251_v21 = vshrl.u32 %v9621_v60, 16 }
 0x122   : > { %v9699_v6 = vsel %vm412_vm0, %v1088_v47, %v1096_v24  ;;  %7595 = vmatpush3.bf16.msra.mxu1 %v8621_v15  ;;  %v1241_v47 = vshll.u32 %v9604_v9, 16  ;;  %v1231_v44 = vrot.slane %v1229_v17, 1  ;;  %v8671_v17 = vld [vmem:[#allocation7 + $0x560] ss:$12 sps:$4 sm:$0xff]  }
 0x123   : > { %3543 = vmatmul.mubr.bf16.gmra.mrb[4].mxu0 %v9553_v62  ;;  %4190 = vmatmul.mubr.bf16.gmra.mrb[60].mxu1 %v9625_v43  ;;  %v1179_v62 = vshrl.u32 %v9511_v61, 16  ;;  %v1198_v61 = vshll.u32 %v8631_v14, 16  ;;  %v1196_v29 = vor.u32 %v1195_v27, %v1191_v38  ;;  %v8611_v38 = vld [vmem:[#allocation7 + $0x3c0] ss:$12 sps:$4 sm:$0xff]   ;;  %v8666_v27 = vld [vmem:[#allocation7 + $0x548] ss:$12 sps:$4 sm:$0xff]  }
 0x124   : > { %3634 = vmatpush1.bf16.msra.mxu0 %v8570_v54  ;;  %3552 = vmatprep.mubr.bf16.mxu0 %v9576_v45  ;;  %v1183_v45 = vrot.slane %v1181_v18, 1  ;;  %v1217_v54 = vshll.u32 %v9572_v40, 16  ;;  %v1243_v15 = vrot.slane %v1241_v47, 1  ;;  %v8657_v18 = vld [vmem:[%s9379_s6 + $0x6c] ss:$0 sps:$4 sm:$0xff]  }
 0x125   : > { %3635 = vmatprep.subr.bf16.mxu0 %v8575_v30  ;;  %4197 = vmatprep.mubr.bf16.mxu1 %v9643_v1  ;;  %v1200_v22 = vrot.slane %v1198_v61, 1 }
 0x126   : > { %v1184_v26 = vor.u32 %v1183_v45, %v1179_v62  ;;  %v1219_v30 = vrot.slane %v1217_v54, 1  ;;  %v1232_v62 = vor.u32 %v1231_v44, %v1227_v52  ;;  %7656 = vmatprep.subr.bf16.mxu1 %v8666_v27  ;;  %v1265_v54 = vshll.u32 %v9646_v13, 16  ;;  %v8667_v52 = vld [vmem:[#allocation7 + $0x488] ss:$12 sps:$4 sm:$0xff]   ;;  %v8652_v27 = vld [vmem:[#allocation7 + $0x484] ss:$12 sps:$4 sm:$0xff]  }
 0x127   : > { %v9722_v31 = vsel %vm663_vm1, %v1196_v29, %v1200_v22  ;;  %v8626_v29 = vld [vmem:[#allocation7 + $0x3f4] ss:$12 sps:$4 sm:$0xff]   ;;  %v1287_v44 = vshrl.u32 %v9689_v48, 16 }
 0x128   : > { %3636 = vmatpush1.bf16.msra.mxu0 %v8573_v63  ;;  %v9713_v2 = vsel %vm663_vm1, %v1184_v26, %v1188_v10  ;;  %v1220_v36 = vor.u32 %v1219_v30, %v1215_v51  ;;  %v1239_v63 = vshrl.u32 %v9604_v9, 16  ;;  %v1246_v9 = vshll.u32 %v8657_v18, 16  ;;  %v8665_v26 = vld [vmem:[%s9379_s6 + $0x7c] ss:$0 sps:$4 sm:$0xff]  }
 0x129   : > { %3637 = vmatprep.subr.bf16.mxu0 %v8583_v3  ;;  %v1234_v3 = vshll.u32 %v8649_v58, 16  ;;  %v1258_v46 = vshll.u32 %v8665_v26, 16  ;;  %v1267_v49 = vrot.slane %v1265_v54, 1  ;;  %v7050_v26 = vld [vmem:[%s9379_s6 + $0x28] sm:$0xf] }
 0x12b   : > { %3553 = vmatmul.mubr.bf16.gmra.mrb[8].mxu0 %v9567_v50  ;;  %4198 = vmatmul.mubr.bf16.gmra.mrb[64].mxu1 %v9637_v5  ;;  %v1210_v50 = vshll.u32 %v8636_v41, 16  ;;  %v1236_v45 = vrot.slane %v1234_v3, 1  ;;  %v1260_v41 = vrot.slane %v1258_v46, 1  ;;  %v8695_v3 = vld [vmem:[%s9379_s6 + $0xac] ss:$0 sps:$4 sm:$0xff]  }
 0x12c   : > { %3638 = vmatpush1.bf16.msra.mxu0 %v8581_v23  ;;  %3562 = vmatprep.mubr.bf16.mxu0 %v9596_v33  ;;  %v8644_v33 = vld [vmem:[%s9379_s6 + $0x4c] ss:$0 sps:$4 sm:$0xff]  }
 0x12d   : > { %3639 = vmatprep.subr.bf16.mxu0 %v8592_v7  ;;  %4205 = vmatprep.mubr.bf16.mxu1 %v9661_v25  ;;  %v1212_v0 = vrot.slane %v1210_v50, 1  ;;  %v1222_v40 = vshll.u32 %v8644_v33, 16  ;;  %v8620_v23 = vld [vmem:[#allocation7 + $0x3dc] ss:$12 sps:$4 sm:$0xff]   ;;  %v9744_v14 = vsel %vm663_vm1, %v1232_v62, %v1236_v45  ;;  %v1248_v7 = vrot.slane %v1246_v9, 1 }
 0x12e   : > { %v1275_v33 = vshrl.u32 %v9669_v56, 16  ;;  %v8645_v9 = vld [vmem:[#allocation7 + $0x468] ss:$12 sps:$4 sm:$0xff]  }
 0x12f   : > { %v9728_v53 = vsel %vm663_vm1, %v1208_v12, %v1212_v0  ;;  %v1224_v24 = vrot.slane %v1222_v40, 1  ;;  %v8634_v12 = vld [vmem:[#allocation7 + $0x424] ss:$12 sps:$4 sm:$0xff]   ;;  %v8632_v0 = vld [vmem:[#allocation7 + $0x420] ss:$12 sps:$4 sm:$0xff]  }
 0x130   : > { %3640 = vmatpush1.bf16.msra.mxu0 %v8590_v32  ;;  %v1263_v32 = vshrl.u32 %v9646_v13, 16  ;;  %v8627_v13 = vld [vmem:[#allocation7 + $0x408] ss:$12 sps:$4 sm:$0xff]  }
 0x131   : > { %3641 = vmatprep.subr.bf16.mxu0 %v8598_v57  ;;  %v9736_v16 = vsel %vm663_vm1, %v1220_v36, %v1224_v24  ;;  %v8629_v57 = vld [vmem:[#allocation7 + $0x40c] ss:$12 sps:$4 sm:$0xff]   ;;  %v1289_v24 = vshll.u32 %v9689_v48, 16 }
 0x132   : > { %v1268_v50 = vor.u32 %v1267_v49, %v1263_v32  ;;  %v8675_v48 = vld [vmem:[#allocation7 + $0x578] ss:$12 sps:$4 sm:$0xff]  }
 0x133   : > { %3563 = vmatmul.mubr.bf16.gmra.mrb[12].mxu0 %v9585_v8  ;;  %4206 = vmatmul.mubr.bf16.gmra.mrb[68].mxu1 %v9657_v42  ;;  %v1244_v8 = vor.u32 %v1243_v15, %v1239_v63  ;;  %v9780_v15 = vld [vmem:[#allocation2 + $0x20] sm:$0xff]  ;;  %v1291_v62 = vrot.slane %v1289_v24, 1  ;;  %v7053_v49 = vld [vmem:[%s9379_s6 + $0x34] sm:$0xf]  ;;  %v8693_v24 = vld [vmem:[#allocation7 + $0x500] ss:$12 sps:$4 sm:$0xff]  }
 0x134   : > { %3572 = vmatprep.mubr.bf16.mxu0 %v9611_v59  ;;  %3642 = vmatpush1.bf16.msra.mxu0 %v8596_v55  ;;  %v1253_v59 = vshll.u32 %v9621_v60, 16  ;;  %v8618_v60 = vld [vmem:[#allocation7 + $0x3d8] ss:$12 sps:$4 sm:$0xff]  }
 0x135   : > { %3643 = vmatprep.subr.bf16.mxu0 %v8606_v11  ;;  %4213 = vmatprep.mubr.bf16.mxu1 %v9684_v34  ;;  %v9748_v61 = vsel %vm663_vm1, %v1244_v8, %v1248_v7  ;;  %v8686_v11 = vld [vmem:[%s9379_s6 + $0x9c] ss:$0 sps:$4 sm:$0xff]   ;;  %v1292_v18 = vor.u32 %v1291_v62, %v1287_v44  ;;  %v7049_v7 = vld [vmem:[%s9379_s6 + $0x24] sm:$0xf] }
 0x136   : > { %v1255_v10 = vrot.slane %v1253_v59, 1  ;;  %v1282_v40 = vshll.u32 %v8686_v11, 16  ;;  %v8647_v8 = vld [vmem:[#allocation7 + $0x46c] ss:$12 sps:$4 sm:$0xff]   ;;  %v9797_v46 = vcombine.low %v7049_v7, %v7050_v26 }
 0x138   : > { %3644 = vmatpush1.bf16.msra.mxu0 %v8604_v4  ;;  %v1256_v35 = vor.u32 %v1255_v10, %v1251_v21  ;;  %v1284_v47 = vrot.slane %v1282_v40, 1  ;;  %v8642_v4 = vld [vmem:[#allocation7 + $0x454] ss:$12 sps:$4 sm:$0xff]   ;;  %v8679_v21 = vld [vmem:[#allocation7 + $0x4b8] ss:$12 sps:$4 sm:$0xff]   ;;  %1652 = vst [vmem:[#allocation2 + $0x38] sm:$0xff] %v9797_v46 }
 0x139   : > { %3645 = vmatprep.subr.bf16.mxu0 %v8613_v37  ;;  %v8640_v37 = vld [vmem:[#allocation7 + $0x450] ss:$12 sps:$4 sm:$0xff]   ;;  %v7057_v40 = vld [vmem:[%s9379_s6 + $0x44] sm:$0xf] }
 0x13a   : > { %v9757_v22 = vsel %vm663_vm1, %v1256_v35, %v1260_v41  ;;  %v9794_v10 = vld [vmem:[#allocation2 + $0x68] sm:$0xff] }
 0x13b   : > { %3573 = vmatmul.mubr.bf16.gmra.mrb[16].mxu0 %v9608_v19  ;;  %4214 = vmatmul.mubr.bf16.gmra.mrb[72].mxu1 %v9675_v20  ;;  %v8674_v19 = vld [vmem:[%s9379_s6 + $0x8c] ss:$0 sps:$4 sm:$0xff]   ;;  %1314 = vst [vmem:[#allocation2 + $0x1d8] sm:$0xff] %v9757_v22 }
 0x13c   : > { %3582 = vmatprep.mubr.bf16.mxu0 %v9633_v28  ;;  %3646 = vmatpush1.bf16.msra.mxu0 %v8611_v38  ;;  %v8624_v28 = vld [vmem:[#allocation7 + $0x3f0] ss:$12 sps:$4 sm:$0xff]   ;;  %v1270_v51 = vshll.u32 %v8674_v19, 16  ;;  %v7052_v19 = vld [vmem:[%s9379_s6 + $0x30] sm:$0xf] }
 0x13d   : > { %3647 = vmatprep.subr.bf16.mxu0 %v8620_v23  ;;  %4221 = vmatprep.mubr.bf16.mxu1 %v9699_v6  ;;  %v8680_v38 = vld [vmem:[#allocation7 + $0x590] ss:$12 sps:$4 sm:$0xff]  }
 0x13e   : > { %v1272_v30 = vrot.slane %v1270_v51, 1  ;;  %v7048_v23 = vld [vmem:[%s9379_s6 + $0x20] sm:$0xf] }
 0x13f   : > { %v7088_v35 = vcombine.low %v7048_v23, %v7049_v7 }
 0x140   : > { %3648 = vmatpush1.bf16.msra.mxu0 %v8618_v60  ;;  %v9764_v55 = vsel %vm663_vm1, %v1268_v50, %v1272_v30  ;;  %v8687_v60 = vld [vmem:[#allocation7 + $0x5a8] ss:$12 sps:$4 sm:$0xff]  }
 0x141   : > { %3649 = vmatprep.subr.bf16.mxu0 %v8626_v29  ;;  %1315 = vst [vmem:[#allocation2 + $0x220] sm:$0xff] %v9764_v55  ;;  %v1443_v29 = vshrl.u32 %v7088_v35, 16  ;;  %v1446_v41 = vshll.u32 %v7088_v35, 16 }
 0x143   : > { %3583 = vmatmul.mubr.bf16.gmra.mrb[20].mxu0 %v9625_v43  ;;  %4222 = vmatmul.mubr.bf16.gmra.mrb[76].mxu1 %v9695_v39  ;;  %v1277_v43 = vshll.u32 %v9669_v56, 16  ;;  %v8637_v56 = vld [vmem:[#allocation7 + $0x438] ss:$12 sps:$4 sm:$0xff]   ;;  %v1445_v51 = vrot.slane %v1443_v29, 3 }
 0x144   : > { %3592 = vmatprep.mubr.bf16.mxu0 %v9643_v1  ;;  %3650 = vmatpush1.bf16.msra.mxu0 %v8624_v28  ;;  %v8639_v1 = vld [vmem:[#allocation7 + $0x43c] ss:$12 sps:$4 sm:$0xff]  }
 0x145   : > { %3651 = vmatprep.subr.bf16.mxu0 %v8629_v57  ;;  %4262 = vmatprep.mubr.bf16.mxu1 %v9713_v2  ;;  %v1279_v36 = vrot.slane %v1277_v43, 1  ;;  %v7054_v28 = vld [vmem:[%s9379_s6 + $0x38] sm:$0xf]  ;;  %v1448_v57 = vrot.slane %v1446_v41, 4  ;;  %v8701_v41 = vld [vmem:[#allocation7 + $0x5f0] ss:$12 sps:$4 sm:$0xff]  }
 0x146   : > { %v7091_v11 = vcombine.low %v7054_v28, %v7054_v28  ;;  %v9804_v43 = vcombine.low %v7053_v49, %v7054_v28 }
 0x147   : > { %v1280_v58 = vor.u32 %v1279_v36, %v1275_v33  ;;  %v7090_v33 = vcombine.low %v7052_v19, %v7053_v49  ;;  %v7056_v36 = vld [vmem:[%s9379_s6 + $0x40] sm:$0xf] }
 0x148   : > { %3652 = vmatpush1.bf16.msra.mxu0 %v8627_v13  ;;  %v8688_v13 = vld [vmem:[#allocation7 + $0x4e8] ss:$12 sps:$4 sm:$0xff]   ;;  %1653 = vst [vmem:[#allocation2 + $0x80] sm:$0xff] %v9804_v43  ;;  %v7064_v49 = vld [vmem:[%s9379_s6 + $0x60] sm:$0xf] }
 0x149   : > { %3653 = vmatprep.subr.bf16.mxu0 %v8634_v12  ;;  %v9777_v63 = vsel %vm663_vm1, %v1280_v58, %v1284_v47  ;;  %v8692_v12 = vld [vmem:[#allocation7 + $0x5c0] ss:$12 sps:$4 sm:$0xff]   ;;  %v1463_v58 = vshll.u32 %v7090_v33, 16 }
 0x14a   : > { %1316 = vst [vmem:[#allocation2 + $0x268] sm:$0xff] %v9777_v63  ;;  %v9812_v47 = vld [vmem:[#allocation2 + $0xb0] sm:$0xff] }
 0x14b   : > { %3593 = vmatmul.mubr.bf16.gmra.mrb[24].mxu0 %v9637_v5  ;;  %4263 = vmatmul.mubr.bf16.vlgmr.msra.gmra.mrb[80].mxu1 %v9780_v15  ;;  %v8672_v5 = vld [vmem:[#allocation7 + $0x4a0] ss:$12 sps:$4 sm:$0xff]  }
 0x14c   : > { %3602 = vmatprep.mubr.bf16.mxu0 %v9661_v25  ;;  %3654 = vmatpush1.bf16.msra.mxu0 %v8632_v0  ;;  %v1294_v25 = vshll.u32 %v8695_v3, 16  ;;  %v1449_v0 = vor.u32 %v1448_v57, %v1445_v51  ;;  %v7092_v3 = vcombine.low %v7056_v36, %v7057_v40 }
 0x14d   : > { %3655 = vmatprep.subr.bf16.mxu0 %v8639_v1  ;;  %4270 = vmatprep.mubr.bf16.mxu1 %v9722_v31 }
 0x14e   : > { %7657 = vmatpush3.bf16.msra.mxu1 %v8667_v52  ;;  %v1296_v45 = vrot.slane %v1294_v25, 1  ;;  %v7058_v52 = vld [vmem:[%s9379_s6 + $0x48] sm:$0xf] }
 0x14f   : > { %7658 = vmatprep.subr.bf16.mxu1 %v8671_v17  ;;  %v1460_v17 = vshrl.u32 %v7090_v33, 16  ;;  %v7093_v62 = vcombine.low %v7058_v52, %v7058_v52 }
 0x150   : > { %3656 = vmatpush1.bf16.msra.mxu0 %v8637_v56  ;;  %v9786_v59 = vsel %vm663_vm1, %v1292_v18, %v1296_v45  ;;  %v1471_v56 = vshll.u32 %v7091_v11, 16  ;;  %v9819_v18 = vcombine.low %v7057_v40, %v7058_v52  ;;  %v8700_v45 = vld [vmem:[#allocation7 + $0x518] ss:$12 sps:$4 sm:$0xff]  }
 0x151   : > { %3657 = vmatprep.subr.bf16.mxu0 %v8642_v4  ;;  %1317 = vst [vmem:[#allocation2 + $0x2b0] sm:$0xff] %v9786_v59  ;;  %v1462_v4 = vrot.slane %v1460_v17, 3  ;;  %v7068_v17 = vld [vmem:[%s9379_s6 + $0x70] sm:$0xf] }
 0x152   : > { %7659 = vmatpush3.bf16.msra.mxu1 %v8672_v5  ;;  %v8699_v5 = vld [vmem:[#allocation7 + $0x5d8] ss:$12 sps:$4 sm:$0xff]  }
 0x153   : > { %3603 = vmatmul.mubr.bf16.gmra.mrb[28].mxu0 %v9657_v42  ;;  %7660 = vmatprep.subr.bf16.mxu1 %v8675_v48  ;;  %v7089_v42 = vcombine.low %v7050_v26, %v7050_v26  ;;  %v1473_v48 = vrot.slane %v1471_v56, 4  ;;  %v7060_v26 = vld [vmem:[%s9379_s6 + $0x50] sm:$0xf] }
 0x154   : > { %3612 = vmatprep.mubr.bf16.mxu0 %v9684_v34  ;;  %3658 = vmatpush1.bf16.msra.mxu0 %v8640_v37  ;;  %v8681_v34 = vld [vmem:[#allocation7 + $0x4d0] ss:$12 sps:$4 sm:$0xff]   ;;  %v1477_v37 = vshrl.u32 %v7092_v3, 16 }
 0x155   : > { %4271 = vmatmul.mubr.bf16.gmra.mrb[84].mxu1 %v9794_v10  ;;  %3659 = vmatprep.subr.bf16.mxu0 %v8647_v8  ;;  %v1451_v54 = vshrl.u32 %v7089_v42, 16  ;;  %v1454_v32 = vshll.u32 %v7089_v42, 16 }
 0x156   : > { %4278 = vmatprep.mubr.bf16.mxu1 %v9728_v53  ;;  %7661 = vmatpush3.bf16.msra.mxu1 %v8679_v21  ;;  %v1485_v21 = vshrl.u32 %v7093_v62, 16  ;;  %v1479_v7 = vrot.slane %v1477_v37, 3  ;;  %v8655_v37 = vld [vmem:[#allocation7 + $0x49c] ss:$12 sps:$4 sm:$0xff]  }
 0x157   : > { %7662 = vmatprep.subr.bf16.mxu1 %v8680_v38  ;;  %v1453_v50 = vrot.slane %v1451_v54, 3  ;;  %v1456_v30 = vrot.slane %v1454_v32, 4  ;;  %v1488_v38 = vshll.u32 %v7093_v62, 16 }
 0x158   : > { %3660 = vmatpush1.bf16.msra.mxu0 %v8645_v9  ;;  %v1480_v9 = vshll.u32 %v7092_v3, 16  ;;  %v1487_v42 = vrot.slane %v1485_v21, 3 }
 0x159   : > { %3754 = vmatprep.subr.bf16.mxu0 %v8652_v27  ;;  %v1457_v1 = vor.u32 %v1456_v30, %v1453_v50  ;;  %v7061_v27 = vld [vmem:[%s9379_s6 + $0x54] sm:$0xf]  ;;  %v7065_v30 = vld [vmem:[%s9379_s6 + $0x64] sm:$0xf] }
 0x15a   : > { %7663 = vmatpush3.bf16.msra.mxu1 %v8681_v34  ;;  %v1482_v35 = vrot.slane %v1480_v9, 4  ;;  %v1490_v34 = vrot.slane %v1488_v38, 4  ;;  %v7094_v29 = vcombine.low %v7060_v26, %v7061_v27  ;;  %v7072_v38 = vld [vmem:[%s9379_s6 + $0x80] sm:$0xf] }
 0x15b   : > { %3613 = vmatmul.mubr.bf16.gmra.mrb[32].mxu0 %v9675_v20  ;;  %7664 = vmatprep.subr.bf16.mxu1 %v8687_v60  ;;  %v9816_v44 = vsel %vm412_vm0, %v1449_v0, %v1457_v1  ;;  %v1468_v20 = vshrl.u32 %v7091_v11, 16  ;;  %v7062_v60 = vld [vmem:[%s9379_s6 + $0x58] sm:$0xf]  ;;  %v7096_v0 = vcombine.low %v7064_v49, %v7065_v30 }
 0x15c   : > { %3622 = vmatprep.mubr.bf16.mxu0 %v9699_v6  ;;  %v1465_v6 = vrot.slane %v1463_v58, 4  ;;  %v7095_v32 = vcombine.low %v7062_v60, %v7062_v60  ;;  %v9828_v19 = vcombine.low %v7061_v27, %v7062_v60  ;;  %v1483_v28 = vor.u32 %v1482_v35, %v1479_v7  ;;  %v7069_v58 = vld [vmem:[%s9379_s6 + $0x74] sm:$0xf] }
 0x15d   : > { %4279 = vmatmul.mubr.bf16.gmra.mrb[88].mxu1 %v9812_v47  ;;  %v1470_v25 = vrot.slane %v1468_v20, 3  ;;  %v1491_v51 = vor.u32 %v1490_v34, %v1487_v42  ;;  %v1494_v57 = vshrl.u32 %v7094_v29, 16  ;;  %v1497_v50 = vshll.u32 %v7094_v29, 16  ;;  %v7073_v42 = vld [vmem:[%s9379_s6 + $0x84] sm:$0xf] }
 0x15e   : > { %4286 = vmatprep.mubr.bf16.mxu1 %v9736_v16  ;;  %7665 = vmatpush3.bf16.msra.mxu1 %v8688_v13  ;;  %v1466_v8 = vor.u32 %v1465_v6, %v1462_v4  ;;  %v7066_v13 = vld [vmem:[%s9379_s6 + $0x68] sm:$0xf]  ;;  %v1502_v33 = vshrl.u32 %v7095_v32, 16  ;;  %v1505_v11 = vshll.u32 %v7095_v32, 16  ;;  %v1511_v56 = vshrl.u32 %v7096_v0, 16 }
 0x15f   : > { %7666 = vmatprep.subr.bf16.mxu1 %v8692_v12  ;;  %v1474_v23 = vor.u32 %v1473_v48, %v1470_v25  ;;  %v8705_v12 = vld [vmem:[#allocation7 + $0x530] ss:$12 sps:$4 sm:$0xff]   ;;  %v7097_v1 = vcombine.low %v7066_v13, %v7066_v13  ;;  %v1496_v36 = vrot.slane %v1494_v57, 3  ;;  %v1499_v40 = vrot.slane %v1497_v50, 4  ;;  %v7070_v4 = vld [vmem:[%s9379_s6 + $0x78] sm:$0xf] }
 0x160   : > { %v9841_v52 = vcombine.low %v7065_v30, %v7066_v13  ;;  %v1507_v20 = vrot.slane %v1505_v11, 4  ;;  %v1514_v3 = vshll.u32 %v7096_v0, 16  ;;  %v8650_v6 = vld [vmem:[#allocation7 + $0x480] ss:$12 sps:$4 sm:$0xff]   ;;  %v7098_v48 = vcombine.low %v7068_v17, %v7069_v58  ;;  %v7074_v32 = vld [vmem:[%s9379_s6 + $0x88] sm:$0xf] }
 0x161   : > { %v9826_v54 = vsel %vm412_vm0, %v1466_v8, %v1474_v23  ;;  %v1500_v62 = vor.u32 %v1499_v40, %v1496_v36  ;;  %v1522_v25 = vshll.u32 %v7097_v1, 16  ;;  %v1513_v8 = vrot.slane %v1511_v56, 3  ;;  %v8653_v23 = vld [vmem:[#allocation7 + $0x498] ss:$12 sps:$4 sm:$0xff]   ;;  %v9856_v50 = vld [vmem:[#allocation7 + $0x608] ss:$12 sps:$4 sm:$0xff]  }
 0x162   : > { %7667 = vmatpush3.bf16.msra.mxu1 %v8693_v24  ;;  %v1504_v24 = vrot.slane %v1502_v33, 3  ;;  %v1516_v9 = vrot.slane %v1514_v3, 4  ;;  %v7099_v21 = vcombine.low %v7070_v4, %v7070_v4  ;;  %v9847_v27 = vcombine.low %v7069_v58, %v7070_v4  ;;  %v9858_v30 = vld [vmem:[#allocation2 + $0x140] sm:$0xff]  ;;  %v8663_v17 = vld [vmem:[#allocation7 + $0x4cc] ss:$12 sps:$4 sm:$0xff]  }
 0x163   : > { %3623 = vmatmul.mubr.bf16.gmra.mrb[44].mxu0 %v9695_v39  ;;  %7668 = vmatprep.subr.bf16.mxu1 %v8699_v5  ;;  %v9834_v39 = vld [vmem:[#allocation2 + $0xf8] sm:$0xff]  ;;  %v1519_v5 = vshrl.u32 %v7097_v1, 16  ;;  %v1524_v26 = vrot.slane %v1522_v25, 4  ;;  %v1528_v35 = vshrl.u32 %v7098_v48, 16  ;;  %v1531_v29 = vshll.u32 %v7098_v48, 16 }
 0x164   : > { %3661 = vmatprep.mubr.bf16.mxu0 %v9713_v2  ;;  %v9839_v2 = vsel %vm412_vm0, %v1483_v28, %v1491_v51  ;;  %v1517_v60 = vor.u32 %v1516_v9, %v1513_v8  ;;  %v1539_v51 = vshll.u32 %v7099_v21, 16  ;;  %v7100_v57 = vcombine.low %v7072_v38, %v7073_v42  ;;  %v7078_v48 = vld [vmem:[%s9379_s6 + $0x98] sm:$0xf] }
 0x165   : > { %4287 = vmatmul.mubr.bf16.gmra.mrb[92].mxu1 %v9834_v39  ;;  %v1521_v7 = vrot.slane %v1519_v5, 3  ;;  %v1530_v28 = vrot.slane %v1528_v35, 3  ;;  %v1533_v13 = vrot.slane %v1531_v29, 4  ;;  %v7101_v33 = vcombine.low %v7074_v32, %v7074_v32  ;;  %v8670_v29 = vld [vmem:[#allocation7 + $0x4e4] ss:$12 sps:$4 sm:$0xff]  }
 0x166   : > { %4294 = vmatprep.mubr.bf16.mxu1 %v9744_v14  ;;  %7669 = vmatpush3.bf16.msra.mxu1 %v8700_v45  ;;  %v1508_v45 = vor.u32 %v1507_v20, %v1504_v24  ;;  %v9861_v11 = vcombine.low %v7073_v42, %v7074_v32  ;;  %v1541_v1 = vrot.slane %v1539_v51, 4  ;;  %v1545_v36 = vshrl.u32 %v7100_v57, 16 }
 0x167   : > { %7670 = vmatprep.subr.bf16.mxu1 %v8701_v41  ;;  %v1536_v41 = vshrl.u32 %v7099_v21, 16  ;;  %v1525_v49 = vor.u32 %v1524_v26, %v1521_v7  ;;  %v1548_v40 = vshll.u32 %v7100_v57, 16  ;;  %v1534_v58 = vor.u32 %v1533_v13, %v1530_v28  ;;  %v8661_v26 = vld [vmem:[#allocation7 + $0x4c8] ss:$12 sps:$4 sm:$0xff]  }
 0x168   : > { %v9852_v34 = vsel %vm412_vm0, %v1500_v62, %v1508_v45  ;;  %v1553_v24 = vshrl.u32 %v7101_v33, 16  ;;  %v1556_v20 = vshll.u32 %v7101_v33, 16  ;;  %v1547_v3 = vrot.slane %v1545_v36, 3  ;;  %v7077_v62 = vld [vmem:[%s9379_s6 + $0x94] sm:$0xf] }
 0x169   : > { %v9865_v0 = vsel %vm412_vm0, %v1517_v60, %v1525_v49  ;;  %v1550_v4 = vrot.slane %v1548_v40, 4  ;;  %v7103_v9 = vcombine.low %v7078_v48, %v7078_v48  ;;  %v9874_v21 = vcombine.low %v7077_v62, %v7078_v48  ;;  %v9878_v60 = vld [vmem:[#allocation2 + $0x188] sm:$0xff]  ;;  %v7080_v49 = vld [vmem:[%s9379_s6 + $0xa0] sm:$0xf]  ;;  %v7081_v57 = vld [vmem:[%s9379_s6 + $0xa4] sm:$0xf] }
 0x16a   : > { %7671 = vmatpush3.bf16.msra.mxu1 %v8705_v12  ;;  %v1538_v12 = vrot.slane %v1536_v41, 3  ;;  %v1555_v5 = vrot.slane %v1553_v24, 3  ;;  %v1558_v25 = vrot.slane %v1556_v20, 4  ;;  %v8678_v13 = vld [vmem:[#allocation7 + $0x4fc] ss:$12 sps:$4 sm:$0xff]   ;;  %v7104_v33 = vcombine.low %v7080_v49, %v7081_v57 }
 0x16b   : > { %3662 = vmatmul.mubr.bf16.vlgmr.msra.gmra.mrb[48].mxu0 %v9780_v15  ;;  %v8660_v15 = vld [vmem:[#allocation7 + $0x4b4] ss:$12 sps:$4 sm:$0xff]   ;;  %8022 = vmatprep.subr.bf16.mxu1 %v9856_v50  ;;  %v1551_v8 = vor.u32 %v1550_v4, %v1547_v3  ;;  %v1570_v35 = vshrl.u32 %v7103_v9, 16  ;;  %v1573_v42 = vshll.u32 %v7103_v9, 16  ;;  %v1707_v36 = vshll.u32 %v9804_v43, 16 }
 0x16c   : > { %3755 = vmatpush1.bf16.msra.mxu0 %v8650_v6  ;;  %3667 = vmatprep.mubr.bf16.mxu0 %v9722_v31  ;;  %v8658_v31 = vld [vmem:[#allocation7 + $0x4b0] ss:$12 sps:$4 sm:$0xff]   ;;  %v1542_v56 = vor.u32 %v1541_v1, %v1538_v12  ;;  %v7076_v6 = vld [vmem:[%s9379_s6 + $0x90] sm:$0xf]  ;;  %v1559_v38 = vor.u32 %v1558_v25, %v1555_v5  ;;  %v7085_v4 = vld [vmem:[%s9379_s6 + $0xb4] sm:$0xf] }
 0x16d   : > { %4295 = vmatmul.mubr.bf16.gmra.mrb[96].mxu1 %v9858_v30  ;;  %3756 = vmatprep.subr.bf16.mxu0 %v8655_v37  ;;  %v7102_v37 = vcombine.low %v7076_v6, %v7077_v62  ;;  %v1572_v28 = vrot.slane %v1570_v35, 3  ;;  %v1575_v51 = vrot.slane %v1573_v42, 4  ;;  %v7084_v20 = vld [vmem:[%s9379_s6 + $0xb0] sm:$0xf]  ;;  %v7086_v6 = vld [vmem:[%s9379_s6 + $0xb8] sm:$0xf] }
 0x16e   : > { %4302 = vmatprep.mubr.bf16.mxu1 %v9748_v61  ;;  %v9872_v45 = vsel %vm412_vm0, %v1534_v58, %v1542_v56  ;;  %v8676_v56 = vld [vmem:[#allocation7 + $0x4f8] ss:$12 sps:$4 sm:$0xff]   ;;  %v8684_v62 = vld [vmem:[#allocation7 + $0x514] ss:$12 sps:$4 sm:$0xff]   ;;  %v7106_v9 = vcombine.low %v7084_v20, %v7085_v4  ;;  %v1693_v42 = vshrl.u32 %v9797_v46, 16 }
 0x16f   : > { %v1565_v7 = vshll.u32 %v7102_v37, 16  ;;  %v1576_v40 = vor.u32 %v1575_v51, %v1572_v28  ;;  %v8777_v51 = vld [vmem:[%s9379_s6 + $0x2c] ss:$0 sps:$4 sm:$0xff]  }
 0x170   : > { %3757 = vmatpush1.bf16.msra.mxu0 %v8653_v23  ;;  %v1562_v23 = vshrl.u32 %v7102_v37, 16 }
 0x171   : > { %3758 = vmatprep.subr.bf16.mxu0 %v8660_v15  ;;  %v1567_v32 = vrot.slane %v1565_v7, 4  ;;  %v7082_v15 = vld [vmem:[%s9379_s6 + $0xa8] sm:$0xf]  ;;  %v9902_v7 = vld [vmem:[#allocation2 + $0x1d0] sm:$0xff] }
 0x172   : > { %v1564_v41 = vrot.slane %v1562_v23, 3  ;;  %v9888_v1 = vcombine.low %v7081_v57, %v7082_v15  ;;  %v9900_v23 = vcombine.low %v7085_v4, %v7086_v6  ;;  %v1695_v57 = vshll.u32 %v9797_v46, 16  ;;  %v8778_v4 = vld [vmem:[%s9379_s6 + $0x3c] ss:$0 sps:$4 sm:$0xff]  }
 0x173   : > { %3668 = vmatmul.mubr.bf16.gmra.mrb[4].mxu0 %v9794_v10  ;;  %v9882_v10 = vsel %vm412_vm0, %v1551_v8, %v1559_v38  ;;  %v1705_v8 = vshrl.u32 %v9804_v43, 16  ;;  %v7107_v38 = vcombine.low %v7086_v6, %v7086_v6  ;;  %v1719_v6 = vshll.u32 %v9819_v18, 16 }
 0x174   : > { %3759 = vmatpush1.bf16.msra.mxu0 %v8658_v31  ;;  %3677 = vmatprep.mubr.bf16.mxu0 %v9728_v53  ;;  %v8668_v53 = vld [vmem:[#allocation7 + $0x4e0] ss:$12 sps:$4 sm:$0xff]   ;;  %v1568_v12 = vor.u32 %v1567_v32, %v1564_v41  ;;  %v7105_v31 = vcombine.low %v7082_v15, %v7082_v15  ;;  %v1599_v41 = vshll.u32 %v7106_v9, 16 }
 0x175   : > { %4303 = vmatmul.mubr.bf16.gmra.mrb[100].mxu1 %v9878_v60  ;;  %3760 = vmatprep.subr.bf16.mxu0 %v8663_v17  ;;  %v1582_v17 = vshll.u32 %v7104_v33, 16  ;;  %v1604_v32 = vshrl.u32 %v7107_v38, 16  ;;  %v1607_v49 = vshll.u32 %v7107_v38, 16 }
 0x176   : > { %4310 = vmatprep.mubr.bf16.mxu1 %v9757_v22  ;;  %v1579_v22 = vshrl.u32 %v7104_v33, 16  ;;  %v1587_v58 = vshrl.u32 %v7105_v31, 16  ;;  %v1590_v24 = vshll.u32 %v7105_v31, 16  ;;  %v9893_v3 = vsel %vm412_vm0, %v1568_v12, %v1576_v40 }
 0x177   : > { %v1584_v25 = vrot.slane %v1582_v17, 4  ;;  %v1601_v12 = vrot.slane %v1599_v41, 4  ;;  %v1606_v33 = vrot.slane %v1604_v32, 3  ;;  %v1609_v31 = vrot.slane %v1607_v49, 4  ;;  %v8704_v49 = vld [vmem:[#allocation7 + $0x55c] ss:$12 sps:$4 sm:$0xff]  }
 0x178   : > { %3761 = vmatpush1.bf16.msra.mxu0 %v8661_v26  ;;  %v1581_v5 = vrot.slane %v1579_v22, 3  ;;  %v1589_v48 = vrot.slane %v1587_v58, 3  ;;  %v1592_v37 = vrot.slane %v1590_v24, 4  ;;  %v1700_v40 = vshll.u32 %v8777_v51, 16  ;;  %v8689_v22 = vld [vmem:[#allocation7 + $0x528] ss:$12 sps:$4 sm:$0xff]  }
 0x179   : > { %3762 = vmatprep.subr.bf16.mxu0 %v8670_v29  ;;  %v1596_v29 = vshrl.u32 %v7106_v9, 16  ;;  %v1610_v20 = vor.u32 %v1609_v31, %v1606_v33  ;;  %v1731_v41 = vshll.u32 %v9828_v19, 16  ;;  %v1741_v31 = vshrl.u32 %v9841_v52, 16 }
 0x17a   : > { %v1585_v26 = vor.u32 %v1584_v25, %v1581_v5  ;;  %v1593_v35 = vor.u32 %v1592_v37, %v1589_v48  ;;  %v1717_v48 = vshrl.u32 %v9819_v18, 16 }
 0x17b   : > { %3678 = vmatmul.mubr.bf16.gmra.mrb[8].mxu0 %v9812_v47  ;;  %v1709_v47 = vrot.slane %v1707_v36, 1  ;;  %v1697_v36 = vrot.slane %v1695_v57, 1  ;;  %v1733_v57 = vrot.slane %v1731_v41, 1  ;;  %v1765_v41 = vshrl.u32 %v9861_v11, 16 }
 0x17c   : > { %3763 = vmatpush1.bf16.msra.mxu0 %v8668_v53  ;;  %3687 = vmatprep.mubr.bf16.mxu0 %v9736_v16  ;;  %v8682_v16 = vld [vmem:[#allocation7 + $0x510] ss:$12 sps:$4 sm:$0xff]   ;;  %v8691_v53 = vld [vmem:[#allocation7 + $0x52c] ss:$12 sps:$4 sm:$0xff]   ;;  %v9908_v28 = vsel %vm412_vm0, %v1585_v26, %v1593_v35  ;;  %v1712_v26 = vshll.u32 %v8778_v4, 16 }
 0x17d   : > { %4311 = vmatmul.mubr.bf16.gmra.mrb[104].mxu1 %v9902_v7  ;;  %3764 = vmatprep.subr.bf16.mxu0 %v8678_v13  ;;  %v1598_v13 = vrot.slane %v1596_v29, 3  ;;  %v1698_v25 = vor.u32 %v1697_v36, %v1693_v42  ;;  %v1710_v38 = vor.u32 %v1709_v47, %v1705_v8  ;;  %v8782_v35 = vld [vmem:[%s9379_s6 + $0x4c] ss:$0 sps:$4 sm:$0xff]   ;;  %v9925_v29 = vld [vmem:[#allocation2 + $0x218] sm:$0xff]  ;;  %v1721_v42 = vrot.slane %v1719_v6, 1 }
 0x17e   : > { %4318 = vmatprep.mubr.bf16.mxu1 %v9764_v55  ;;  %v7444_v15 = vpop.f32.mrb[0].mxu1  ;;  %v8696_v8 = vld [vmem:[#allocation7 + $0x540] ss:$12 sps:$4 sm:$0xff]   ;;  %v1714_v47 = vrot.slane %v1712_v26, 1  ;;  %v1724_v32 = vshll.u32 %v8782_v35, 16 }
 0x17f   : > { %v7445_v55 = vpop.f32.mrb[1].mxu1  ;;  %v1602_v24 = vor.u32 %v1601_v12, %v1598_v13  ;;  %v1722_v51 = vor.u32 %v1721_v42, %v1717_v48  ;;  %v8711_v35 = vld [vmem:[#allocation7 + $0x574] ss:$12 sps:$4 sm:$0xff]  }
 0x180   : > { %3765 = vmatpush1.bf16.msra.mxu0 %v8676_v56  ;;  %v9912_v17 = vadd.f32 %v7445_v55, %v7444_v15  ;;  %v7447_v58 = vpop.f32.mrb[2].mxu1  ;;  %v8698_v56 = vld [vmem:[#allocation7 + $0x544] ss:$12 sps:$4 sm:$0xff]   ;;  %v9937_v12 = vsel %vm663_vm1, %v1710_v38, %v1714_v47  ;;  %v1726_v33 = vrot.slane %v1724_v32, 1  ;;  %v1743_v55 = vshll.u32 %v9841_v52, 16 }
 0x181   : > { %3766 = vmatprep.subr.bf16.mxu0 %v8684_v62  ;;  %v7448_v5 = vpop.f32.mrb[3].mxu1  ;;  %v1702_v62 = vrot.slane %v1700_v40, 1  ;;  %v9922_v9 = vsel %vm412_vm0, %v1602_v24, %v1610_v20  ;;  %v8788_v24 = vld [vmem:[%s9379_s6 + $0x7c] ss:$0 sps:$4 sm:$0xff]   ;;  %v1753_v20 = vshrl.u32 %v9847_v27, 16 }
 0x182   : > { %v9919_v37 = vadd.f32 %v7448_v5, %v7447_v58  ;;  %v9946_v6 = vsel %vm663_vm1, %v1722_v51, %v1726_v33  ;;  %v1745_v5 = vrot.slane %v1743_v55, 1  ;;  %v1760_v26 = vshll.u32 %v8788_v24, 16  ;;  %v8792_v32 = vld [vmem:[%s9379_s6 + $0x8c] ss:$0 sps:$4 sm:$0xff]  }
 0x183   : > { %3688 = vmatmul.mubr.bf16.gmra.mrb[12].mxu0 %v9834_v39  ;;  %v9929_v39 = vsel %vm663_vm1, %v1698_v25, %v1702_v62  ;;  %v1755_v25 = vshll.u32 %v9847_v27, 16  ;;  %v8702_v62 = vld [vmem:[#allocation7 + $0x558] ss:$12 sps:$4 sm:$0xff]   ;;  %v1767_v51 = vshll.u32 %v9861_v11, 16  ;;  %v1779_v55 = vshll.u32 %v9874_v21, 16 }
 0x184   : > { %3697 = vmatprep.mubr.bf16.mxu0 %v9744_v14  ;;  %3767 = vmatpush1.bf16.msra.mxu0 %v8682_v16  ;;  %v8783_v14 = vld [vmem:[%s9379_s6 + $0x5c] ss:$0 sps:$4 sm:$0xff]   ;;  %v1729_v16 = vshrl.u32 %v9828_v19, 16  ;;  %v1762_v47 = vrot.slane %v1760_v26, 1  ;;  %v1791_v24 = vshll.u32 %v9888_v1, 16 }
 0x185   : > { %4319 = vmatmul.mubr.bf16.gmra.mrb[108].mxu1 %v9925_v29  ;;  %3768 = vmatprep.subr.bf16.mxu0 %v8691_v53  ;;  %v1736_v15 = vshll.u32 %v8783_v14, 16  ;;  %v8787_v53 = vld [vmem:[%s9379_s6 + $0x6c] ss:$0 sps:$4 sm:$0xff]   ;;  %v1746_v14 = vor.u32 %v1745_v5, %v1741_v31  ;;  %v1769_v33 = vrot.slane %v1767_v51, 1  ;;  %v1772_v31 = vshll.u32 %v8792_v32, 16 }
 0x186   : > { %4326 = vmatprep.mubr.bf16.mxu1 %v9777_v63  ;;  %v7450_v13 = vpop.f32.mrb[4].mxu1  ;;  %v1734_v36 = vor.u32 %v1733_v57, %v1729_v16  ;;  %v1748_v58 = vshll.u32 %v8787_v53, 16  ;;  %v1757_v16 = vrot.slane %v1755_v25, 1  ;;  %v1777_v53 = vshrl.u32 %v9874_v21, 16 }
 0x187   : > { %v7451_v63 = vpop.f32.mrb[5].mxu1  ;;  %v1738_v40 = vrot.slane %v1736_v15, 1  ;;  %v8793_v15 = vld [vmem:[%s9379_s6 + $0x9c] ss:$0 sps:$4 sm:$0xff]   ;;  %v1774_v5 = vrot.slane %v1772_v31, 1  ;;  %v1781_v25 = vrot.slane %v1779_v55, 1 }
 0x188   : > { %3769 = vmatpush1.bf16.msra.mxu0 %v8689_v22  ;;  %v9943_v4 = vadd.f32 %v7451_v63, %v7450_v13  ;;  %v7453_v22 = vpop.f32.mrb[6].mxu1  ;;  %v1750_v38 = vrot.slane %v1748_v58, 1  ;;  %v1758_v57 = vor.u32 %v1757_v16, %v1753_v20  ;;  %v8714_v13 = vld [vmem:[#allocation7 + $0x58c] ss:$12 sps:$4 sm:$0xff]   ;;  %v1789_v58 = vshrl.u32 %v9888_v1, 16 }
 0x189   : > { %3770 = vmatprep.subr.bf16.mxu0 %v8698_v56  ;;  %v7454_v56 = vpop.f32.mrb[7].mxu1  ;;  %v9951_v48 = vsel %vm663_vm1, %v1734_v36, %v1738_v40  ;;  %v9105_v40 = vmov 0   ;;  %v1793_v16 = vrot.slane %v1791_v24, 1 }
 0x18a   : > { %v9954_v42 = vadd.f32 %v7454_v56, %v7453_v22  ;;  %v9971_v36 = vsel %vm663_vm1, %v1758_v57, %v1762_v47  ;;  %4637 = vst [vmem:[#allocation3] sm:$0xf] %v9105_v40  ;;  %4638 = vst [vmem:[#allocation3 + $0x10] sm:$0xf] %v9105_v40  ;;  %v1770_v22 = vor.u32 %v1769_v33, %v1765_v41  ;;  %v8795_v56 = vld [vmem:[%s9379_s6 + $0xbc] ss:$0 sps:$4 sm:$0xff]  }
 0x18b   : > { %3698 = vmatmul.mubr.bf16.gmra.mrb[16].mxu0 %v9858_v30  ;;  %v9957_v30 = vld [vmem:[#allocation2 + $0x260] sm:$0xff]  ;;  %4639 = vst [vmem:[#allocation3 + $0x20] sm:$0xf] %v9105_v40  ;;  %4640 = vst [vmem:[#allocation3 + $0x30] sm:$0xf] %v9105_v40  ;;  %v1801_v47 = vshrl.u32 %v9900_v23, 16  ;;  %v1794_v55 = vor.u32 %v1793_v16, %v1789_v58 }
 0x18c   : > { %3707 = vmatprep.mubr.bf16.mxu0 %v9748_v61  ;;  %3771 = vmatpush1.bf16.msra.mxu0 %v8696_v8  ;;  %v8709_v61 = vld [vmem:[#allocation7 + $0x570] ss:$12 sps:$4 sm:$0xff]   ;;  %v9964_v8 = vsel %vm663_vm1, %v1746_v14, %v1750_v38  ;;  %4641 = vst [vmem:[#allocation3 + $0x40] sm:$0xf] %v9105_v40  ;;  %4642 = vst [vmem:[#allocation3 + $0x50] sm:$0xf] %v9105_v40  ;;  %v10001_v51 = vsel %vm663_vm1, %v1770_v22, %v1774_v5 }
 0x18d   : > { %4327 = vmatmul.mubr.bf16.gmra.mrb[112].mxu1 %v9957_v30  ;;  %3772 = vmatprep.subr.bf16.mxu0 %v8704_v49  ;;  %v8794_v49 = vld [vmem:[%s9379_s6 + $0xac] ss:$0 sps:$4 sm:$0xff]   ;;  %4643 = vst [vmem:[#allocation3 + $0x60] sm:$0xf] %v9105_v40  ;;  %4644 = vst [vmem:[#allocation3 + $0x70] sm:$0xf] %v9105_v40 }
 0x18e   : > { %4334 = vmatprep.mubr.bf16.mxu1 %v9786_v59  ;;  %v7456_v63 = vpop.f32.mrb[8].mxu1  ;;  %v1784_v59 = vshll.u32 %v8793_v15, 16  ;;  %4645 = vst [vmem:[#allocation3 + $0x80] sm:$0xf] %v9105_v40  ;;  %4646 = vst [vmem:[#allocation3 + $0x90] sm:$0xf] %v9105_v40 }
 0x18f   : > { %4647 = vst [vmem:[#allocation3 + $0x8] sm:$0xf0] %v9105_v40  ;;  %4648 = vst [vmem:[#allocation3 + $0x18] sm:$0xf0] %v9105_v40  ;;  %v7457_v20 = vpop.f32.mrb[9].mxu1  ;;  %v1803_v41 = vshll.u32 %v9900_v23, 16 }
 0x190   : > { %3773 = vmatpush1.bf16.msra.mxu0 %v8702_v62  ;;  %4649 = vst [vmem:[#allocation3 + $0x28] sm:$0xf0] %v9105_v40  ;;  %4650 = vst [vmem:[#allocation3 + $0x38] sm:$0xf0] %v9105_v40  ;;  %v1796_v62 = vshll.u32 %v8794_v49, 16  ;;  %v9996_v38 = vadd.f32 %v7457_v20, %v7456_v63  ;;  %v7459_v26 = vpop.f32.mrb[10].mxu1 }
 0x191   : > { %4651 = vst [vmem:[#allocation3 + $0x48] sm:$0xf0] %v9105_v40  ;;  %4652 = vst [vmem:[#allocation3 + $0x58] sm:$0xf0] %v9105_v40  ;;  %3774 = vmatprep.subr.bf16.mxu0 %v8711_v35  ;;  %v1786_v14 = vrot.slane %v1784_v59, 1  ;;  %v7460_v32 = vpop.f32.mrb[11].mxu1  ;;  %v1782_v35 = vor.u32 %v1781_v25, %v1777_v53 }
 0x192   : > { %4653 = vst [vmem:[#allocation3 + $0x68] sm:$0xf0] %v9105_v40  ;;  %4654 = vst [vmem:[#allocation3 + $0x78] sm:$0xf0] %v9105_v40  ;;  %v1798_v57 = vrot.slane %v1796_v62, 1  ;;  %v8805_v15 = vld [vmem:[#allocation2 + $0x1d8] sm:$0xff]  ;;  %v10004_v31 = vadd.f32 %v7460_v32, %v7459_v26 }
 0x193   : > { %4655 = vst [vmem:[#allocation3 + $0x88] sm:$0xf0] %v9105_v40  ;;  %4656 = vst [vmem:[#allocation3 + $0x98] sm:$0xf0] %v9105_v40  ;;  %3708 = vmatmul.mubr.bf16.gmra.mrb[20].mxu0 %v9878_v60  ;;  %v8712_v33 = vld [vmem:[#allocation7 + $0x588] ss:$12 sps:$4 sm:$0xff]   ;;  %v10010_v59 = vsel %vm663_vm1, %v1782_v35, %v1786_v14 }
 0x194   : > { %3717 = vmatprep.mubr.bf16.mxu0 %v8805_v15  ;;  %3775 = vmatpush1.bf16.msra.mxu0 %v8709_v61  ;;  %v1808_v49 = vshll.u32 %v8795_v56, 16  ;;  %v10006_v63 = vld [vmem:[#allocation2 + $0x2a8] sm:$0xff]  ;;  %v8720_v60 = vld [vmem:[#allocation7 + $0x5a4] ss:$12 sps:$4 sm:$0xff]   ;;  %v1805_v53 = vrot.slane %v1803_v41, 1  ;;  %v10014_v24 = vsel %vm663_vm1, %v1794_v55, %v1798_v57 }
 0x195   : > { %4335 = vmatmul.mubr.bf16.gmra.mrb[116].mxu1 %v10006_v63  ;;  %3776 = vmatprep.subr.bf16.mxu0 %v8714_v13  ;;  %v8718_v58 = vld [vmem:[#allocation7 + $0x5a0] ss:$12 sps:$4 sm:$0xff]   ;;  %v8726_v5 = vld [vmem:[#allocation7 + $0x5bc] ss:$12 sps:$4 sm:$0xff]   ;;  %v8807_v14 = vld [vmem:[#allocation2 + $0x220] sm:$0xff] }
 0x196   : > { %4375 = vmatprep.mubr.bf16.mxu1 %v9797_v46  ;;  %v1810_v61 = vrot.slane %v1808_v49, 1  ;;  %v1806_v20 = vor.u32 %v1805_v53, %v1801_v47  ;;  %v7462_v22 = vpop.f32.mrb[12].mxu1  ;;  %v8755_v26 = vld [vmem:[#allocation7 + $0x620] ss:$12 sps:$4 sm:$0xff]   ;;  %v8724_v16 = vld [vmem:[#allocation7 + $0x5b8] ss:$12 sps:$4 sm:$0xff]  }
 0x197   : > { %v7463_v25 = vpop.f32.mrb[13].mxu1  ;;  %v8729_v32 = vld [vmem:[#allocation7 + $0x5d4] ss:$12 sps:$4 sm:$0xff]   ;;  %v8727_v15 = vld [vmem:[#allocation7 + $0x5d0] ss:$12 sps:$4 sm:$0xff]  }
 0x198   : > { %3777 = vmatpush1.bf16.msra.mxu0 %v8712_v33  ;;  %v10017_v13 = vsel %vm663_vm1, %v1806_v20, %v1810_v61  ;;  %v10019_v62 = vadd.f32 %v7463_v25, %v7462_v22  ;;  %v7465_v56 = vpop.f32.mrb[14].mxu1  ;;  %v8735_v49 = vld [vmem:[#allocation7 + $0x5ec] ss:$12 sps:$4 sm:$0xff]   ;;  %v8767_v25 = vld [vmem:[#allocation7 + $0x668] ss:$12 sps:$4 sm:$0xff]  }
 0x199   : > { %3778 = vmatprep.subr.bf16.mxu0 %v8720_v60  ;;  %v7466_v46 = vpop.f32.mrb[15].mxu1  ;;  %v8808_v20 = vld [vmem:[#allocation2 + $0x268] sm:$0xff] }
 0x19a   : > { %v10022_v47 = vadd.f32 %v7466_v46, %v7465_v56 }
 0x19b   : > { %3718 = vmatmul.mubr.bf16.gmra.mrb[24].mxu0 %v9902_v7  ;;  %v8759_v7 = vld [vmem:[#allocation7 + $0x638] ss:$12 sps:$4 sm:$0xff]  }
 0x19c   : > { %3727 = vmatprep.mubr.bf16.mxu0 %v8807_v14  ;;  %3779 = vmatpush1.bf16.msra.mxu0 %v8718_v58  ;;  %v8733_v58 = vld [vmem:[#allocation7 + $0x5e8] ss:$12 sps:$4 sm:$0xff]  }
 0x19d   : > { %4376 = vmatmul.mubr.bf16.vlgmr.msra.gmra.mrb[120].mxu1 %v9816_v44  ;;  %3780 = vmatprep.subr.bf16.mxu0 %v8726_v5  ;;  %v8741_v5 = vld [vmem:[#allocation7 + $0x604] ss:$12 sps:$4 sm:$0xff]  }
 0x19e   : > { %v3413_v35 = vpop.f32.mrb[0].mxu0  ;;  %4383 = vmatprep.mubr.bf16.mxu1 %v9804_v43  ;;  %8023 = vmatpush3.bf16.msra.mxu1 %v9856_v50  ;;  %v7468_v33 = vpop.f32.mrb[16].mxu1  ;;  %v8760_v50 = vld [vmem:[#allocation7 + $0x650] ss:$12 sps:$4 sm:$0xff]  }
 0x19f   : > { %v3414_v57 = vpop.f32.mrb[1].mxu0  ;;  %8024 = vmatprep.subr.bf16.mxu1 %v8755_v26  ;;  %v7469_v60 = vpop.f32.mrb[17].mxu1 }
 0x1a0   : > { %v3415_v41 = vpop.f32.mrb[2].mxu0  ;;  %3781 = vmatpush1.bf16.msra.mxu0 %v8724_v16  ;;  %v10027_v53 = vadd.f32 %v7469_v60, %v7468_v33  ;;  %v7471_v61 = vpop.f32.mrb[18].mxu1  ;;  %v8768_v16 = vld [vmem:[#allocation7 + $0x680] ss:$12 sps:$4 sm:$0xff]   ;;  %v8775_v57 = vld [vmem:[#allocation7 + $0x698] ss:$12 sps:$4 sm:$0xff]  }
 0x1a1   : > { %v3416_v55 = vpop.f32.mrb[3].mxu0  ;;  %3782 = vmatprep.subr.bf16.mxu0 %v8729_v32  ;;  %v7472_v43 = vpop.f32.mrb[19].mxu1  ;;  %v8809_v32 = vld [vmem:[#allocation2 + $0x2b0] sm:$0xff] }
 0x1a2   : > { %8025 = vmatpush3.bf16.msra.mxu1 %v8755_v26  ;;  %v10030_v22 = vadd.f32 %v7472_v43, %v7471_v61  ;;  %v8776_v55 = vld [vmem:[#allocation7 + $0x6b0] ss:$12 sps:$4 sm:$0xff]   ;;  %v8739_v61 = vld [vmem:[#allocation7 + $0x600] ss:$12 sps:$4 sm:$0xff]  }
 0x1a3   : > { %3728 = vmatmul.mubr.bf16.gmra.mrb[28].mxu0 %v9925_v29  ;;  %8026 = vmatprep.subr.bf16.mxu1 %v8759_v7 }
 0x1a4   : > { %3737 = vmatprep.mubr.bf16.mxu0 %v8808_v20  ;;  %3783 = vmatpush1.bf16.msra.mxu0 %v8727_v15  ;;  %v8747_v20 = vld [vmem:[#allocation7 + $0x61c] ss:$12 sps:$4 sm:$0xff]  }
 0x1a5   : > { %4384 = vmatmul.mubr.bf16.gmra.mrb[124].mxu1 %v9826_v54  ;;  %3784 = vmatprep.subr.bf16.mxu0 %v8735_v49  ;;  %v8810_v49 = vld [vmem:[#allocation2 + $0x38] sm:$0xff] }
 0x1a6   : > { %4391 = vmatprep.mubr.bf16.mxu1 %v9819_v18  ;;  %8027 = vmatpush3.bf16.msra.mxu1 %v8759_v7  ;;  %v7474_v29 = vpop.f32.mrb[20].mxu1 }
 0x1a7   : > { %8028 = vmatprep.subr.bf16.mxu1 %v8760_v50  ;;  %v7475_v56 = vpop.f32.mrb[21].mxu1 }
 0x1a8   : > { %3785 = vmatpush1.bf16.msra.mxu0 %v8733_v58  ;;  %v10034_v46 = vadd.f32 %v7475_v56, %v7474_v29  ;;  %v7477_v26 = vpop.f32.mrb[22].mxu1  ;;  %v8745_v29 = vld [vmem:[#allocation7 + $0x618] ss:$12 sps:$4 sm:$0xff]  }
 0x1a9   : > { %3879 = vmatprep.subr.bf16.mxu0 %v8741_v5  ;;  %v7478_v14 = vpop.f32.mrb[23].mxu1 }
 0x1aa   : > { %8029 = vmatpush3.bf16.msra.mxu1 %v8760_v50  ;;  %v10037_v35 = vadd.f32 %v7478_v14, %v7477_v26  ;;  %v8754_v26 = vld [vmem:[#allocation7 + $0x634] ss:$12 sps:$4 sm:$0xff]  }
 0x1ab   : > { %3738 = vmatmul.mubr.bf16.gmra.mrb[32].mxu0 %v9957_v30  ;;  %8030 = vmatprep.subr.bf16.mxu1 %v8767_v25 }
 0x1ac   : > { %3747 = vmatprep.mubr.bf16.mxu0 %v8809_v32 }
 0x1ad   : > { %4392 = vmatmul.mubr.bf16.gmra.mrb[128].mxu1 %v9839_v2 }
 0x1ae   : > { %4399 = vmatprep.mubr.bf16.mxu1 %v9828_v19  ;;  %8031 = vmatpush3.bf16.msra.mxu1 %v8767_v25  ;;  %v7480_v7 = vpop.f32.mrb[24].mxu1  ;;  %v8811_v25 = vld [vmem:[#allocation2 + $0x80] sm:$0xff] }
 0x1af   : > { %8032 = vmatprep.subr.bf16.mxu1 %v8768_v16  ;;  %v7481_v41 = vpop.f32.mrb[25].mxu1 }
 0x1b0   : > { %v10041_v15 = vadd.f32 %v7481_v41, %v7480_v7  ;;  %v7483_v33 = vpop.f32.mrb[26].mxu1 }
 0x1b1   : > { %v7484_v30 = vpop.f32.mrb[27].mxu1 }
 0x1b2   : > { %8033 = vmatpush3.bf16.msra.mxu1 %v8768_v16  ;;  %v10044_v60 = vadd.f32 %v7484_v30, %v7483_v33  ;;  %v8752_v16 = vld [vmem:[#allocation7 + $0x630] ss:$12 sps:$4 sm:$0xff]  }
 0x1b3   : > { %3748 = vmatmul.mubr.bf16.gmra.mrb[52].mxu0 %v10006_v63  ;;  %8034 = vmatprep.subr.bf16.mxu1 %v8775_v57 }
 0x1b4   : > { %3786 = vmatprep.mubr.bf16.mxu0 %v8810_v49  ;;  %v8774_v49 = vld [vmem:[#allocation7 + $0x664] ss:$12 sps:$4 sm:$0xff]  }
 0x1b5   : > { %4400 = vmatmul.mubr.bf16.gmra.mrb[132].mxu1 %v9852_v34 }
 0x1b6   : > { %4407 = vmatprep.mubr.bf16.mxu1 %v9841_v52  ;;  %8035 = vmatpush3.bf16.msra.mxu1 %v8775_v57  ;;  %v7486_v43 = vpop.f32.mrb[28].mxu1  ;;  %v8763_v57 = vld [vmem:[#allocation7 + $0x64c] ss:$12 sps:$4 sm:$0xff]  }
 0x1b7   : > { %8036 = vmatprep.subr.bf16.mxu1 %v8776_v55  ;;  %v7487_v50 = vpop.f32.mrb[29].mxu1 }
 0x1b8   : > { %v10048_v58 = vadd.f32 %v7487_v50, %v7486_v43  ;;  %v7489_v63 = vpop.f32.mrb[30].mxu1  ;;  %v8772_v50 = vld [vmem:[#allocation7 + $0x660] ss:$12 sps:$4 sm:$0xff]  }
 0x1b9   : > { %v7490_v5 = vpop.f32.mrb[31].mxu1 }
 0x1ba   : > { %8037 = vmatpush3.bf16.msra.mxu1 %v8776_v55  ;;  %v10051_v56 = vadd.f32 %v7490_v5, %v7489_v63  ;;  %v8761_v55 = vld [vmem:[#allocation7 + $0x648] ss:$12 sps:$4 sm:$0xff]  }
 0x1bb   : > { %3787 = vmatmul.mubr.bf16.vlgmr.msra.gmra.mrb[56].mxu0 %v9816_v44  ;;  %v2212_v44 = vlaneseq }
 0x1bc   : > { %3880 = vmatpush1.bf16.msra.mxu0 %v8739_v61  ;;  %3792 = vmatprep.mubr.bf16.mxu0 %v8811_v25  ;;  %v10071_v25 = vld [vmem:[%s11099_s2] sm:$0x7] }
 0x1bd   : > { %4408 = vmatmul.mubr.bf16.gmra.mrb[136].mxu1 %v9865_v0  ;;  %3881 = vmatprep.subr.bf16.mxu0 %v8747_v20  ;;  %v10062_v61 = vshrl.u32 %v2212_v44, 7  ;;  %v8784_v44 = vld [vmem:[#allocation7 + $0x690] ss:$12 sps:$4 sm:$0xff]  }
 0x1be   : > { %4415 = vmatprep.mubr.bf16.mxu1 %v9847_v27  ;;  %v7492_v14 = vpop.f32.mrb[32].mxu1 }
 0x1bf   : > { %v7493_v32 = vpop.f32.mrb[33].mxu1  ;;  %v2222_v63 = vsub.s32 2, %v10062_v61 }
 0x1c0   : > { %3882 = vmatpush1.bf16.msra.mxu0 %v8745_v29  ;;  %v10055_v7 = vadd.f32 %v7493_v32, %v7492_v14  ;;  %v7495_v41 = vpop.f32.mrb[34].mxu1  ;;  %v8779_v14 = vld [vmem:[#allocation7 + $0x678] ss:$12 sps:$4 sm:$0xff]  }
 0x1c1   : > { %3883 = vmatprep.subr.bf16.mxu0 %v8754_v26  ;;  %v7496_v33 = vpop.f32.mrb[35].mxu1  ;;  %v10079_v32 = vrot.slane %v10071_v25, %v2222_v63 }
 0x1c2   : > { %v10058_v30 = vadd.f32 %v7496_v33, %v7495_v41  ;;  %v8791_v41 = vld [vmem:[#allocation7 + $0x6ac] ss:$12 sps:$4 sm:$0xff]  }
 0x1c3   : > { %3793 = vmatmul.mubr.bf16.gmra.mrb[4].mxu0 %v9826_v54  ;;  %v8781_v54 = vld [vmem:[#allocation7 + $0x67c] ss:$12 sps:$4 sm:$0xff]  }
 0x1c4   : > { %3802 = vmatprep.mubr.bf16.mxu0 %v9819_v18  ;;  %3884 = vmatpush1.bf16.msra.mxu0 %v8752_v16  ;;  %v8786_v16 = vld [vmem:[#allocation7 + $0x694] ss:$12 sps:$4 sm:$0xff]  }
 0x1c5   : > { %4416 = vmatmul.mubr.bf16.gmra.mrb[140].mxu1 %v9872_v45  ;;  %3885 = vmatprep.subr.bf16.mxu0 %v8763_v57 }
 0x1c6   : > { %4423 = vmatprep.mubr.bf16.mxu1 %v9861_v11  ;;  %v7498_v43 = vpop.f32.mrb[36].mxu1 }
 0x1c7   : > { %v7499_v20 = vpop.f32.mrb[37].mxu1 }
 0x1c8   : > { %3886 = vmatpush1.bf16.msra.mxu0 %v8761_v55  ;;  %v10066_v5 = vadd.f32 %v7499_v20, %v7498_v43  ;;  %v7501_v18 = vpop.f32.mrb[38].mxu1  ;;  %v4042_v43 = vadd.f32 %v9919_v37, %v10079_v32  ;;  %v4047_v37 = vadd.f32 %v9943_v4, %v10079_v32 }
 0x1c9   : > { %3887 = vmatprep.subr.bf16.mxu0 %v8774_v49  ;;  %v7502_v29 = vpop.f32.mrb[39].mxu1 }
 0x1ca   : > { %v10074_v26 = vadd.f32 %v7502_v29, %v7501_v18 }
 0x1cb   : > { %3803 = vmatmul.mubr.bf16.gmra.mrb[8].mxu0 %v9839_v2 }
 0x1cc   : > { %3812 = vmatprep.mubr.bf16.mxu0 %v9828_v19  ;;  %3888 = vmatpush1.bf16.msra.mxu0 %v8772_v50  ;;  %v4039_v19 = vadd.f32 %v9912_v17, %v10079_v32 }
 0x1cd   : > { %4424 = vmatmul.mubr.bf16.gmra.mrb[144].mxu1 %v9882_v10  ;;  %3889 = vmatprep.subr.bf16.mxu0 %v8781_v54  ;;  %v8789_v54 = vld [vmem:[#allocation7 + $0x6a8] ss:$12 sps:$4 sm:$0xff]  }
 0x1ce   : > { %4431 = vmatprep.mubr.bf16.mxu1 %v9874_v21  ;;  %v7520_v57 = vpop.f32.mrb[40].mxu1 }
 0x1cf   : > { %v7521_v2 = vpop.f32.mrb[41].mxu1 }
 0x1d0   : > { %3890 = vmatpush1.bf16.msra.mxu0 %v8779_v14  ;;  %v7522_v33 = vadd.f32 %v7521_v2, %v7520_v57  ;;  %v7523_v55 = vpop.f32.mrb[42].mxu1 }
 0x1d1   : > { %3891 = vmatprep.subr.bf16.mxu0 %v8786_v16  ;;  %v7524_v49 = vpop.f32.mrb[43].mxu1 }
 0x1d2   : > { %v10087_v50 = vadd.f32 %v7522_v33, %v4039_v19  ;;  %v7525_v20 = vadd.f32 %v7524_v49, %v7523_v55 }
 0x1d3   : > { %3813 = vmatmul.mubr.bf16.gmra.mrb[12].mxu0 %v9852_v34 }
 0x1d4   : > { %3822 = vmatprep.mubr.bf16.mxu0 %v9841_v52  ;;  %3892 = vmatpush1.bf16.msra.mxu0 %v8784_v44  ;;  %v10091_v63 = vadd.f32 %v7525_v20, %v4042_v43  ;;  %v4050_v52 = vadd.f32 %v9954_v42, %v10079_v32  ;;  %v4058_v42 = vadd.f32 %v10004_v31, %v10079_v32 }
 0x1d5   : > { %4432 = vmatmul.mubr.bf16.gmra.mrb[148].mxu1 %v9893_v3  ;;  %3893 = vmatprep.subr.bf16.mxu0 %v8791_v41  ;;  %v4055_v41 = vadd.f32 %v9996_v38, %v10079_v32  ;;  %v4063_v31 = vadd.f32 %v10019_v62, %v10079_v32 }
 0x1d6   : > { %4439 = vmatprep.mubr.bf16.mxu1 %v9888_v1  ;;  %v7526_v17 = vpop.f32.mrb[44].mxu1 }
 0x1d7   : > { %v7527_v34 = vpop.f32.mrb[45].mxu1 }
 0x1d8   : > { %3894 = vmatpush1.bf16.msra.mxu0 %v8789_v54  ;;  %v7528_v18 = vadd.f32 %v7527_v34, %v7526_v17  ;;  %v7529_v29 = vpop.f32.mrb[46].mxu1 }
 0x1d9   : > { %v7530_v14 = vpop.f32.mrb[47].mxu1 }
 0x1da   : > { %v10099_v16 = vadd.f32 %v7528_v18, %v4047_v37  ;;  %v7531_v57 = vadd.f32 %v7530_v14, %v7529_v29 }
 0x1db   : > { %3823 = vmatmul.mubr.bf16.gmra.mrb[16].mxu0 %v9865_v0 }
 0x1dc   : > { %3832 = vmatprep.mubr.bf16.mxu0 %v9847_v27  ;;  %v10103_v44 = vadd.f32 %v7531_v57, %v4050_v52 }
 0x1dd   : > { %4440 = vmatmul.mubr.bf16.gmra.mrb[152].mxu1 %v9908_v28 }
 0x1de   : > { %4447 = vmatprep.mubr.bf16.mxu1 %v9900_v23  ;;  %v7532_v4 = vpop.f32.mrb[48].mxu1 }
 0x1df   : > { %v7533_v2 = vpop.f32.mrb[49].mxu1 }
 0x1e0   : > { %v7534_v0 = vadd.f32 %v7533_v2, %v7532_v4  ;;  %v7535_v19 = vpop.f32.mrb[50].mxu1 }
 0x1e1   : > { %v7536_v33 = vpop.f32.mrb[51].mxu1 }
 0x1e2   : > { %v10111_v27 = vadd.f32 %v7534_v0, %v4055_v41  ;;  %v7537_v55 = vadd.f32 %v7536_v33, %v7535_v19 }
 0x1e3   : > { %3833 = vmatmul.mubr.bf16.gmra.mrb[20].mxu0 %v9872_v45 }
 0x1e4   : > { %3842 = vmatprep.mubr.bf16.mxu0 %v9861_v11  ;;  %v10115_v49 = vadd.f32 %v7537_v55, %v4058_v42  ;;  %v4066_v11 = vadd.f32 %v10022_v47, %v10079_v32  ;;  %v4071_v47 = vadd.f32 %v10027_v53, %v10079_v32 }
 0x1e5   : > { %4448 = vmatmul.mubr.bf16.gmra.mrb[156].mxu1 %v9922_v9 }
 0x1e6   : > { %v3499_v43 = vpop.f32.mrb[36].mxu0  ;;  %8038 = vmatprep.mubr.bf16.mxu1 %v9929_v39  ;;  %v7538_v20 = vpop.f32.mrb[52].mxu1 }
 0x1e7   : > { %v3500_v38 = vpop.f32.mrb[37].mxu0  ;;  %v7539_v17 = vpop.f32.mrb[53].mxu1 }
 0x1e8   : > { %v3501_v54 = vpop.f32.mrb[38].mxu0  ;;  %v7540_v34 = vadd.f32 %v7539_v17, %v7538_v20  ;;  %v7541_v37 = vpop.f32.mrb[54].mxu1  ;;  %v4079_v20 = vadd.f32 %v10034_v46, %v10079_v32 }
 0x1e9   : > { %v3502_v45 = vpop.f32.mrb[39].mxu0  ;;  %v7542_v18 = vpop.f32.mrb[55].mxu1 }
 0x1ea   : > { %v10123_v29 = vadd.f32 %v7540_v34, %v4063_v31  ;;  %v7543_v14 = vadd.f32 %v7542_v18, %v7541_v37  ;;  %v4087_v37 = vadd.f32 %v10041_v15, %v10079_v32 }
 0x1eb   : > { %3843 = vmatmul.mubr.bf16.gmra.mrb[24].mxu0 %v9882_v10 }
 0x1ec   : > { %3852 = vmatprep.mubr.bf16.mxu0 %v9874_v21  ;;  %v10127_v52 = vadd.f32 %v7543_v14, %v4066_v11  ;;  %v4074_v21 = vadd.f32 %v10030_v22, %v10079_v32  ;;  %v4082_v22 = vadd.f32 %v10037_v35, %v10079_v32  ;;  %v4090_v35 = vadd.f32 %v10044_v60, %v10079_v32 }
 0x1ed   : > { %8039 = vmatmul.mubr.bf16.vlgmr.msra.gmra.mrb[160].mxu1 %v9937_v12  ;;  %v4098_v60 = vadd.f32 %v10051_v56, %v10079_v32  ;;  %v4106_v56 = vadd.f32 %v10058_v30, %v10079_v32 }
 0x1ee   : > { %v3538_v57 = vpop.f32.mrb[40].mxu0  ;;  %8042 = vmatprep.mubr.bf16.mxu1 %v9946_v6  ;;  %v7544_v4 = vpop.f32.mrb[56].mxu1 }
 0x1ef   : > { %v3539_v62 = vpop.f32.mrb[41].mxu0  ;;  %v7545_v41 = vpop.f32.mrb[57].mxu1 }
 0x1f0   : > { %v3540_v2 = vpop.f32.mrb[42].mxu0  ;;  %v7546_v0 = vadd.f32 %v7545_v41, %v7544_v4  ;;  %v7547_v19 = vpop.f32.mrb[58].mxu1  ;;  %v4095_v4 = vadd.f32 %v10048_v58, %v10079_v32  ;;  %v4103_v58 = vadd.f32 %v10055_v7, %v10079_v32  ;;  %v4111_v7 = vadd.f32 %v10066_v5, %v10079_v32 }
 0x1f1   : > { %v3541_v10 = vpop.f32.mrb[43].mxu0  ;;  %v7548_v33 = vpop.f32.mrb[59].mxu1 }
 0x1f2   : > { %v10135_v42 = vadd.f32 %v7546_v0, %v4071_v47  ;;  %v7549_v55 = vadd.f32 %v7548_v33, %v7547_v19 }
 0x1f3   : > { %3853 = vmatmul.mubr.bf16.gmra.mrb[28].mxu0 %v9893_v3 }
 0x1f4   : > { %3862 = vmatprep.mubr.bf16.mxu0 %v9888_v1  ;;  %v10139_v43 = vadd.f32 %v7549_v55, %v4074_v21 }
 0x1f5   : > { %8043 = vmatmul.mubr.bf16.gmra.mrb[164].mxu1 %v9951_v48 }
 0x1f6   : > { %8046 = vmatprep.mubr.bf16.mxu1 %v9964_v8  ;;  %v7550_v53 = vpop.f32.mrb[60].mxu1 }
 0x1f7   : > { %v7551_v38 = vpop.f32.mrb[61].mxu1 }
 0x1f8   : > { %v7552_v3 = vadd.f32 %v7551_v38, %v7550_v53  ;;  %v7553_v54 = vpop.f32.mrb[62].mxu1 }
 0x1f9   : > { %v7554_v17 = vpop.f32.mrb[63].mxu1 }
 0x1fa   : > { %v10147_v1 = vadd.f32 %v7552_v3, %v4079_v20  ;;  %v7555_v45 = vadd.f32 %v7554_v17, %v7553_v54 }
 0x1fb   : > { %3863 = vmatmul.mubr.bf16.gmra.mrb[32].mxu0 %v9908_v28 }
 0x1fc   : > { %3872 = vmatprep.mubr.bf16.mxu0 %v9900_v23  ;;  %v10151_v31 = vadd.f32 %v7555_v45, %v4082_v22 }
 0x1fd   : > { %8047 = vmatmul.mubr.bf16.gmra.mrb[168].mxu1 %v9971_v36 }
 0x1fe   : > { %8050 = vmatprep.mubr.bf16.mxu1 %v10001_v51  ;;  %v7556_v46 = vpop.f32.mrb[64].mxu1 }
 0x1ff   : > { %v7557_v34 = vpop.f32.mrb[65].mxu1 }
 0x200   : > { %v7558_v28 = vadd.f32 %v7557_v34, %v7556_v46  ;;  %v7559_v18 = vpop.f32.mrb[66].mxu1 }
 0x201   : > { %v7560_v11 = vpop.f32.mrb[67].mxu1 }
 0x202   : > { %v10159_v23 = vadd.f32 %v7558_v28, %v4087_v37  ;;  %v7561_v14 = vadd.f32 %v7560_v11, %v7559_v18 }
 0x203   : > { %3873 = vmatmul.mubr.bf16.gmra.mrb[60].mxu0 %v9922_v9 }
 0x204   : > { %3911 = vmatprep.mubr.bf16.mxu0 %v9105_v40  ;;  %v10163_v57 = vadd.f32 %v7561_v14, %v4090_v35 }
 0x205   : > { %8051 = vmatmul.mubr.bf16.gmra.mrb[172].mxu1 %v10010_v59 }
 0x206   : > { %8054 = vmatprep.mubr.bf16.mxu1 %v10014_v24  ;;  %v7562_v15 = vpop.f32.mrb[68].mxu1 }
 0x207   : > { %v7563_v62 = vpop.f32.mrb[69].mxu1 }
 0x208   : > { %v7564_v9 = vadd.f32 %v7563_v62, %v7562_v15  ;;  %v7565_v2 = vpop.f32.mrb[70].mxu1 }
 0x209   : > { %v7566_v41 = vpop.f32.mrb[71].mxu1 }
 0x20a   : > { %v10171_v10 = vadd.f32 %v7564_v9, %v4095_v4  ;;  %v7567_v47 = vadd.f32 %v7566_v41, %v7565_v2 }
 0x20b   : > { %3912 = vmatmul.mubr.bf16.vlgmr.msra.gmra.mrb[64].mxu0 %v9929_v39 }
 0x20c   : > { %3917 = vmatprep.mubr.bf16.mxu0 %v9105_v40  ;;  %v10175_v0 = vadd.f32 %v7567_v47, %v4098_v60 }
 0x20d   : > { %8055 = vmatmul.mubr.bf16.gmra.mrb[176].mxu1 %v10017_v13 }
 0x20e   : > { %v7568_v19 = vpop.f32.mrb[72].mxu1 }
 0x20f   : > { %v7569_v33 = vpop.f32.mrb[73].mxu1 }
 0x210   : > { %v7570_v21 = vadd.f32 %v7569_v33, %v7568_v19  ;;  %v7571_v55 = vpop.f32.mrb[74].mxu1 }
 0x211   : > { %v7572_v39 = vpop.f32.mrb[75].mxu1 }
 0x212   : > { %v10182_v53 = vadd.f32 %v7570_v21, %v4103_v58  ;;  %v7573_v38 = vadd.f32 %v7572_v39, %v7571_v55 }
 0x213   : > { %3918 = vmatmul.mubr.bf16.gmra.mrb[4].mxu0 %v9937_v12  ;;  %v4114_v12 = vadd.f32 %v10074_v26, %v10079_v32 }
 0x214   : > { %3927 = vmatprep.mubr.bf16.mxu0 %v9105_v40  ;;  %v10185_v20 = vadd.f32 %v7573_v38, %v4106_v56 }
 0x216   : > { %v7574_v3 = vpop.f32.mrb[76].mxu1 }
 0x217   : > { %v7575_v54 = vpop.f32.mrb[77].mxu1 }
 0x218   : > { %v7576_v17 = vadd.f32 %v7575_v54, %v7574_v3  ;;  %v7577_v22 = vpop.f32.mrb[78].mxu1 }
 0x219   : > { %v7578_v45 = vpop.f32.mrb[79].mxu1 }
 0x21a   : > { %v10192_v30 = vadd.f32 %v7576_v17, %v4111_v7  ;;  %v7579_v46 = vadd.f32 %v7578_v45, %v7577_v22 }
 0x21b   : > { %3928 = vmatmul.mubr.bf16.gmra.mrb[8].mxu0 %v9946_v6 }
 0x21c   : > { %3937 = vmatprep.mubr.bf16.mxu0 %v9105_v40  ;;  %v10195_v34 = vadd.f32 %v7579_v46, %v4114_v12 }
 0x21e   : > { %v7596_v37 = vpop.f32.mrb[80].mxu1 }
 0x21f   : > { %v7597_v28 = vpop.f32.mrb[81].mxu1 }
 0x220   : > { %v7598_v18 = vadd.f32 %v7597_v28, %v7596_v37  ;;  %v7599_v11 = vpop.f32.mrb[82].mxu1 }
 0x221   : > { %v7600_v5 = vpop.f32.mrb[83].mxu1 }
 0x222   : > { %v10199_v35 = vadd.f32 %v7598_v18, %v10087_v50  ;;  %v7601_v6 = vadd.f32 %v7600_v5, %v7599_v11 }
 0x223   : > { %3938 = vmatmul.mubr.bf16.gmra.mrb[12].mxu0 %v9951_v48 }
 0x224   : > { %3947 = vmatprep.mubr.bf16.mxu0 %v9105_v40  ;;  %v10203_v26 = vadd.f32 %v7601_v6, %v10091_v63 }
 0x228   : > { %v7602_v32 = vpop.f32.mrb[84].mxu1 }
 0x229   : > { %v7603_v14 = vpop.f32.mrb[85].mxu1 }
 0x22a   : > { %v7604_v15 = vadd.f32 %v7603_v14, %v7602_v32  ;;  %v7605_v62 = vpop.f32.mrb[86].mxu1 }
 0x22b   : > { %v7606_v4 = vpop.f32.mrb[87].mxu1  ;;  %3948 = vmatmul.mubr.bf16.gmra.mrb[16].mxu0 %v9964_v8 }
 0x22c   : > { %v10207_v9 = vadd.f32 %v7604_v15, %v10099_v16  ;;  %v7607_v48 = vadd.f32 %v7606_v4, %v7605_v62  ;;  %3957 = vmatprep.mubr.bf16.mxu0 %v9105_v40 }
 0x22e   : > { %v10211_v50 = vadd.f32 %v7607_v48, %v10103_v44 }
 0x230   : > { %v7608_v2 = vpop.f32.mrb[88].mxu1 }
 0x231   : > { %v7609_v41 = vpop.f32.mrb[89].mxu1 }
 0x232   : > { %v7610_v63 = vadd.f32 %v7609_v41, %v7608_v2  ;;  %v7611_v60 = vpop.f32.mrb[90].mxu1 }
 0x233   : > { %v7612_v47 = vpop.f32.mrb[91].mxu1  ;;  %3958 = vmatmul.mubr.bf16.gmra.mrb[20].mxu0 %v9971_v36 }
 0x234   : > { %v10215_v19 = vadd.f32 %v7610_v63, %v10111_v27  ;;  %v7613_v8 = vadd.f32 %v7612_v47, %v7611_v60  ;;  %3967 = vmatprep.mubr.bf16.mxu0 %v9105_v40 }
 0x236   : > { %v10219_v16 = vadd.f32 %v7613_v8, %v10115_v49  ;;  %v3624_v33 = vpop.f32.mrb[44].mxu0 }
 0x237   : > { %v3625_v58 = vpop.f32.mrb[45].mxu0 }
 0x238   : > { %v7614_v44 = vpop.f32.mrb[92].mxu1  ;;  %v3626_v21 = vpop.f32.mrb[46].mxu0 }
 0x239   : > { %v7615_v55 = vpop.f32.mrb[93].mxu1  ;;  %v3627_v39 = vpop.f32.mrb[47].mxu0 }
 0x23a   : > { %v7616_v56 = vadd.f32 %v7615_v55, %v7614_v44  ;;  %v7617_v38 = vpop.f32.mrb[94].mxu1 }
 0x23b   : > { %v7618_v3 = vpop.f32.mrb[95].mxu1  ;;  %3968 = vmatmul.mubr.bf16.gmra.mrb[24].mxu0 %v10001_v51 }
 0x23c   : > { %v10223_v36 = vadd.f32 %v7616_v56, %v10123_v29  ;;  %v7619_v27 = vadd.f32 %v7618_v3, %v7617_v38  ;;  %3977 = vmatprep.mubr.bf16.mxu0 %v9105_v40 }
 0x23e   : > { %v10227_v49 = vadd.f32 %v7619_v27, %v10127_v52  ;;  %v3663_v54 = vpop.f32.mrb[48].mxu0 }
 0x23f   : > { %v3664_v7 = vpop.f32.mrb[49].mxu0 }
 0x240   : > { %v7620_v17 = vpop.f32.mrb[96].mxu1  ;;  %v3665_v22 = vpop.f32.mrb[50].mxu0 }
 0x241   : > { %v7621_v45 = vpop.f32.mrb[97].mxu1  ;;  %v3666_v12 = vpop.f32.mrb[51].mxu0 }
 0x242   : > { %v7622_v46 = vadd.f32 %v7621_v45, %v7620_v17  ;;  %v7623_v37 = vpop.f32.mrb[98].mxu1 }
 0x243   : > { %v7624_v28 = vpop.f32.mrb[99].mxu1  ;;  %3978 = vmatmul.mubr.bf16.gmra.mrb[28].mxu0 %v10010_v59 }
 0x244   : > { %v10231_v51 = vadd.f32 %v7622_v46, %v10135_v42  ;;  %v7625_v29 = vadd.f32 %v7624_v28, %v7623_v37  ;;  %3987 = vmatprep.mubr.bf16.mxu0 %v9105_v40 }
 0x246   : > { %v10235_v52 = vadd.f32 %v7625_v29, %v10139_v43 }
 0x248   : > { %v7626_v18 = vpop.f32.mrb[100].mxu1 }
 0x249   : > { %v7627_v11 = vpop.f32.mrb[101].mxu1 }
 0x24a   : > { %v7628_v5 = vadd.f32 %v7627_v11, %v7626_v18  ;;  %v7629_v6 = vpop.f32.mrb[102].mxu1 }
 0x24b   : > { %v7630_v32 = vpop.f32.mrb[103].mxu1  ;;  %3988 = vmatmul.mubr.bf16.gmra.mrb[32].mxu0 %v10014_v24 }
 0x24c   : > { %v10239_v14 = vadd.f32 %v7628_v5, %v10147_v1  ;;  %v7631_v59 = vadd.f32 %v7630_v32, %v7629_v6  ;;  %3997 = vmatprep.mubr.bf16.mxu0 %v9105_v40 }
 0x24e   : > { %v10243_v42 = vadd.f32 %v7631_v59, %v10151_v31 }
 0x250   : > { %v7632_v15 = vpop.f32.mrb[104].mxu1 }
 0x251   : > { %v7633_v62 = vpop.f32.mrb[105].mxu1 }
 0x252   : > { %v7634_v43 = vadd.f32 %v7633_v62, %v7632_v15  ;;  %v7635_v4 = vpop.f32.mrb[106].mxu1 }
 0x253   : > { %v7636_v48 = vpop.f32.mrb[107].mxu1  ;;  %3998 = vmatmul.mubr.bf16.gmra.mrb[68].mxu0 %v10017_v13 }
 0x254   : > { %v10247_v2 = vadd.f32 %v7634_v43, %v10159_v23  ;;  %v7637_v24 = vadd.f32 %v7636_v48, %v7635_v4 }
 0x256   : > { %v10250_v1 = vadd.f32 %v7637_v24, %v10163_v57 }
 0x258   : > { %v7638_v41 = vpop.f32.mrb[108].mxu1 }
 0x259   : > { %v7639_v63 = vpop.f32.mrb[109].mxu1 }
 0x25a   : > { %v7640_v40 = vadd.f32 %v7639_v63, %v7638_v41  ;;  %v7641_v60 = vpop.f32.mrb[110].mxu1 }
 0x25b   : > { %v7642_v31 = vpop.f32.mrb[111].mxu1 }
 0x25c   : > { %v10253_v47 = vadd.f32 %v7640_v40, %v10171_v10  ;;  %v7643_v8 = vadd.f32 %v7642_v31, %v7641_v60 }
 0x25e   : > { %v10256_v33 = vadd.f32 %v7643_v8, %v10175_v0 }
 0x260   : > { %v7644_v13 = vpop.f32.mrb[112].mxu1 }
 0x261   : > { %v7645_v58 = vpop.f32.mrb[113].mxu1 }
 0x262   : > { %v7646_v23 = vadd.f32 %v7645_v58, %v7644_v13  ;;  %v7647_v44 = vpop.f32.mrb[114].mxu1 }
 0x263   : > { %v7648_v21 = vpop.f32.mrb[115].mxu1 }
 0x264   : > { %v10259_v57 = vadd.f32 %v7646_v23, %v10182_v53  ;;  %v7649_v55 = vadd.f32 %v7648_v21, %v7647_v44 }
 0x266   : > { %v10262_v39 = vadd.f32 %v7649_v55, %v10185_v20 }
 0x268   : > { %v7650_v56 = vpop.f32.mrb[116].mxu1 }
 0x269   : > { %v7651_v38 = vpop.f32.mrb[117].mxu1 }
 0x26a   : > { %v7652_v10 = vadd.f32 %v7651_v38, %v7650_v56  ;;  %v7653_v3 = vpop.f32.mrb[118].mxu1 }
 0x26b   : > { %v7654_v27 = vpop.f32.mrb[119].mxu1 }
 0x26c   : > { %v10265_v0 = vadd.f32 %v7652_v10, %v10192_v30  ;;  %v7655_v54 = vadd.f32 %v7654_v27, %v7653_v3 }
 0x26e   : > { %v10268_v7 = vadd.f32 %v7655_v54, %v10195_v34 }
 0x270   : > { %v7672_v17 = vpop.f32.mrb[120].mxu1 }
 0x271   : > { %v7673_v22 = vpop.f32.mrb[121].mxu1 }
 0x272   : > { %v7674_v53 = vadd.f32 %v7673_v22, %v7672_v17  ;;  %v7675_v45 = vpop.f32.mrb[122].mxu1 }
 0x273   : > { %v7676_v12 = vpop.f32.mrb[123].mxu1 }
 0x274   : > { %v7677_v46 = vadd.f32 %v7676_v12, %v7675_v45  ;;  %v10271_v20 = vadd.f32 %v7674_v53, %v10199_v35 }
 0x276   : > { %v10274_v37 = vadd.f32 %v7677_v46, %v10203_v26 }
 0x278   : > { %v7678_v28 = vpop.f32.mrb[124].mxu1 }
 0x279   : > { %v7679_v29 = vpop.f32.mrb[125].mxu1 }
 0x27a   : > { %v7680_v30 = vadd.f32 %v7679_v29, %v7678_v28  ;;  %v7681_v18 = vpop.f32.mrb[126].mxu1 }
 0x27b   : > { %v7682_v11 = vpop.f32.mrb[127].mxu1 }
 0x27c   : > { %v7683_v5 = vadd.f32 %v7682_v11, %v7681_v18  ;;  %v10277_v34 = vadd.f32 %v7680_v30, %v10207_v9 }
 0x27e   : > { %v10280_v6 = vadd.f32 %v7683_v5, %v10211_v50 }
 0x280   : > { %v7684_v32 = vpop.f32.mrb[128].mxu1 }
 0x281   : > { %v7685_v59 = vpop.f32.mrb[129].mxu1 }
 0x282   : > { %v7686_v15 = vadd.f32 %v7685_v59, %v7684_v32  ;;  %v7687_v35 = vpop.f32.mrb[130].mxu1 }
 0x283   : > { %v7688_v62 = vpop.f32.mrb[131].mxu1 }
 0x284   : > { %v7689_v43 = vadd.f32 %v7688_v62, %v7687_v35  ;;  %v10283_v26 = vadd.f32 %v7686_v15, %v10215_v19 }
 0x286   : > { %v3749_v4 = vpop.f32.mrb[52].mxu0  ;;  %v10286_v48 = vadd.f32 %v7689_v43, %v10219_v16 }
 0x287   : > { %v3750_v24 = vpop.f32.mrb[53].mxu0 }
 0x288   : > { %v7690_v41 = vpop.f32.mrb[132].mxu1  ;;  %v3751_v9 = vpop.f32.mrb[54].mxu0 }
 0x289   : > { %v7691_v63 = vpop.f32.mrb[133].mxu1  ;;  %v3752_v40 = vpop.f32.mrb[55].mxu0 }
 0x28a   : > { %v7692_v50 = vadd.f32 %v7691_v63, %v7690_v41  ;;  %v7693_v60 = vpop.f32.mrb[134].mxu1 }
 0x28b   : > { %v7694_v31 = vpop.f32.mrb[135].mxu1 }
 0x28c   : > { %v7695_v8 = vadd.f32 %v7694_v31, %v7693_v60  ;;  %v10289_v13 = vadd.f32 %v7692_v50, %v10223_v36 }
 0x28e   : > { %v3788_v58 = vpop.f32.mrb[56].mxu0  ;;  %v10292_v19 = vadd.f32 %v7695_v8, %v10227_v49 }
 0x28f   : > { %v3789_v23 = vpop.f32.mrb[57].mxu0 }
 0x290   : > { %v7696_v44 = vpop.f32.mrb[136].mxu1  ;;  %v3790_v16 = vpop.f32.mrb[58].mxu0 }
 0x291   : > { %v7697_v21 = vpop.f32.mrb[137].mxu1  ;;  %v3791_v55 = vpop.f32.mrb[59].mxu0 }
 0x292   : > { %v7698_v56 = vadd.f32 %v7697_v21, %v7696_v44  ;;  %v7699_v38 = vpop.f32.mrb[138].mxu1 }
 0x293   : > { %v7700_v10 = vpop.f32.mrb[139].mxu1 }
 0x294   : > { %v7701_v3 = vadd.f32 %v7700_v10, %v7699_v38  ;;  %v10295_v27 = vadd.f32 %v7698_v56, %v10231_v51 }
 0x296   : > { %v10298_v54 = vadd.f32 %v7701_v3, %v10235_v52 }
 0x298   : > { %v7702_v36 = vpop.f32.mrb[140].mxu1 }
 0x299   : > { %v7703_v17 = vpop.f32.mrb[141].mxu1 }
 0x29a   : > { %v7704_v22 = vadd.f32 %v7703_v17, %v7702_v36  ;;  %v7705_v49 = vpop.f32.mrb[142].mxu1 }
 0x29b   : > { %v7706_v53 = vpop.f32.mrb[143].mxu1 }
 0x29c   : > { %v7707_v45 = vadd.f32 %v7706_v53, %v7705_v49  ;;  %v10301_v12 = vadd.f32 %v7704_v22, %v10239_v14 }
 0x29e   : > { %v10304_v46 = vadd.f32 %v7707_v45, %v10243_v42 }
 0x2a0   : > { %v7708_v28 = vpop.f32.mrb[144].mxu1 }
 0x2a1   : > { %v7709_v29 = vpop.f32.mrb[145].mxu1 }
 0x2a2   : > { %v7710_v30 = vadd.f32 %v7709_v29, %v7708_v28  ;;  %v7711_v51 = vpop.f32.mrb[146].mxu1 }
 0x2a3   : > { %v7712_v18 = vpop.f32.mrb[147].mxu1 }
 0x2a4   : > { %v7713_v11 = vadd.f32 %v7712_v18, %v7711_v51  ;;  %v10307_v52 = vadd.f32 %v7710_v30, %v10247_v2 }
 0x2a6   : > { %v10310_v5 = vadd.f32 %v7713_v11, %v10250_v1 }
 0x2a8   : > { %v7714_v32 = vpop.f32.mrb[148].mxu1 }
 0x2a9   : > { %v7715_v59 = vpop.f32.mrb[149].mxu1 }
 0x2aa   : > { %v7716_v15 = vadd.f32 %v7715_v59, %v7714_v32  ;;  %v7717_v14 = vpop.f32.mrb[150].mxu1 }
 0x2ab   : > { %v7718_v35 = vpop.f32.mrb[151].mxu1 }
 0x2ac   : > { %v7719_v62 = vadd.f32 %v7718_v35, %v7717_v14  ;;  %v10313_v42 = vadd.f32 %v7716_v15, %v10253_v47 }
 0x2ae   : > { %v10316_v43 = vadd.f32 %v7719_v62, %v10256_v33 }
 0x2b0   : > { %v7720_v4 = vpop.f32.mrb[152].mxu1 }
 0x2b1   : > { %v7721_v24 = vpop.f32.mrb[153].mxu1 }
 0x2b2   : > { %v7722_v41 = vadd.f32 %v7721_v24, %v7720_v4  ;;  %v7723_v2 = vpop.f32.mrb[154].mxu1 }
 0x2b3   : > { %v7724_v9 = vpop.f32.mrb[155].mxu1 }
 0x2b4   : > { %v7725_v63 = vadd.f32 %v7724_v9, %v7723_v2  ;;  %v10319_v1 = vadd.f32 %v7722_v41, %v10259_v57 }
 0x2b6   : > { %v10322_v40 = vadd.f32 %v7725_v63, %v10262_v39 }
 0x2b8   : > { %v7726_v50 = vpop.f32.mrb[156].mxu1 }
 0x2b9   : > { %v7727_v60 = vpop.f32.mrb[157].mxu1 }
 0x2ba   : > { %v7728_v31 = vadd.f32 %v7727_v60, %v7726_v50  ;;  %v7729_v47 = vpop.f32.mrb[158].mxu1 }
 0x2bb   : > { %v7730_v8 = vpop.f32.mrb[159].mxu1 }
 0x2bc   : > { %v7731_v58 = vadd.f32 %v7730_v8, %v7729_v47  ;;  %v10325_v33 = vadd.f32 %v7728_v31, %v10265_v0 }
 0x2be   : > { %v10328_v23 = vadd.f32 %v7731_v58, %v10268_v7 }
 0x2c0   : > { %v8040_v44 = vpop.f32.mrb[160].mxu1 }
 0x2c1   : > { %v4499_v16 = vadd.f32 %v8040_v44, %v10277_v34  ;;  %v4490_v57 = vpop.f32.mrb[161].mxu1 }
 0x2c2   : > { %v4491_v21 = vadd.f32 %v4490_v57, %v10271_v20  ;;  %v8041_v39 = vpop.f32.mrb[162].mxu1 }
 0x2c3   : > { %v4502_v55 = vadd.f32 %v8041_v39, %v10280_v6  ;;  %v4493_v56 = vpop.f32.mrb[163].mxu1  ;;  %v4619_v10 = vmax.f32 %v4499_v16, 0.0 }
 0x2c4   : > { %v4494_v38 = vadd.f32 %v4493_v56, %v10274_v37  ;;  %v4617_v36 = vmax.f32 %v4491_v21, 0.0 }
 0x2c5   : > { %v4620_v3 = vmax.f32 %v4502_v55, 0.0 }
 0x2c6   : > { %v4618_v0 = vmax.f32 %v4494_v38, 0.0 }
 0x2c7   : > { %v4658_v17 = vpack.c.bf16 %v4620_v3, %v4619_v10 }
 0x2c8   : > { %v4657_v22 = vpack.c.bf16 %v4618_v0, %v4617_v36  ;;  %v8044_v7 = vpop.f32.mrb[164].mxu1 }
 0x2c9   : > { %v4678_v49 = vrot.slane %v4658_v17, 4  ;;  %v4515_v53 = vadd.f32 %v8044_v7, %v10289_v13  ;;  %v4506_v34 = vpop.f32.mrb[165].mxu1  ;;  %v2214_v17 = vsub.s32 0, %v10062_v61 }
 0x2ca   : > { %v4677_v45 = vrot.slane %v4657_v22, 4  ;;  %v4507_v20 = vadd.f32 %v4506_v34, %v10283_v26  ;;  %v8045_v28 = vpop.f32.mrb[166].mxu1 }
 0x2cb   : > { %4699 = vst [vmem:[#allocation3 + $0x18] ss:$-4 sps:$4 sm:$0xff] %v4678_v49   ;;  %v4518_v6 = vadd.f32 %v8045_v28, %v10292_v19  ;;  %v4509_v29 = vpop.f32.mrb[167].mxu1  ;;  %v4623_v30 = vmax.f32 %v4515_v53, 0.0 }
 0x2cc   : > { %4697 = vst [vmem:[#allocation3 + $0x8] ss:$-4 sps:$4 sm:$0xff] %v4677_v45   ;;  %v4510_v37 = vadd.f32 %v4509_v29, %v10286_v48  ;;  %v4621_v18 = vmax.f32 %v4507_v20, 0.0 }
 0x2cd   : > { %v4624_v51 = vmax.f32 %v4518_v6, 0.0 }
 0x2ce   : > { %v4622_v11 = vmax.f32 %v4510_v37, 0.0  ;;  %v10355_v37 = vrot.slane %v10071_v25, %v2214_v17 }
 0x2cf   : > { %v4660_v32 = vpack.c.bf16 %v4624_v51, %v4623_v30 }
 0x2d0   : > { %v4659_v59 = vpack.c.bf16 %v4622_v11, %v4621_v18  ;;  %v8048_v15 = vpop.f32.mrb[168].mxu1 }
 0x2d1   : > { %v4680_v13 = vrot.slane %v4660_v32, 4  ;;  %v4531_v14 = vadd.f32 %v8048_v15, %v10301_v12  ;;  %v4522_v35 = vpop.f32.mrb[169].mxu1 }
 0x2d2   : > { %v4679_v26 = vrot.slane %v4659_v59, 4  ;;  %v4523_v62 = vadd.f32 %v4522_v35, %v10295_v27  ;;  %v8049_v4 = vpop.f32.mrb[170].mxu1 }
 0x2d3   : > { %4703 = vst [vmem:[#allocation3 + $0x38] ss:$-4 sps:$4 sm:$0xff] %v4680_v13   ;;  %v4534_v19 = vadd.f32 %v8049_v4, %v10304_v46  ;;  %v4525_v24 = vpop.f32.mrb[171].mxu1  ;;  %v4627_v41 = vmax.f32 %v4531_v14, 0.0 }
 0x2d4   : > { %4701 = vst [vmem:[#allocation3 + $0x28] ss:$-4 sps:$4 sm:$0xff] %v4679_v26   ;;  %v4526_v48 = vadd.f32 %v4525_v24, %v10298_v54  ;;  %v4625_v9 = vmax.f32 %v4523_v62, 0.0 }
 0x2d5   : > { %v4628_v2 = vmax.f32 %v4534_v19, 0.0 }
 0x2d6   : > { %v4626_v63 = vmax.f32 %v4526_v48, 0.0  ;;  %v3874_v50 = vpop.f32.mrb[60].mxu0 }
 0x2d7   : > { %v4662_v60 = vpack.c.bf16 %v4628_v2, %v4627_v41  ;;  %v3875_v31 = vpop.f32.mrb[61].mxu0 }
 0x2d8   : > { %v4661_v12 = vpack.c.bf16 %v4626_v63, %v4625_v9  ;;  %v8052_v47 = vpop.f32.mrb[172].mxu1  ;;  %v3876_v8 = vpop.f32.mrb[62].mxu0 }
 0x2d9   : > { %v4682_v58 = vrot.slane %v4662_v60, 4  ;;  %v4547_v27 = vadd.f32 %v8052_v47, %v10313_v42  ;;  %v4538_v44 = vpop.f32.mrb[173].mxu1  ;;  %v3877_v16 = vpop.f32.mrb[63].mxu0 }
 0x2da   : > { %v4681_v46 = vrot.slane %v4661_v12, 4  ;;  %v4539_v57 = vadd.f32 %v4538_v44, %v10307_v52  ;;  %v8053_v54 = vpop.f32.mrb[174].mxu1 }
 0x2db   : > { %4707 = vst [vmem:[#allocation3 + $0x58] ss:$-4 sps:$4 sm:$0xff] %v4682_v58   ;;  %v4550_v21 = vadd.f32 %v8053_v54, %v10316_v43  ;;  %v4541_v39 = vpop.f32.mrb[175].mxu1  ;;  %v4631_v56 = vmax.f32 %v4547_v27, 0.0  ;;  %v2218_v43 = vsub.s32 1, %v10062_v61 }
 0x2dc   : > { %4705 = vst [vmem:[#allocation3 + $0x48] ss:$-4 sps:$4 sm:$0xff] %v4681_v46   ;;  %v4542_v55 = vadd.f32 %v4541_v39, %v10310_v5  ;;  %v4629_v10 = vmax.f32 %v4539_v57, 0.0 }
 0x2dd   : > { %v4632_v38 = vmax.f32 %v4550_v21, 0.0 }
 0x2de   : > { %v4630_v3 = vmax.f32 %v4542_v55, 0.0  ;;  %v3913_v36 = vpop.f32.mrb[64].mxu0 }
 0x2df   : > { %v4664_v42 = vpack.c.bf16 %v4632_v38, %v4631_v56  ;;  %v3914_v0 = vpop.f32.mrb[65].mxu0 }
 0x2e0   : > { %v4663_v52 = vpack.c.bf16 %v4630_v3, %v4629_v10  ;;  %v8056_v22 = vpop.f32.mrb[176].mxu1  ;;  %v3915_v7 = vpop.f32.mrb[66].mxu0 }
 0x2e1   : > { %v4684_v49 = vrot.slane %v4664_v42, 4  ;;  %v4563_v53 = vadd.f32 %v8056_v22, %v10325_v33  ;;  %v4554_v5 = vpop.f32.mrb[177].mxu1  ;;  %v3916_v34 = vpop.f32.mrb[67].mxu0  ;;  %v10359_v33 = vrot.slane %v10071_v25, %v2218_v43 }
 0x2e2   : > { %v4683_v45 = vrot.slane %v4663_v52, 4  ;;  %v4555_v20 = vadd.f32 %v4554_v5, %v10319_v1  ;;  %v8057_v28 = vpop.f32.mrb[178].mxu1 }
 0x2e3   : > { %4711 = vst [vmem:[#allocation3 + $0x78] ss:$-4 sps:$4 sm:$0xff] %v4684_v49   ;;  %v4566_v6 = vadd.f32 %v8057_v28, %v10328_v23  ;;  %v4557_v29 = vpop.f32.mrb[179].mxu1  ;;  %v4635_v30 = vmax.f32 %v4563_v53, 0.0 }
 0x2e4   : > { %4709 = vst [vmem:[#allocation3 + $0x68] ss:$-4 sps:$4 sm:$0xff] %v4683_v45   ;;  %v4558_v61 = vadd.f32 %v4557_v29, %v10322_v40  ;;  %v4633_v18 = vmax.f32 %v4555_v20, 0.0 }
 0x2e5   : > { %v4636_v51 = vmax.f32 %v4566_v6, 0.0 }
 0x2e6   : > { %v4634_v1 = vmax.f32 %v4558_v61, 0.0  ;;  %v3919_v11 = vpop.f32.mrb[4].mxu0 }
 0x2e7   : > { %v4666_v32 = vpack.c.bf16 %v4636_v51, %v4635_v30  ;;  %v8090_v59 = vadd.f32 %v3919_v11, %v10355_v37  ;;  %v3921_v15 = vpop.f32.mrb[5].mxu0 }
 0x2e8   : > { %v4665_v23 = vpack.c.bf16 %v4634_v1, %v4633_v18  ;;  %v8091_v13 = vadd.f32 %v3921_v15, %v10359_v33  ;;  %v3923_v14 = vpop.f32.mrb[6].mxu0 }
 0x2e9   : > { %v4686_v35 = vrot.slane %v4666_v32, 4  ;;  %4569 = vst [vmem:[%s10363_s29] sm:$0xff] %v8090_v59  ;;  %v8092_v25 = vadd.f32 %v3923_v14, %v10355_v37  ;;  %v3925_v40 = vpop.f32.mrb[7].mxu0 }
 0x2ea   : > { %v4685_v26 = vrot.slane %v4665_v23, 4  ;;  %v4585_v62 = vmax.f32 %v8091_v13, 0.0  ;;  %v8093_v4 = vadd.f32 %v3925_v40, %v10359_v33 }
 0x2eb   : > { %4715 = vst [vmem:[#allocation3 + $0x98] ss:$-4 sps:$4 sm:$0xff] %v4686_v35   ;;  %4570 = vst [vmem:[%s10363_s29 + $0x18] sm:$0xff] %v8092_v25 }
 0x2ec   : > { %4713 = vst [vmem:[#allocation3 + $0x88] ss:$-4 sps:$4 sm:$0xff] %v4685_v26   ;;  %4601 = vst [vmem:[%s10363_s29 + $0x8] sm:$0xff] %v4585_v62  ;;  %v4586_v19 = vmax.f32 %v8093_v4, 0.0 }
 0x2ee   : > { %4602 = vst [vmem:[%s10363_s29 + $0x20] sm:$0xff] %v4586_v19  ;;  %v3929_v24 = vpop.f32.mrb[8].mxu0 }
 0x2ef   : > { %v8094_v48 = vadd.f32 %v3929_v24, %v10355_v37  ;;  %v3931_v41 = vpop.f32.mrb[9].mxu0 }
 0x2f0   : > { %v8095_v2 = vadd.f32 %v3931_v41, %v10359_v33  ;;  %v3933_v9 = vpop.f32.mrb[10].mxu0 }
 0x2f1   : > { %4571 = vst [vmem:[%s10363_s29 + $0x30] sm:$0xff] %v8094_v48  ;;  %v8096_v63 = vadd.f32 %v3933_v9, %v10355_v37  ;;  %v3935_v50 = vpop.f32.mrb[11].mxu0 }
 0x2f2   : > { %v4587_v60 = vmax.f32 %v8095_v2, 0.0  ;;  %v8097_v31 = vadd.f32 %v3935_v50, %v10359_v33 }
 0x2f3   : > { %4572 = vst [vmem:[%s10363_s29 + $0x48] sm:$0xff] %v8096_v63 }
 0x2f4   : > { %4603 = vst [vmem:[%s10363_s29 + $0x38] sm:$0xff] %v4587_v60  ;;  %v4588_v12 = vmax.f32 %v8097_v31, 0.0 }
 0x2f6   : > { %4604 = vst [vmem:[%s10363_s29 + $0x50] sm:$0xff] %v4588_v12  ;;  %v3939_v47 = vpop.f32.mrb[12].mxu0 }
 0x2f7   : > { %v8098_v8 = vadd.f32 %v3939_v47, %v10355_v37  ;;  %v3941_v58 = vpop.f32.mrb[13].mxu0 }
 0x2f8   : > { %v8099_v27 = vadd.f32 %v3941_v58, %v10359_v33  ;;  %v3943_v44 = vpop.f32.mrb[14].mxu0  ;;  %v9106_v58 = vmov (!%p7344_p4), 0  }
 0x2f9   : > { %4573 = vst [vmem:[%s10363_s29 + $0x60] sm:$0xff] %v8098_v8  ;;  %v8100_v16 = vadd.f32 %v3943_v44, %v10355_v37  ;;  %v3945_v46 = vpop.f32.mrb[15].mxu0  ;;  %4721 = vst [vmem:[#allocation3] sm:$0xff] (!%p7344_p4), %v9106_v58 }
 0x2fa   : > { %v4589_v57 = vmax.f32 %v8099_v27, 0.0  ;;  %v8101_v54 = vadd.f32 %v3945_v46, %v10359_v33  ;;  %4722 = vst [vmem:[#allocation3 + $0x8] sm:$0xff] (!%p7344_p4), %v9106_v58 }
 0x2fb   : > { %4574 = vst [vmem:[%s10363_s29 + $0x78] sm:$0xff] %v8100_v16 }
 0x2fc   : > { %4605 = vst [vmem:[%s10363_s29 + $0x68] sm:$0xff] %v4589_v57  ;;  %v4590_v21 = vmax.f32 %v8101_v54, 0.0 }
 0x2fe   : > { %4606 = vst [vmem:[%s10363_s29 + $0x80] sm:$0xff] %v4590_v21  ;;  %v3949_v39 = vpop.f32.mrb[16].mxu0 }
 0x2ff   : > { %v8102_v55 = vadd.f32 %v3949_v39, %v10355_v37  ;;  %v3951_v56 = vpop.f32.mrb[17].mxu0 }
 0x300   : > { %v8103_v38 = vadd.f32 %v3951_v56, %v10359_v33  ;;  %v3953_v10 = vpop.f32.mrb[18].mxu0 }
 0x301   : > { %4575 = vst [vmem:[%s10363_s29 + $0x90] sm:$0xff] %v8102_v55  ;;  %v8104_v3 = vadd.f32 %v3953_v10, %v10355_v37  ;;  %v3955_v36 = vpop.f32.mrb[19].mxu0 }
 0x302   : > { %v4591_v42 = vmax.f32 %v8103_v38, 0.0  ;;  %v8105_v0 = vadd.f32 %v3955_v36, %v10359_v33 }
 0x303   : > { %4576 = vst [vmem:[%s10363_s29 + $0xa8] sm:$0xff] %v8104_v3 }
 0x304   : > { %4607 = vst [vmem:[%s10363_s29 + $0x98] sm:$0xff] %v4591_v42  ;;  %v4592_v17 = vmax.f32 %v8105_v0, 0.0 }
 0x306   : > { %4608 = vst [vmem:[%s10363_s29 + $0xb0] sm:$0xff] %v4592_v17  ;;  %v3959_v52 = vpop.f32.mrb[20].mxu0 }
 0x307   : > { %v8106_v22 = vadd.f32 %v3959_v52, %v10355_v37  ;;  %v3961_v7 = vpop.f32.mrb[21].mxu0 }
 0x308   : > { %v8107_v43 = vadd.f32 %v3961_v7, %v10359_v33  ;;  %v3963_v49 = vpop.f32.mrb[22].mxu0 }
 0x309   : > { %4577 = vst [vmem:[%s10363_s29 + $0xc0] sm:$0xff] %v8106_v22  ;;  %v8108_v53 = vadd.f32 %v3963_v49, %v10355_v37  ;;  %v3965_v5 = vpop.f32.mrb[23].mxu0 }
 0x30a   : > { %v4593_v34 = vmax.f32 %v8107_v43, 0.0  ;;  %v8109_v45 = vadd.f32 %v3965_v5, %v10359_v33 }
 0x30b   : > { %4578 = vst [vmem:[%s10363_s29 + $0xd8] sm:$0xff] %v8108_v53 }
 0x30c   : > { %4609 = vst [vmem:[%s10363_s29 + $0xc8] sm:$0xff] %v4593_v34  ;;  %v4594_v20 = vmax.f32 %v8109_v45, 0.0 }
 0x30e   : > { %4610 = vst [vmem:[%s10363_s29 + $0xe0] sm:$0xff] %v4594_v20  ;;  %v3969_v28 = vpop.f32.mrb[24].mxu0 }
 0x30f   : > { %v8110_v6 = vadd.f32 %v3969_v28, %v10355_v37  ;;  %v3971_v29 = vpop.f32.mrb[25].mxu0 }
 0x310   : > { %v8111_v61 = vadd.f32 %v3971_v29, %v10359_v33  ;;  %v3973_v30 = vpop.f32.mrb[26].mxu0 }
 0x311   : > { %4579 = vst [vmem:[%s10363_s29 + $0xf0] sm:$0xff] %v8110_v6  ;;  %v8112_v51 = vadd.f32 %v3973_v30, %v10355_v37  ;;  %v3975_v18 = vpop.f32.mrb[27].mxu0 }
 0x312   : > { %v4595_v1 = vmax.f32 %v8111_v61, 0.0  ;;  %v8113_v11 = vadd.f32 %v3975_v18, %v10359_v33 }
 0x313   : > { %4580 = vst [vmem:[%s10363_s29 + $0x108] sm:$0xff] %v8112_v51 }
 0x314   : > { %4611 = vst [vmem:[%s10363_s29 + $0xf8] sm:$0xff] %v4595_v1  ;;  %v4596_v32 = vmax.f32 %v8113_v11, 0.0 }
 0x316   : > { %4612 = vst [vmem:[%s10363_s29 + $0x110] sm:$0xff] %v4596_v32  ;;  %v3979_v59 = vpop.f32.mrb[28].mxu0 }
 0x317   : > { %v8114_v15 = vadd.f32 %v3979_v59, %v10355_v37  ;;  %v3981_v23 = vpop.f32.mrb[29].mxu0 }
 0x318   : > { %v8115_v13 = vadd.f32 %v3981_v23, %v10359_v33  ;;  %v3983_v14 = vpop.f32.mrb[30].mxu0 }
 0x319   : > { %4581 = vst [vmem:[%s10363_s29 + $0x120] sm:$0xff] %v8114_v15  ;;  %v8116_v35 = vadd.f32 %v3983_v14, %v10355_v37  ;;  %v3985_v25 = vpop.f32.mrb[31].mxu0 }
 0x31a   : > { %v4597_v40 = vmax.f32 %v8115_v13, 0.0  ;;  %v8117_v26 = vadd.f32 %v3985_v25, %v10359_v33 }
 0x31b   : > { %4582 = vst [vmem:[%s10363_s29 + $0x138] sm:$0xff] %v8116_v35 }
 0x31c   : > { %4613 = vst [vmem:[%s10363_s29 + $0x128] sm:$0xff] %v4597_v40  ;;  %v4598_v62 = vmax.f32 %v8117_v26, 0.0 }
 0x31e   : > { %4614 = vst [vmem:[%s10363_s29 + $0x140] sm:$0xff] %v4598_v62  ;;  %v3989_v4 = vpop.f32.mrb[32].mxu0 }
 0x31f   : > { %v8118_v19 = vadd.f32 %v3989_v4, %v10355_v37  ;;  %v3991_v24 = vpop.f32.mrb[33].mxu0 }
 0x320   : > { %v8119_v48 = vadd.f32 %v3991_v24, %v10359_v33  ;;  %v3993_v41 = vpop.f32.mrb[34].mxu0 }
 0x321   : > { %4583 = vst [vmem:[%s10363_s29 + $0x150] sm:$0xff] %v8118_v19  ;;  %v8120_v2 = vadd.f32 %v3993_v41, %v10355_v37  ;;  %v3995_v9 = vpop.f32.mrb[35].mxu0 }
 0x322   : > { %v4599_v63 = vmax.f32 %v8119_v48, 0.0  ;;  %v8121_v50 = vadd.f32 %v3995_v9, %v10359_v33 }
 0x323   : > { %4584 = vst [vmem:[%s10363_s29 + $0x168] sm:$0xff] %v8120_v2  ;;  %4720 = sbr.rel (%p7344_p4) target bundleno = 810 (0x32a), region = 56 }
 0x324   : > { %4615 = vst [vmem:[%s10363_s29 + $0x158] sm:$0xff] %v4599_v63  ;;  %v4600_v60 = vmax.f32 %v8121_v50, 0.0 }
 0x326   : > { %4616 = vst [vmem:[%s10363_s29 + $0x170] sm:$0xff] %v4600_v60  ;;  %v3999_v31 = vpop.f32.mrb[68].mxu0 }
 0x327   : > { %v4000_v12 = vpop.f32.mrb[69].mxu0 }
 0x328   : > { %v4001_v47 = vpop.f32.mrb[70].mxu0 }
 0x329   : > { %v4002_v8 = vpop.f32.mrb[71].mxu0 }
 0x32a PF: > { %p7345_p1 = scmp.ne.s32.totalorder %s9080_s24, 1 }
 0x32b   : > { %v9107_v37 = vmov (!%p7345_p1), 0  }
 0x32c   : > { %4726 = sbr.rel (%p7345_p1) target bundleno = 819 (0x333), region = 60  ;;  %4728 = vst [vmem:[#allocation3 + $0x90] sm:$0xff] (!%p7345_p1), %v9107_v37  ;;  %4729 = vst [vmem:[#allocation3 + $0x98] sm:$0xff] (!%p7345_p1), %v9107_v37 }
 0x333 PF: > { %v8812_v33 = vld [vmem:[#allocation9 + $0x40] sm:$0xff]   ;;  %v8814_v44 = vld [vmem:[#allocation9 + $0x48] sm:$0xff]   ;;  %v8816_v46 = vld [vmem:[#allocation9 + $0x50] sm:$0xff]   ;;  %vm4914_vm2 = vcmask 1043456   ;;  %vm4955_vm3 = vsmask.f32 3328 }
 0x334   : > { %v8813_v27 = vld [vmem:[#allocation9] sm:$0xff]   ;;  %7750 = vmatprep.subr.bf16.mxu1 %v8812_v33  ;;  %v8815_v16 = vld [vmem:[#allocation9 + $0x8] sm:$0xff]   ;;  %v8817_v57 = vld [vmem:[#allocation9 + $0x10] sm:$0xff]   ;;  %s8254_s15 = smul.u32 48, %s9080_s24  ;;  %s11151_s1 = sld [smem:[#allocation16_spill]] }
 0x335   : > { %7751 = vmatpush3.bf16.msra.mxu1 %v8813_v27  ;;  %v8818_v54 = vld [vmem:[#allocation9 + $0x58] sm:$0xff]   ;;  %v8820_v39 = vld [vmem:[#allocation9 + $0x60] sm:$0xff]   ;;  %v8822_v56 = vld [vmem:[#allocation9 + $0x68] sm:$0xff]   ;;  %s8255_s9 = smul.u32 96, %s9084_s25  ;;  %s6795_s25 = sshll.u32 %s10363_s29, 4  ;;  %s11029_s25 = int_to_ptr.vmem [resolvable:$true] %s6795_s25 }
 0x336   : > { %7752 = vmatprep.subr.bf16.mxu1 %v8814_v44  ;;  %v8819_v21 = vld [vmem:[#allocation9 + $0x18] sm:$0xff]   ;;  %v8821_v55 = vld [vmem:[#allocation9 + $0x20] sm:$0xff]   ;;  %v4731_v10 = vld [vmem:[#allocation3 + $0x8] sm:$0xff]  ;;  %s11152_s14 = sld [smem:[#allocation21_spill]]  ;;  %s11036_s26 = scalar_lea.sflag [#allocation6], %s283_s17 }
 0x337   : > { %v4730_v38 = vld [vmem:[#allocation3] sm:$0xff]  ;;  %v8823_v3 = vld [vmem:[#allocation9 + $0x28] sm:$0xff]   ;;  %v4916_v42 = vrot.slane %v4731_v10, 4  ;;  %v4755_v52 = vshrl.u32 %v4731_v10, 16  ;;  %v4758_v22 = vshll.u32 %v4731_v10, 16  ;;  %v10430_v5 = vld [vmem:[#allocation3 + $0x10] sm:$0xff]  ;;  %s6792_s5 = sadd.s32 %s8255_s9, %s8254_s15 }
 0x338   : > { %v4915_v36 = vrot.slane %v4730_v38, 4  ;;  %v4747_v0 = vshrl.u32 %v4730_v38, 16  ;;  %v4750_v17 = vshll.u32 %v4730_v38, 16  ;;  %v8824_v34 = vld [vmem:[#allocation9 + $0x70] sm:$0xff]   ;;  %v10432_v29 = vld [vmem:[#allocation3 + $0x18] sm:$0xff]  ;;  %v4918_v18 = vrot.slane %v10430_v5, 4 }
 0x339   : > { %7753 = vmatpush3.bf16.msra.mxu1 %v8815_v16  ;;  %v4757_v45 = vrot.slane %v4755_v52, 3  ;;  %v4760_v20 = vrot.slane %v4758_v22, 4  ;;  %v4959_v6 = vrot.slane %v4755_v52, 4  ;;  %v8825_v61 = vld [vmem:[#allocation9 + $0x30] sm:$0xff]   ;;  %v4960_v51 = vrot.slane %v4758_v22, 5  ;;  %v10439_v23 = vld [vmem:[#allocation3 + $0x20] sm:$0xff] }
 0x33a   : > { %7754 = vmatprep.subr.bf16.mxu1 %v8816_v46  ;;  %v4917_v7 = vsel %vm4914_vm2, %v4915_v36, %v4916_v42  ;;  %v4749_v43 = vrot.slane %v4747_v0, 3  ;;  %v4752_v49 = vrot.slane %v4750_v17, 4  ;;  %v4956_v53 = vrot.slane %v4747_v0, 4  ;;  %v10445_v35 = vld [vmem:[#allocation3 + $0x28] sm:$0xff]  ;;  %v8826_v26 = vld [vmem:[#allocation9 + $0x78] sm:$0xff]   ;;  %v8828_v50 = vld [vmem:[#allocation9 + $0xc0] sm:$0xff]  }
 0x33b   : > { %6309 = vmatprep.mubr.bf16.mxu1 %v4917_v7  ;;  %v4957_v28 = vrot.slane %v4750_v17, 5  ;;  %v4919_v1 = vrot.slane %v10432_v29, 4  ;;  %v4761_v11 = vor.u32 %v4760_v20, %v4757_v45  ;;  %v4764_v32 = vshrl.u32 %v10430_v5, 16  ;;  %v8827_v48 = vld [vmem:[#allocation9 + $0x38] sm:$0xff]   ;;  %v10466_v33 = vld [vmem:[#allocation3 + $0x30] sm:$0xff]  ;;  %v8829_v42 = vld [vmem:[#allocation9 + $0x80] sm:$0xff]  }
 0x33c   : > { %v4753_v30 = vor.u32 %v4752_v49, %v4749_v43  ;;  %v4767_v59 = vshll.u32 %v10430_v5, 16  ;;  %v4772_v15 = vshrl.u32 %v10432_v29, 16  ;;  %v4775_v14 = vshll.u32 %v10432_v29, 16  ;;  %v10468_v27 = vld [vmem:[#allocation3 + $0x38] sm:$0xff]  ;;  %v10496_v22 = vld [vmem:[#allocation3 + $0x40] sm:$0xff]  ;;  %v10498_v7 = vld [vmem:[#allocation3 + $0x48] sm:$0xff] }
 0x33d   : > { %7755 = vmatpush3.bf16.msra.mxu1 %v8817_v57  ;;  %v10442_v13 = vsel %vm4914_vm2, %v4918_v18, %v4919_v1  ;;  %v4958_v25 = vor.u32 %v4957_v28, %v4956_v53  ;;  %v4961_v40 = vor.u32 %v4960_v51, %v4959_v6  ;;  %v4766_v4 = vrot.slane %v4764_v32, 3  ;;  %v8830_v49 = vld [vmem:[#allocation9 + $0xc8] sm:$0xff]   ;;  %v8832_v18 = vld [vmem:[#allocation9 + $0xd0] sm:$0xff]   ;;  %v8835_v29 = vld [vmem:[#allocation9 + $0x98] sm:$0xff]   ;;  %s7421_s24 = sshll.u32 %s6792_s5, 7  ;;  %s8970_s6 = scalar_lea.vmem %s11029_s25, 6144 }
 0x33e   : > { %7756 = vmatprep.subr.bf16.mxu1 %v8818_v54  ;;  %v4762_v62 = vsel %vm412_vm0, %v4753_v30, %v4761_v11  ;;  %v4769_v19 = vrot.slane %v4767_v59, 4  ;;  %v4774_v24 = vrot.slane %v4772_v15, 3  ;;  %5245 = vst [vmem:[#allocation2 + $0x20] sm:$0xff] %v10442_v13  ;;  %v4777_v41 = vrot.slane %v4775_v14, 4  ;;  %v8831_v28 = vld [vmem:[#allocation9 + $0x88] sm:$0xff]   ;;  %s11027_s30 = scalar_lea.hbm %s11152_s14, %s7421_s24  ;;  %p8971_p3 = scmp.ne.s32.totalorder %s11029_s25, %s8970_s6 }
 0x33f   : > { %v4921_v2 = vrot.slane %v10439_v23, 4  ;;  %v4922_v9 = vrot.slane %v10445_v35, 4  ;;  %v4781_v63 = vshrl.u32 %v10439_v23, 16  ;;  %v4784_v31 = vshll.u32 %v10439_v23, 16  ;;  %p11153_p13 = scmp.ne.s32.totalorder %s11151_s1, 0  ;;  %s9108_s8 = smov [#allocation10]  }
 0x340   : > { %v4770_v60 = vor.u32 %v4769_v19, %v4766_v4  ;;  %v4789_v12 = vshrl.u32 %v10445_v35, 16  ;;  %v4792_v47 = vshll.u32 %v10445_v35, 16  ;;  %v4778_v8 = vor.u32 %v4777_v41, %v4774_v24  ;;  %v8838_v24 = vld [vmem:[#allocation9 + $0x140] sm:$0xff]   ;;  %v8833_v41 = vld [vmem:[#allocation9 + $0x90] sm:$0xff]   ;;  %s8974_s11 = sshll.u32 %s9108_s8, 4  ;;  %s8975_s11 = int_to_ptr.vmem [resolvable:$false] %s8974_s11 }
 0x341   : > { %7757 = vmatpush3.bf16.msra.mxu1 %v8819_v21  ;;  %v10462_v58 = vsel %vm4914_vm2, %v4921_v2, %v4922_v9  ;;  %v4783_v37 = vrot.slane %v4781_v63, 3  ;;  %v10471_v44 = vsel %vm4955_vm3, %v4958_v25, %v4961_v40  ;;  %v4786_v16 = vrot.slane %v4784_v31, 4  ;;  %v8834_v9 = vld [vmem:[#allocation9 + $0xd8] sm:$0xff]   ;;  %7878 = vmatprep.subr.bf16.mxu0 %v8838_v24  ;;  %p8972_p7 = pnand %p8971_p3, %p11153_p13  ;;  %s8976_s13 = scalar_lea.vmem %s8975_s11, 12288 }
 0x342   : > { %7758 = vmatprep.subr.bf16.mxu1 %v8820_v39  ;;  %v4791_v46 = vrot.slane %v4789_v12, 3  ;;  %v4794_v57 = vrot.slane %v4792_v47, 4  ;;  %v4924_v54 = vrot.slane %v10466_v33, 4  ;;  %5246 = vst [vmem:[#allocation2 + $0x68] sm:$0xff] %v10462_v58  ;;  %v10482_v21 = vsel %vm412_vm0, %v4770_v60, %v4778_v8  ;;  %v8840_v60 = vld [vmem:[#allocation9 + $0x148] sm:$0xff]   ;;  %v10532_v8 = vld [vmem:[#allocation3 + $0x50] sm:$0xff]  ;;  %p8977_p11 = scmp.lt.s32.totalorder %s11029_s25, %s8975_s11  ;;  %p8978_p5 = scmp.lt.s32.totalorder %s8976_s13, %s8970_s6 }
 0x343   : > { %v4925_v39 = vrot.slane %v10468_v27, 4  ;;  %v4787_v38 = vor.u32 %v4786_v16, %v4783_v37  ;;  %v4809_v36 = vshll.u32 %v10468_v27, 16  ;;  %v10500_v43 = vrot.slane %v4764_v32, 4  ;;  %v10534_v37 = vld [vmem:[#allocation3 + $0x58] sm:$0xff]  ;;  %p8973_p9 = pneg %p8972_p7 }
 0x344   : > { %v4795_v10 = vor.u32 %v4794_v57, %v4791_v46  ;;  %v4927_v20 = vrot.slane %v10496_v22, 4  ;;  %v4815_v30 = vshrl.u32 %v10496_v22, 16  ;;  %v4818_v51 = vshll.u32 %v10496_v22, 16  ;;  %p8979_p8 = por %p8978_p5, %p8977_p11 }
 0x345   : > { %7759 = vmatpush3.bf16.msra.mxu1 %v8821_v55  ;;  %v4798_v55 = vshrl.u32 %v10466_v33, 16  ;;  %v10490_v0 = vsel %vm4914_vm2, %v4924_v54, %v4925_v39  ;;  %v4811_v45 = vrot.slane %v4809_v36, 4  ;;  %v4823_v11 = vshrl.u32 %v10498_v7, 16 }
 0x346   : > { %7760 = vmatprep.subr.bf16.mxu1 %v8822_v56  ;;  %v4801_v56 = vshll.u32 %v10466_v33, 16  ;;  %v10503_v53 = vsel %vm412_vm0, %v4787_v38, %v4795_v10  ;;  %5247 = vst [vmem:[#allocation2 + $0xb0] sm:$0xff] %v10490_v0  ;;  %v4826_v32 = vshll.u32 %v10498_v7, 16  ;;  %v4817_v40 = vrot.slane %v4815_v30, 3  ;;  %v8841_v10 = vld [vmem:[#allocation9 + $0x108] sm:$0xff]   ;;  %p8980_p12 = pnand %p8979_p8, %p8973_p9 }
 0x347   : > { %v4800_v17 = vrot.slane %v4798_v55, 3  ;;  %v4825_v4 = vrot.slane %v4823_v11, 3  ;;  %v5254_v16 = vrot.slane %v4767_v59, 5  ;;  %v5256_v46 = vrot.slane %v4772_v15, 4 }
 0x348   : > { %v4803_v52 = vrot.slane %v4801_v56, 4  ;;  %v4828_v19 = vrot.slane %v4826_v32, 4  ;;  %v5257_v57 = vrot.slane %v4775_v14, 5  ;;  %v4930_v54 = vrot.slane %v10532_v8, 4 }
 0x349   : > { %7761 = vmatpush3.bf16.msra.mxu1 %v8823_v3  ;;  %v4806_v3 = vshrl.u32 %v10468_v27, 16  ;;  %v4931_v39 = vrot.slane %v10534_v37, 4  ;;  %v4832_v5 = vshrl.u32 %v10532_v8, 16  ;;  %v4835_v59 = vshll.u32 %v10532_v8, 16  ;;  %v8872_v8 = vld [vmem:[#allocation9 + $0x208] sm:$0xff]  }
 0x34a   : > { %7762 = vmatprep.subr.bf16.mxu1 %v8824_v34  ;;  %v4804_v6 = vor.u32 %v4803_v52, %v4800_v17  ;;  %v4840_v15 = vshrl.u32 %v10534_v37, 16  ;;  %v5255_v17 = vor.u32 %v5254_v16, %v10500_v43  ;;  %v5258_v52 = vor.u32 %v5257_v57, %v5256_v46  ;;  %v8843_v57 = vld [vmem:[#allocation9 + $0xa8] sm:$0xff]  }
 0x34b   : > { %v4808_v34 = vrot.slane %v4806_v3, 3  ;;  %v10551_v14 = vsel %vm4914_vm2, %v4930_v54, %v4931_v39  ;;  %v5268_v35 = vrot.slane %v4801_v56, 5  ;;  %v5277_v33 = vrot.slane %v4823_v11, 4 }
 0x34c   : > { %5249 = vst [vmem:[#allocation2 + $0x140] sm:$0xff] %v10551_v14  ;;  %v5278_v56 = vrot.slane %v4826_v32, 5  ;;  %v5282_v22 = vrot.slane %v4835_v59, 5 }
 0x34d   : > { %7763 = vmatpush3.bf16.msra.mxu1 %v8825_v61  ;;  %v4928_v61 = vrot.slane %v10498_v7, 4  ;;  %v4812_v1 = vor.u32 %v4811_v45, %v4808_v34  ;;  %v4834_v34 = vrot.slane %v4832_v5, 3  ;;  %v4837_v45 = vrot.slane %v4835_v59, 4 }
 0x34e   : > { %7764 = vmatprep.subr.bf16.mxu1 %v8826_v26  ;;  %v4820_v26 = vrot.slane %v4818_v51, 4 }
 0x34f   : > { %v10518_v25 = vsel %vm4914_vm2, %v4927_v20, %v4928_v61  ;;  %v4842_v20 = vrot.slane %v4840_v15, 3  ;;  %v4838_v61 = vor.u32 %v4837_v45, %v4834_v34 }
 0x350   : > { %5248 = vst [vmem:[#allocation2 + $0xf8] sm:$0xff] %v10518_v25  ;;  %v4821_v2 = vor.u32 %v4820_v26, %v4817_v40  ;;  %v8846_v26 = vld [vmem:[#allocation9 + $0x158] sm:$0xff]  }
 0x351   : > { %7765 = vmatpush3.bf16.msra.mxu1 %v8827_v48  ;;  %v8839_v48 = vld [vmem:[#allocation9 + $0x100] sm:$0xff]  }
 0x352   : > { %7814 = vmatprep.subr.bf16.mxu1 %v8828_v50  ;;  %v4829_v50 = vor.u32 %v4828_v19, %v4825_v4  ;;  %7879 = vmatpush3.bf16.msra.mxu0 %v8839_v48  ;;  %v10570_v4 = vld [vmem:[#allocation3 + $0x60] sm:$0xff]  ;;  %v10572_v19 = vld [vmem:[#allocation3 + $0x68] sm:$0xff] }
 0x353   : > { %7880 = vmatprep.subr.bf16.mxu0 %v8840_v60  ;;  %v8842_v48 = vld [vmem:[#allocation9 + $0xe8] sm:$0xff]   ;;  %v4852_v60 = vshll.u32 %v10570_v4, 16  ;;  %v4857_v16 = vshrl.u32 %v10572_v19, 16  ;;  %v11121_v46 = vshll.u32 %v10572_v19, 16 }
 0x354   : > { %6310 = vmatmul.mubr.bf16.vlgmr.msra.gmra.mrb[180].mxu1 %v4762_v62  ;;  %v10525_v62 = vsel %vm412_vm0, %v4804_v6, %v4812_v1  ;;  %v10545_v38 = vsel %vm412_vm0, %v4821_v2, %v4829_v50  ;;  %v10567_v6 = vsel %vm4955_vm3, %v5255_v17, %v5258_v52  ;;  %v8837_v1 = vld [vmem:[#allocation9 + $0xa0] sm:$0xff]   ;;  %v4934_v2 = vrot.slane %v10572_v19, 4  ;;  %v8847_v50 = vld [vmem:[#allocation9 + $0x118] sm:$0xff]   ;;  %v8848_v52 = vld [vmem:[#allocation9 + $0xf0] sm:$0xff]  }
 0x355   : > { %7815 = vmatpush3.bf16.msra.mxu1 %v8829_v42  ;;  %6317 = vmatprep.mubr.bf16.mxu1 %v10442_v13  ;;  %v4843_v42 = vshll.u32 %v10534_v37, 16  ;;  %v4862_v17 = vrot.slane %v11121_v46, 4  ;;  %v8859_v46 = vld [vmem:[#allocation9 + $0x138] sm:$0xff]   ;;  %v11146_v37 = vshll.u32 %v10572_v19, 16 }
 0x356   : > { %7816 = vmatprep.subr.bf16.mxu1 %v8830_v49  ;;  %v8836_v49 = vld [vmem:[#allocation9 + $0xe0] sm:$0xff]   ;;  %7881 = vmatpush3.bf16.msra.mxu0 %v8841_v10  ;;  %v4854_v10 = vrot.slane %v4852_v60, 4 }
 0x357   : > { %v4845_v43 = vrot.slane %v4843_v42, 4  ;;  %6503 = vmatprep.mubr.bf16.mxu0 %v10567_v6  ;;  %v5285_v11 = vrot.slane %v4843_v42, 5  ;;  %v5292_v42 = vrot.slane %v11146_v37, 5 }
 0x359   : > { %7817 = vmatpush3.bf16.msra.mxu1 %v8831_v28  ;;  %v8844_v28 = vld [vmem:[#allocation9 + $0x150] sm:$0xff]   ;;  %v4846_v40 = vor.u32 %v4845_v43, %v4842_v20  ;;  %v8851_v20 = vld [vmem:[#allocation9 + $0x120] sm:$0xff]   ;;  %v5260_v43 = vrot.slane %v4781_v63, 4 }
 0x35a   : > { %7818 = vmatprep.subr.bf16.mxu1 %v8832_v18  ;;  %v8845_v18 = vld [vmem:[#allocation9 + $0x110] sm:$0xff]   ;;  %7882 = vmatprep.subr.bf16.mxu0 %v8844_v28  ;;  %v8852_v28 = vld [vmem:[#allocation9 + $0x168] sm:$0xff]  }
 0x35b   : > { %v10575_v24 = vsel %vm412_vm0, %v4838_v61, %v4846_v40  ;;  %7883 = vmatpush3.bf16.msra.mxu0 %v8845_v18  ;;  %v10599_v61 = vld [vmem:[#allocation3 + $0x70] sm:$0xff]  ;;  %v5261_v18 = vrot.slane %v4784_v31, 5  ;;  %v5263_v40 = vrot.slane %v4789_v12, 4 }
 0x35c   : > { %6318 = vmatmul.mubr.bf16.gmra.mrb[184].mxu1 %v10482_v21  ;;  %7884 = vmatprep.subr.bf16.mxu0 %v8846_v26  ;;  %v10608_v26 = vld [vmem:[#allocation3 + $0x78] sm:$0xff]  ;;  %v11118_v23 = vshll.u32 %v10599_v61, 16  ;;  %v11148_v19 = vshll.u32 %v10599_v61, 16 }
 0x35d   : > { %6325 = vmatprep.mubr.bf16.mxu1 %v10462_v58  ;;  %7819 = vmatpush3.bf16.msra.mxu1 %v8833_v41  ;;  %v4933_v41 = vrot.slane %v10570_v4, 4  ;;  %v4937_v63 = vrot.slane %v10608_v26, 4  ;;  %v11117_v31 = vshrl.u32 %v10608_v26, 16  ;;  %v11119_v12 = vshll.u32 %v10608_v26, 16 }
 0x35e   : > { %7820 = vmatprep.subr.bf16.mxu1 %v8834_v9  ;;  %v4849_v9 = vshrl.u32 %v10570_v4, 16  ;;  %v11147_v4 = vshrl.u32 %v10599_v61, 16 }
 0x35f   : > { %v10584_v54 = vsel %vm4914_vm2, %v4933_v41, %v4934_v2  ;;  %7885 = vmatpush3.bf16.msra.mxu0 %v8847_v50  ;;  %v8849_v41 = vld [vmem:[#allocation9 + $0xb0] sm:$0xff]   ;;  %v8853_v2 = vld [vmem:[#allocation9 + $0x128] sm:$0xff]   ;;  %v11120_v50 = vshrl.u32 %v10599_v61, 16 }
 0x360   : > { %v4851_v39 = vrot.slane %v4849_v9, 3  ;;  %5250 = vst [vmem:[#allocation2 + $0x188] sm:$0xff] %v10584_v54  ;;  %v5288_v59 = vrot.slane %v4849_v9, 4 }
 0x361   : > { %7821 = vmatpush3.bf16.msra.mxu1 %v8835_v29  ;;  %v4859_v29 = vrot.slane %v4857_v16, 3 }
 0x362   : > { %7822 = vmatprep.subr.bf16.mxu1 %v8836_v49  ;;  %v8850_v49 = vld [vmem:[#allocation9 + $0x160] sm:$0xff]   ;;  %v4855_v34 = vor.u32 %v4854_v10, %v4851_v39  ;;  %v8854_v39 = vld [vmem:[#allocation9 + $0xf8] sm:$0xff]  }
 0x363   : > { %v4863_v45 = vor.u32 %v4862_v17, %v4859_v29  ;;  %7886 = vmatprep.subr.bf16.mxu0 %v8850_v49  ;;  %v4871_v29 = vrot.slane %v11118_v23, 4  ;;  %v4876_v17 = vrot.slane %v11117_v31, 3  ;;  %v8856_v49 = vld [vmem:[#allocation9 + $0x170] sm:$0xff]   ;;  %v8858_v31 = vld [vmem:[#allocation9 + $0x178] sm:$0xff]  }
 0x364   : > { %6326 = vmatmul.mubr.bf16.gmra.mrb[188].mxu1 %v10503_v53  ;;  %7887 = vmatpush3.bf16.msra.mxu0 %v8851_v20 }
 0x365   : > { %6333 = vmatprep.mubr.bf16.mxu1 %v10490_v0  ;;  %7823 = vmatpush3.bf16.msra.mxu1 %v8837_v1  ;;  %v10606_v1 = vsel %vm412_vm0, %v4855_v34, %v4863_v45  ;;  %v8855_v34 = vld [vmem:[#allocation9 + $0xb8] sm:$0xff]  }
 0x366   : > { %7824 = vmatprep.subr.bf16.mxu1 %v8842_v48  ;;  %v4936_v48 = vrot.slane %v10599_v61, 4  ;;  %7888 = vmatprep.subr.bf16.mxu0 %v8852_v28  ;;  %v8857_v28 = vld [vmem:[#allocation9 + $0x130] sm:$0xff]  }
 0x368   : > { %v10617_v10 = vsel %vm4914_vm2, %v4936_v48, %v4937_v63  ;;  %7889 = vmatpush3.bf16.msra.mxu0 %v8853_v2  ;;  %v5262_v48 = vor.u32 %v5261_v18, %v5260_v43  ;;  %v5264_v63 = vrot.slane %v4792_v47, 5  ;;  %v5267_v43 = vrot.slane %v4798_v55, 4 }
 0x369   : > { %7825 = vmatpush3.bf16.msra.mxu1 %v8843_v57  ;;  %v4868_v57 = vrot.slane %v11120_v50, 3  ;;  %5251 = vst [vmem:[#allocation2 + $0x1d0] sm:$0xff] %v10617_v10  ;;  %7890 = vmatprep.subr.bf16.mxu0 %v8856_v49  ;;  %v5270_v47 = vrot.slane %v4806_v3, 4  ;;  %v5271_v18 = vrot.slane %v4809_v36, 5  ;;  %v5275_v55 = vrot.slane %v4818_v51, 5  ;;  %v8870_v51 = vld [vmem:[#allocation9 + $0x200] sm:$0xff]  }
 0x36a   : > { %7826 = vmatprep.subr.bf16.mxu1 %v8848_v52  ;;  %v4879_v52 = vrot.slane %v11119_v12, 4  ;;  %v8860_v12 = vld [vmem:[#allocation9 + $0x1c0] sm:$0xff]   ;;  %v5265_v50 = vor.u32 %v5264_v63, %v5263_v40  ;;  %v5269_v40 = vor.u32 %v5268_v35, %v5267_v43  ;;  %v5279_v36 = vor.u32 %v5278_v56, %v5277_v33 }
 0x36b   : > { %v4872_v45 = vor.u32 %v4871_v29, %v4868_v57  ;;  %v5272_v2 = vor.u32 %v5271_v18, %v5270_v47  ;;  %v8876_v57 = vld [vmem:[#allocation9 + $0x218] sm:$0xff]   ;;  %v5296_v29 = vrot.slane %v11148_v19, 5  ;;  %v11150_v49 = vshll.u32 %v10608_v26, 16 }
 0x36c   : > { %6334 = vmatmul.mubr.bf16.gmra.mrb[192].mxu1 %v10525_v62  ;;  %v4880_v20 = vor.u32 %v4879_v52, %v4876_v17  ;;  %7891 = vmatpush3.bf16.msra.mxu0 %v8857_v28 }
 0x36d   : > { %6341 = vmatprep.mubr.bf16.mxu1 %v10518_v25  ;;  %7827 = vmatpush3.bf16.msra.mxu1 %v8849_v41  ;;  %v10636_v41 = vsel %vm4955_vm3, %v5262_v48, %v5265_v50  ;;  %v5274_v50 = vrot.slane %v4815_v30, 4  ;;  %v10658_v27 = vsel %vm4955_vm3, %v5269_v40, %v5272_v2  ;;  %v5281_v30 = vrot.slane %v4832_v5, 4  ;;  %v8878_v48 = vld [vmem:[#allocation9 + $0x220] sm:$0xff]  }
 0x36e   : > { %7828 = vmatprep.subr.bf16.mxu1 %v8854_v39  ;;  %v10633_v23 = vsel %vm412_vm0, %v4872_v45, %v4880_v20  ;;  %7892 = vmatprep.subr.bf16.mxu0 %v8858_v31  ;;  %v5291_v31 = vrot.slane %v4857_v16, 4  ;;  %v5299_v52 = vrot.slane %v11150_v49, 5  ;;  %v5043_v45 = vld [vmem:[#allocation3 + $0x80] sm:$0xff]  ;;  %v5044_v20 = vld [vmem:[#allocation3 + $0x88] sm:$0xff] }
 0x36f   : > { %v5276_v3 = vor.u32 %v5275_v55, %v5274_v50  ;;  %v5283_v32 = vor.u32 %v5282_v22, %v5281_v30  ;;  %v5165_v63 = vshrl.u32 %v5043_v45, 16  ;;  %v5168_v43 = vshll.u32 %v5043_v45, 16  ;;  %v8880_v50 = vld [vmem:[#allocation9 + $0x228] sm:$0xff]  }
 0x370   : > { %7893 = vmatpush3.bf16.msra.mxu0 %v8859_v46  ;;  %v5289_v46 = vrot.slane %v4852_v60, 5  ;;  %v5293_v9 = vor.u32 %v5292_v42, %v5291_v31  ;;  %v5295_v60 = vrot.slane %v11147_v4, 4  ;;  %v5173_v35 = vshrl.u32 %v5044_v20, 16  ;;  %v5328_v4 = vld [vmem:[#allocation3 + $0x30] sm:$0xff] }
 0x371   : > { %7829 = vmatpush3.bf16.msra.mxu1 %v8855_v34  ;;  %v10667_v7 = vsel %vm4955_vm3, %v5276_v3, %v5279_v36  ;;  %8058 = vmatprep.subr.bf16.mxu0 %v8870_v51  ;;  %v5176_v61 = vshll.u32 %v5044_v20, 16  ;;  %v5167_v18 = vrot.slane %v5165_v63, 3  ;;  %v5170_v40 = vrot.slane %v5168_v43, 4 }
 0x372   : > { %7942 = vmatprep.subr.bf16.mxu1 %v8860_v12  ;;  %v8874_v12 = vld [vmem:[#allocation9 + $0x210] sm:$0xff]   ;;  %v5290_v39 = vor.u32 %v5289_v46, %v5288_v59  ;;  %v5297_v34 = vor.u32 %v5296_v29, %v5295_v60  ;;  %v5302_v55 = vrot.slane %v5165_v63, 4  ;;  %v5303_v33 = vrot.slane %v5168_v43, 5 }
 0x373   : > { %6504 = vmatmul.mubr.bf16.vlgmr.msra.gmra.mrb[72].mxu0 %v10442_v13  ;;  %v5284_v13 = vrot.slane %v4840_v15, 4  ;;  %v5178_v2 = vrot.slane %v5176_v61, 4  ;;  %v5171_v56 = vor.u32 %v5170_v40, %v5167_v18  ;;  %v5305_v3 = vrot.slane %v5173_v35, 4 }
 0x374   : > { %6342 = vmatmul.mubr.bf16.gmra.mrb[196].mxu1 %v10545_v38  ;;  %6511 = vmatprep.mubr.bf16.mxu0 %v10636_v41  ;;  %v10691_v16 = vsel %vm4955_vm3, %v5290_v39, %v5293_v9  ;;  %v5306_v36 = vrot.slane %v5176_v61, 5  ;;  %v5304_v30 = vor.u32 %v5303_v33, %v5302_v55  ;;  %v5234_v22 = vrot.slane %v5043_v45, 4  ;;  %v8863_v33 = vld [vmem:[#allocation9 + $0x188] sm:$0xff]  }
 0x375   : > { %6349 = vmatprep.mubr.bf16.mxu1 %v10551_v14  ;;  %v5286_v5 = vor.u32 %v5285_v11, %v5284_v13  ;;  %8059 = vmatpush3.bf16.msra.mxu0 %v8870_v51  ;;  %v5326_v51 = vld [vmem:[#allocation3 + $0x20] sm:$0xff]  ;;  %v5235_v11 = vrot.slane %v5044_v20, 4  ;;  %v8862_v20 = vld [vmem:[#allocation9 + $0x1c8] sm:$0xff]   ;;  %v5360_v63 = vshrl.u32 %v5328_v4, 16  ;;  %v5363_v43 = vshll.u32 %v5328_v4, 16 }
 0x376   : > { %8060 = vmatprep.subr.bf16.mxu0 %v8872_v8  ;;  %v5307_v13 = vor.u32 %v5306_v36, %v5305_v3  ;;  %v5510_v37 = vrot.slane %v5326_v51, 4 }
 0x377   : > { %v10681_v15 = vsel %vm4955_vm3, %v5283_v32, %v5286_v5  ;;  %v5327_v32 = vld [vmem:[#allocation3 + $0x28] sm:$0xff]  ;;  %v5343_v5 = vshrl.u32 %v5326_v51, 16  ;;  %v5558_v55 = vrot.slane %v5363_v43, 5 }
 0x378   : > { %v5351_v46 = vshrl.u32 %v5327_v32, 16  ;;  %v5354_v31 = vshll.u32 %v5327_v32, 16  ;;  %v10712_v42 = vsel %vm4955_vm3, %v5304_v30, %v5307_v13  ;;  %v5511_v39 = vrot.slane %v5327_v32, 4  ;;  %v5330_v30 = vld [vmem:[#allocation3 + $0x40] sm:$0xff]  ;;  %v5331_v32 = vld [vmem:[#allocation3 + $0x48] sm:$0xff] }
 0x379   : > { %8061 = vmatpush3.bf16.msra.mxu0 %v8872_v8  ;;  %v5346_v8 = vshll.u32 %v5326_v51, 16  ;;  %v5345_v9 = vrot.slane %v5343_v5, 3  ;;  %5324 = vst [vmem:[#allocation2 + $0x220] sm:$0xff] %v10712_v42  ;;  %v5550_v29 = vrot.slane %v5343_v5, 4  ;;  %v5362_v51 = vrot.slane %v5360_v63, 3 }
 0x37a   : > { %8062 = vmatprep.subr.bf16.mxu0 %v8874_v12  ;;  %v5356_v19 = vrot.slane %v5354_v31, 4  ;;  %v10721_v49 = vsel %vm4914_vm2, %v5510_v37, %v5511_v39  ;;  %v5554_v45 = vrot.slane %v5354_v31, 5  ;;  %v5365_v13 = vrot.slane %v5363_v43, 4 }
 0x37b   : > { %6512 = vmatmul.mubr.bf16.gmra.mrb[76].mxu0 %v10462_v58  ;;  %v11149_v58 = vshrl.u32 %v10608_v26, 16  ;;  %v5175_v26 = vrot.slane %v5173_v35, 3  ;;  %v5348_v60 = vrot.slane %v5346_v8, 4  ;;  %5542 = vst [vmem:[#allocation2 + $0x38] sm:$0xff] %v10721_v49  ;;  %v8883_v35 = vld [vmem:[#allocation9 + $0x238] sm:$0xff]   ;;  %v5517_v37 = vrot.slane %v5331_v32, 4 }
 0x37c   : > { %6350 = vmatmul.mubr.bf16.gmra.mrb[200].mxu1 %v10575_v24  ;;  %6519 = vmatprep.mubr.bf16.mxu0 %v10658_v27  ;;  %v5366_v31 = vor.u32 %v5365_v13, %v5362_v51  ;;  %v5377_v39 = vshrl.u32 %v5330_v30, 16 }
 0x37d   : > { %6357 = vmatprep.mubr.bf16.mxu1 %v10584_v54  ;;  %v5298_v17 = vrot.slane %v11149_v58, 4  ;;  %8063 = vmatpush3.bf16.msra.mxu0 %v8874_v12  ;;  %v10715_v12 = vsel %vm4914_vm2, %v5234_v22, %v5235_v11  ;;  %v5329_v58 = vld [vmem:[#allocation3 + $0x38] sm:$0xff]  ;;  %v8864_v22 = vld [vmem:[#allocation9 + $0x1d0] sm:$0xff]  }
 0x37e   : > { %8064 = vmatprep.subr.bf16.mxu0 %v8876_v57  ;;  %5252 = vst [vmem:[#allocation2 + $0x218] sm:$0xff] %v10715_v12  ;;  %v5368_v18 = vshrl.u32 %v5329_v58, 16  ;;  %v5371_v40 = vshll.u32 %v5329_v58, 16 }
 0x37f   : > { %v5300_v28 = vor.u32 %v5299_v52, %v5298_v17  ;;  %v8861_v17 = vld [vmem:[#allocation9 + $0x180] sm:$0xff]   ;;  %v5551_v52 = vrot.slane %v5346_v8, 5 }
 0x380   : > { %v5560_v3 = vrot.slane %v5368_v18, 4  ;;  %v5561_v36 = vrot.slane %v5371_v40, 5  ;;  %v5370_v11 = vrot.slane %v5368_v18, 3  ;;  %v5373_v8 = vrot.slane %v5371_v40, 4  ;;  %v8867_v40 = vld [vmem:[#allocation9 + $0x198] sm:$0xff]  }
 0x381   : > { %v10702_v47 = vsel %vm4955_vm3, %v5297_v34, %v5300_v28  ;;  %8065 = vmatpush3.bf16.msra.mxu0 %v8876_v57  ;;  %v5353_v57 = vrot.slane %v5351_v46, 3  ;;  %v5553_v34 = vrot.slane %v5351_v46, 4  ;;  %v5349_v28 = vor.u32 %v5348_v60, %v5345_v9 }
 0x382   : > { %5323 = vst [vmem:[#allocation2 + $0x1d8] sm:$0xff] %v10702_v47  ;;  %8066 = vmatprep.subr.bf16.mxu0 %v8878_v48  ;;  %v5552_v61 = vor.u32 %v5551_v52, %v5550_v29  ;;  %v5562_v5 = vor.u32 %v5561_v36, %v5560_v3  ;;  %v5516_v46 = vrot.slane %v5330_v30, 4  ;;  %v5380_v9 = vshll.u32 %v5330_v30, 16  ;;  %v5332_v29 = vld [vmem:[#allocation3 + $0x50] sm:$0xff] }
 0x383   : > { %6520 = vmatmul.mubr.bf16.gmra.mrb[80].mxu0 %v10490_v0  ;;  %v5179_v0 = vor.u32 %v5178_v2, %v5175_v26  ;;  %v5557_v2 = vrot.slane %v5360_v63, 4  ;;  %v5374_v60 = vor.u32 %v5373_v8, %v5370_v11  ;;  %v5379_v52 = vrot.slane %v5377_v39, 3  ;;  %v5335_v8 = vld [vmem:[#allocation3 + $0x68] sm:$0xff] }
 0x384   : > { %6358 = vmatmul.mubr.bf16.gmra.mrb[204].mxu1 %v10606_v1  ;;  %6527 = vmatprep.mubr.bf16.mxu0 %v10667_v7  ;;  %v5565_v63 = vrot.slane %v5380_v9, 5  ;;  %v5394_v18 = vshrl.u32 %v5332_v29, 16  ;;  %v5519_v30 = vrot.slane %v5332_v29, 4 }
 0x385   : > { %6365 = vmatprep.mubr.bf16.mxu1 %v10617_v10  ;;  %8067 = vmatpush3.bf16.msra.mxu0 %v8878_v48  ;;  %v10709_v59 = vsel %vm412_vm0, %v5171_v56, %v5179_v0  ;;  %v5357_v48 = vor.u32 %v5356_v19, %v5353_v57  ;;  %v5514_v0 = vrot.slane %v5329_v58, 4  ;;  %v5385_v57 = vshrl.u32 %v5331_v32, 16  ;;  %v8866_v58 = vld [vmem:[#allocation9 + $0x1d8] sm:$0xff]  }
 0x386   : > { %8068 = vmatprep.subr.bf16.mxu0 %v8880_v50  ;;  %v5388_v19 = vshll.u32 %v5331_v32, 16  ;;  %v5396_v11 = vrot.slane %v5394_v18, 3 }
 0x387   : > { %v10727_v26 = vsel %vm412_vm0, %v5349_v28, %v5357_v48  ;;  %v5387_v28 = vrot.slane %v5385_v57, 3 }
 0x388   : > { %v5390_v48 = vrot.slane %v5388_v19, 4 }
 0x389   : > { %8069 = vmatpush3.bf16.msra.mxu0 %v8880_v50  ;;  %v5513_v50 = vrot.slane %v5328_v4, 4 }
 0x38b   : > { %6528 = vmatmul.mubr.bf16.gmra.mrb[84].mxu0 %v10518_v25  ;;  %v5555_v25 = vor.u32 %v5554_v45, %v5553_v34  ;;  %v5382_v34 = vrot.slane %v5380_v9, 4  ;;  %v5564_v45 = vrot.slane %v5377_v39, 4 }
 0x38c   : > { %6366 = vmatmul.mubr.bf16.gmra.mrb[208].mxu1 %v10633_v23  ;;  %6535 = vmatprep.mubr.bf16.mxu0 %v10681_v15 }
 0x38d   : > { %6406 = vmatprep.mubr.bf16.mxu1 %v10482_v21  ;;  %v8882_v21 = vld [vmem:[#allocation9 + $0x230] sm:$0xff]   ;;  %v10731_v56 = vsel %vm4955_vm3, %v5552_v61, %v5555_v25  ;;  %v5383_v43 = vor.u32 %v5382_v34, %v5379_v52  ;;  %v5567_v61 = vrot.slane %v5385_v57, 4  ;;  %v5568_v25 = vrot.slane %v5388_v19, 5 }
 0x38e   : > { %8070 = vmatprep.subr.bf16.mxu0 %v8882_v21 }
 0x38f   : > { %8071 = vmatpush3.bf16.msra.mxu0 %v8882_v21  ;;  %v8865_v21 = vld [vmem:[#allocation9 + $0x190] sm:$0xff]   ;;  %v5569_v3 = vor.u32 %v5568_v25, %v5567_v61  ;;  %v8873_v61 = vld [vmem:[#allocation9 + $0x1a8] sm:$0xff]  }
 0x390   : > { %8072 = vmatprep.subr.bf16.mxu0 %v8883_v35 }
 0x393   : > { %6536 = vmatmul.mubr.bf16.gmra.mrb[88].mxu0 %v10551_v14  ;;  %v10746_v14 = vsel %vm412_vm0, %v5366_v31, %v5374_v60  ;;  %v8871_v60 = vld [vmem:[#allocation9 + $0x1e8] sm:$0xff]  }
 0x394   : > { %6407 = vmatmul.mubr.bf16.vlgmr.msra.gmra.mrb[212].mxu1 %v10471_v44  ;;  %v5559_v44 = vor.u32 %v5558_v55, %v5557_v2  ;;  %6543 = vmatprep.mubr.bf16.mxu0 %v10691_v16  ;;  %v5391_v2 = vor.u32 %v5390_v48, %v5387_v28  ;;  %v5566_v55 = vor.u32 %v5565_v63, %v5564_v45  ;;  %v5422_v48 = vshll.u32 %v5335_v8, 16  ;;  %v5337_v63 = vld [vmem:[#allocation3 + $0x78] sm:$0xff] }
 0x395   : > { %7943 = vmatpush3.bf16.msra.mxu1 %v8861_v17  ;;  %6414 = vmatprep.mubr.bf16.mxu1 %v10503_v53  ;;  %v10734_v53 = vsel %vm4914_vm2, %v5513_v50, %v5514_v0  ;;  %v10743_v17 = vsel %vm4914_vm2, %v5516_v46, %v5517_v37  ;;  %v5397_v50 = vshll.u32 %v5332_v29, 16  ;;  %v5571_v0 = vrot.slane %v5394_v18, 4  ;;  %v8869_v46 = vld [vmem:[#allocation9 + $0x1a0] sm:$0xff]  }
 0x396   : > { %7944 = vmatprep.subr.bf16.mxu1 %v8862_v20  ;;  %5543 = vst [vmem:[#allocation2 + $0x80] sm:$0xff] %v10734_v53  ;;  %v10739_v4 = vsel %vm4955_vm3, %v5559_v44, %v5562_v5  ;;  %v5333_v20 = vld [vmem:[#allocation3 + $0x58] sm:$0xff]  ;;  %8073 = vmatpush3.bf16.msra.mxu0 %v8883_v35  ;;  %v5334_v5 = vld [vmem:[#allocation3 + $0x60] sm:$0xff] }
 0x397   : > { %v5402_v35 = vshrl.u32 %v5333_v20, 16  ;;  %v5405_v36 = vshll.u32 %v5333_v20, 16  ;;  %v5520_v51 = vrot.slane %v5333_v20, 4  ;;  %v5399_v32 = vrot.slane %v5397_v50, 4 }
 0x398   : > { %v5522_v29 = vrot.slane %v5334_v5, 4  ;;  %v5411_v34 = vshrl.u32 %v5334_v5, 16  ;;  %v5414_v45 = vshll.u32 %v5334_v5, 16 }
 0x399   : > { %7945 = vmatpush3.bf16.msra.mxu1 %v8863_v33  ;;  %v8868_v33 = vld [vmem:[#allocation9 + $0x1e0] sm:$0xff]   ;;  %v5574_v44 = vrot.slane %v5402_v35, 4  ;;  %v5575_v13 = vrot.slane %v5405_v36, 5  ;;  %v10758_v37 = vsel %vm4914_vm2, %v5519_v30, %v5520_v51  ;;  %v5404_v39 = vrot.slane %v5402_v35, 3 }
 0x39a   : > { %7946 = vmatprep.subr.bf16.mxu1 %v8864_v22  ;;  %v5572_v22 = vrot.slane %v5397_v50, 5  ;;  %v5407_v9 = vrot.slane %v5405_v36, 4  ;;  %v5400_v19 = vor.u32 %v5399_v32, %v5396_v11  ;;  %v5413_v18 = vrot.slane %v5411_v34, 3 }
 0x39b   : > { %6544 = vmatmul.mubr.bf16.gmra.mrb[92].mxu0 %v10584_v54  ;;  %v5576_v57 = vor.u32 %v5575_v13, %v5574_v44  ;;  %v5419_v54 = vshrl.u32 %v5335_v8, 16  ;;  %v5578_v50 = vrot.slane %v5411_v34, 4  ;;  %v5579_v35 = vrot.slane %v5414_v45, 5  ;;  %v8877_v13 = vld [vmem:[#allocation9 + $0x1b0] sm:$0xff]  }
 0x39c   : > { %6415 = vmatmul.mubr.bf16.gmra.mrb[216].mxu1 %v10567_v6  ;;  %v10751_v6 = vsel %vm412_vm0, %v5383_v43, %v5391_v2  ;;  %v5573_v31 = vor.u32 %v5572_v22, %v5571_v0  ;;  %6551 = vmatprep.mubr.bf16.mxu0 %v10702_v47  ;;  %v5408_v52 = vor.u32 %v5407_v9, %v5404_v39  ;;  %v8875_v2 = vld [vmem:[#allocation9 + $0x1f0] sm:$0xff]   ;;  %v5582_v36 = vrot.slane %v5422_v48, 5 }
 0x39d   : > { %6422 = vmatprep.mubr.bf16.mxu1 %v10525_v62  ;;  %7947 = vmatpush3.bf16.msra.mxu1 %v8865_v21  ;;  %v10754_v62 = vsel %vm4955_vm3, %v5566_v55, %v5569_v3  ;;  %v10760_v21 = vld [vmem:[#allocation3 + $0x70] sm:$0xff]  ;;  %v5424_v55 = vrot.slane %v5422_v48, 4  ;;  %v5436_v30 = vshrl.u32 %v5337_v63, 16  ;;  %v5580_v22 = vor.u32 %v5579_v35, %v5578_v50  ;;  %v8881_v48 = vld [vmem:[#allocation9 + $0x1b8] sm:$0xff]  }
 0x39e   : > { %7948 = vmatprep.subr.bf16.mxu1 %v8866_v58  ;;  %v5523_v58 = vrot.slane %v5335_v8, 4  ;;  %v10765_v20 = vsel %vm4955_vm3, %v5573_v31, %v5576_v57  ;;  %v5428_v43 = vshrl.u32 %v10760_v21, 16  ;;  %v10773_v25 = vsel %vm412_vm0, %v5400_v19, %v5408_v52  ;;  %v8879_v31 = vld [vmem:[#allocation9 + $0x1f8] sm:$0xff]  }
 0x39f   : > { %v5431_v0 = vshll.u32 %v10760_v21, 16  ;;  %v5439_v44 = vshll.u32 %v5337_v63, 16  ;;  %v5588_v5 = vrot.slane %v5436_v30, 4  ;;  %v5525_v8 = vrot.slane %v10760_v21, 4  ;;  %v5341_v19 = vld [vmem:[#allocation3 + $0x98] sm:$0xff] }
 0x3a0   : > { %v10768_v28 = vsel %vm4914_vm2, %v5522_v29, %v5523_v58  ;;  %v5585_v51 = vrot.slane %v5428_v43, 4  ;;  %v5430_v57 = vrot.slane %v5428_v43, 3  ;;  %v5438_v52 = vrot.slane %v5436_v30, 3 }
 0x3a1   : > { %7949 = vmatpush3.bf16.msra.mxu1 %v8867_v40  ;;  %v5416_v40 = vrot.slane %v5414_v45, 4  ;;  %v5586_v32 = vrot.slane %v5431_v0, 5  ;;  %v5589_v9 = vrot.slane %v5439_v44, 5  ;;  %v5433_v58 = vrot.slane %v5431_v0, 4 }
 0x3a2   : > { %7950 = vmatprep.subr.bf16.mxu1 %v8868_v33  ;;  %v5581_v33 = vrot.slane %v5419_v54, 4  ;;  %v5441_v45 = vrot.slane %v5439_v44, 4  ;;  %v5470_v43 = vshrl.u32 %v5341_v19, 16 }
 0x3a3   : > { %v5417_v3 = vor.u32 %v5416_v40, %v5413_v18  ;;  %6552 = vmatmul.mubr.bf16.gmra.mrb[96].mxu0 %v10617_v10  ;;  %v5587_v10 = vor.u32 %v5586_v32, %v5585_v51  ;;  %v5590_v21 = vor.u32 %v5589_v9, %v5588_v5  ;;  %v5473_v18 = vshll.u32 %v5341_v19, 16 }
 0x3a4   : > { %6423 = vmatmul.mubr.bf16.gmra.mrb[220].mxu1 %v10636_v41  ;;  %v5421_v41 = vrot.slane %v5419_v54, 3  ;;  %v5583_v11 = vor.u32 %v5582_v36, %v5581_v33  ;;  %6559 = vmatprep.mubr.bf16.mxu0 %v10712_v42  ;;  %v5602_v50 = vrot.slane %v5470_v43, 4  ;;  %v5532_v33 = vrot.slane %v5341_v19, 4 }
 0x3a5   : > { %6430 = vmatprep.mubr.bf16.mxu1 %v10545_v38  ;;  %7951 = vmatpush3.bf16.msra.mxu1 %v8869_v46  ;;  %v5340_v46 = vld [vmem:[#allocation3 + $0x90] sm:$0xff]  ;;  %v5591_v40 = vsel %vm4955_vm3, %v5587_v10, %v5590_v21  ;;  %v5603_v35 = vrot.slane %v5473_v18, 5  ;;  %v5472_v0 = vrot.slane %v5470_v43, 3  ;;  %v5475_v44 = vrot.slane %v5473_v18, 4 }
 0x3a6   : > { %7952 = vmatprep.subr.bf16.mxu1 %v8871_v60  ;;  %v5425_v38 = vor.u32 %v5424_v55, %v5421_v41  ;;  %v5526_v60 = vrot.slane %v5337_v63, 4  ;;  %v5584_v29 = vsel %vm4955_vm3, %v5580_v22, %v5583_v11  ;;  %v5462_v54 = vshrl.u32 %v5340_v46, 16 }
 0x3a7   : > { %v5465_v63 = vshll.u32 %v5340_v46, 16  ;;  %v5442_v41 = vor.u32 %v5441_v45, %v5438_v52  ;;  %v5531_v55 = vrot.slane %v5340_v46, 4  ;;  %v5476_v11 = vor.u32 %v5475_v44, %v5472_v0 }
 0x3a8   : > { %v10780_v39 = vsel %vm412_vm0, %v5417_v3, %v5425_v38  ;;  %v5527_v34 = vsel %vm4914_vm2, %v5525_v8, %v5526_v60  ;;  %v5464_v36 = vrot.slane %v5462_v54, 3  ;;  %v5604_v38 = vor.u32 %v5603_v35, %v5602_v50 }
 0x3a9   : > { %7953 = vmatpush3.bf16.msra.mxu1 %v8873_v61  ;;  %v5434_v61 = vor.u32 %v5433_v58, %v5430_v57  ;;  %v5533_v22 = vsel %vm4914_vm2, %v5531_v55, %v5532_v33 }
 0x3aa   : > { %7954 = vmatprep.subr.bf16.mxu1 %v8875_v2  ;;  %v5599_v2 = vrot.slane %v5462_v54, 4 }
 0x3ab   : > { %v5443_v3 = vsel %vm412_vm0, %v5434_v61, %v5442_v41  ;;  %6560 = vmatmul.mubr.bf16.gmra.mrb[100].mxu0 %v10715_v12 }
 0x3ac   : > { %6431 = vmatmul.mubr.bf16.gmra.mrb[224].mxu1 %v10658_v27  ;;  %v5600_v27 = vrot.slane %v5465_v63, 5  ;;  %8074 = vmatprep.mubr.bf16.mxu0 %v10731_v56 }
 0x3ad   : > { %6438 = vmatprep.mubr.bf16.mxu1 %v10575_v24  ;;  %7955 = vmatpush3.bf16.msra.mxu1 %v8877_v13  ;;  %v5467_v24 = vrot.slane %v5465_v63, 4 }
 0x3ae   : > { %7956 = vmatprep.subr.bf16.mxu1 %v8879_v31  ;;  %v5601_v30 = vor.u32 %v5600_v27, %v5599_v2 }
 0x3af   : > { %v5468_v51 = vor.u32 %v5467_v24, %v5464_v36 }
 0x3b0   : > { %v5605_v13 = vsel %vm4955_vm3, %v5601_v30, %v5604_v38 }
 0x3b1   : > { %7957 = vmatpush3.bf16.msra.mxu1 %v8881_v48  ;;  %v5477_v32 = vsel %vm412_vm0, %v5468_v51, %v5476_v11 }
 0x3b3   : > { %8075 = vmatmul.mubr.bf16.vlgmr.msra.gmra.mrb[104].mxu0 %v10739_v4 }
 0x3b4   : > { %6439 = vmatmul.mubr.bf16.gmra.mrb[228].mxu1 %v10667_v7  ;;  %8078 = vmatprep.mubr.bf16.mxu0 %v10754_v62 }
 0x3b5   : > { %6446 = vmatprep.mubr.bf16.mxu1 %v10606_v1 }
 0x3bb   : > { %8079 = vmatmul.mubr.bf16.gmra.mrb[108].mxu0 %v10765_v20 }
 0x3bc   : > { %6447 = vmatmul.mubr.bf16.gmra.mrb[232].mxu1 %v10681_v15  ;;  %8082 = vmatprep.mubr.bf16.mxu0 %v5584_v29 }
 0x3bd   : > { %6454 = vmatprep.mubr.bf16.mxu1 %v10633_v23 }
 0x3c3   : > { %8083 = vmatmul.mubr.bf16.gmra.mrb[112].mxu0 %v5591_v40 }
 0x3c4   : > { %6455 = vmatmul.mubr.bf16.gmra.mrb[236].mxu1 %v10691_v16  ;;  %8086 = vmatprep.mubr.bf16.mxu0 %v10712_v42 }
 0x3c5   : > { %6462 = vmatprep.mubr.bf16.mxu1 %v10709_v59 }
 0x3cb   : > { %8087 = vmatmul.mubr.bf16.gmra.mrb[116].mxu0 %v5605_v13 }
 0x3cc   : > { %6463 = vmatmul.mubr.bf16.gmra.mrb[240].mxu1 %v10702_v47 }
 0x3cd   : > { %6600 = vmatprep.mubr.bf16.mxu1 %v10721_v49 }
 0x3d4   : > { %6601 = vmatmul.mubr.bf16.vlgmr.msra.gmra.mrb[244].mxu1 %v10727_v26 }
 0x3d5   : > { %6608 = vmatprep.mubr.bf16.mxu1 %v10734_v53 }
 0x3dc   : > { %6609 = vmatmul.mubr.bf16.gmra.mrb[248].mxu1 %v10746_v14 }
 0x3dd   : > { %6616 = vmatprep.mubr.bf16.mxu1 %v10743_v17 }
 0x3e4   : > { %6617 = vmatmul.mubr.bf16.gmra.mrb[252].mxu1 %v10751_v6 }
 0x3e5   : > { %6624 = vmatprep.mubr.bf16.mxu1 %v10758_v37 }
 0x3ec   : > { %6625 = vmatmul.mubr.bf16.gmra.mrb[0].mxu1 %v10773_v25 }
 0x3ed   : > { %6632 = vmatprep.mubr.bf16.mxu1 %v10768_v28 }
 0x3f4   : > { %6633 = vmatmul.mubr.bf16.gmra.mrb[4].mxu1 %v10780_v39 }
 0x3f5   : > { %6640 = vmatprep.mubr.bf16.mxu1 %v5527_v34 }
 0x3fc   : > { %6641 = vmatmul.mubr.bf16.gmra.mrb[8].mxu1 %v5443_v3 }
 0x3fd   : > { %6648 = vmatprep.mubr.bf16.mxu1 %v10715_v12 }
 0x404   : > { %6649 = vmatmul.mubr.bf16.gmra.mrb[12].mxu1 %v10709_v59 }
 0x405   : > { %6656 = vmatprep.mubr.bf16.mxu1 %v5533_v22 }
 0x40c   : > { %6657 = vmatmul.mubr.bf16.gmra.mrb[16].mxu1 %v5477_v32 }
 0x427   : > { %v7766_v1 = vpop.f32.mrb[180].mxu1 }
 0x428   : > { %v7767_v23 = vpop.f32.mrb[181].mxu1 }
 0x429   : > { %v10816_v7 = vadd.f32 %v7767_v23, %v7766_v1  ;;  %v7769_v15 = vpop.f32.mrb[182].mxu1 }
 0x42a   : > { %v7770_v16 = vpop.f32.mrb[183].mxu1 }
 0x42b   : > { %v10818_v47 = vadd.f32 %v7770_v16, %v7769_v15 }
 0x42f   : > { %v7772_v42 = vpop.f32.mrb[184].mxu1 }
 0x430   : > { %v7773_v49 = vpop.f32.mrb[185].mxu1 }
 0x431   : > { %v10820_v26 = vadd.f32 %v7773_v49, %v7772_v42  ;;  %v7775_v56 = vpop.f32.mrb[186].mxu1  ;;  %v10855_v42 = vld [vmem:[%s11101_s4] ss:$0 sm:$0xff] }
 0x432   : > { %v7776_v53 = vpop.f32.mrb[187].mxu1 }
 0x433   : > { %v10822_v4 = vadd.f32 %v7776_v53, %v7775_v56 }
 0x437   : > { %v7778_v12 = vpop.f32.mrb[188].mxu1 }
 0x438   : > { %v7779_v59 = vpop.f32.mrb[189].mxu1 }
 0x439   : > { %v10824_v17 = vadd.f32 %v7779_v59, %v7778_v12  ;;  %v7781_v14 = vpop.f32.mrb[190].mxu1 }
 0x43a   : > { %v7782_v6 = vpop.f32.mrb[191].mxu1 }
 0x43b   : > { %v10826_v62 = vadd.f32 %v7782_v6, %v7781_v14  ;;  %v6312_v6 = vadd.f32 %v10816_v7, %v10855_v42 }
 0x43f   : > { %v7784_v37 = vpop.f32.mrb[192].mxu1 }
 0x440   : > { %v7785_v20 = vpop.f32.mrb[193].mxu1 }
 0x441   : > { %v10828_v28 = vadd.f32 %v7785_v20, %v7784_v37  ;;  %v7787_v25 = vpop.f32.mrb[194].mxu1 }
 0x442   : > { %v7788_v5 = vpop.f32.mrb[195].mxu1 }
 0x443   : > { %v10830_v8 = vadd.f32 %v7788_v5, %v7787_v25  ;;  %v6315_v5 = vadd.f32 %v10818_v47, %v10855_v42  ;;  %v6320_v47 = vadd.f32 %v10820_v26, %v10855_v42 }
 0x446   : > { %v7894_v19 = vpop.f32.mrb[72].mxu0 }
 0x447   : > { %v7790_v46 = vpop.f32.mrb[196].mxu1  ;;  %v7895_v29 = vpop.f32.mrb[73].mxu0 }
 0x448   : > { %v7791_v31 = vpop.f32.mrb[197].mxu1  ;;  %v7896_v10 = vadd.f32 %v7895_v29, %v7894_v19  ;;  %v7897_v58 = vpop.f32.mrb[74].mxu0 }
 0x449   : > { %v10832_v39 = vadd.f32 %v7791_v31, %v7790_v46  ;;  %v7793_v9 = vpop.f32.mrb[198].mxu1  ;;  %v7898_v21 = vpop.f32.mrb[75].mxu0 }
 0x44a   : > { %v7794_v60 = vpop.f32.mrb[199].mxu1  ;;  %v7899_v45 = vadd.f32 %v7898_v21, %v7897_v58 }
 0x44b   : > { %v10834_v57 = vadd.f32 %v7794_v60, %v7793_v9 }
 0x44e   : > { %v7900_v43 = vpop.f32.mrb[76].mxu0 }
 0x44f   : > { %v7796_v52 = vpop.f32.mrb[200].mxu1  ;;  %v7901_v18 = vpop.f32.mrb[77].mxu0 }
 0x450   : > { %v7797_v34 = vpop.f32.mrb[201].mxu1  ;;  %v7902_v40 = vadd.f32 %v7901_v18, %v7900_v43  ;;  %v7903_v41 = vpop.f32.mrb[78].mxu0 }
 0x451   : > { %v10836_v54 = vadd.f32 %v7797_v34, %v7796_v52  ;;  %v7799_v48 = vpop.f32.mrb[202].mxu1  ;;  %v7904_v55 = vpop.f32.mrb[79].mxu0 }
 0x452   : > { %v7800_v61 = vpop.f32.mrb[203].mxu1  ;;  %v7905_v50 = vadd.f32 %v7904_v55, %v7903_v41 }
 0x453   : > { %v10838_v63 = vadd.f32 %v7800_v61, %v7799_v48 }
 0x456   : > { %v7906_v24 = vpop.f32.mrb[80].mxu0 }
 0x457   : > { %v7802_v2 = vpop.f32.mrb[204].mxu1  ;;  %v7907_v0 = vpop.f32.mrb[81].mxu0 }
 0x458   : > { %v7803_v27 = vpop.f32.mrb[205].mxu1  ;;  %v10844_v30 = vadd.f32 %v7907_v0, %v7906_v24  ;;  %v7909_v38 = vpop.f32.mrb[82].mxu0 }
 0x459   : > { %v10840_v35 = vadd.f32 %v7803_v27, %v7802_v2  ;;  %v7805_v33 = vpop.f32.mrb[206].mxu1  ;;  %v7910_v44 = vpop.f32.mrb[83].mxu0 }
 0x45a   : > { %v7806_v3 = vpop.f32.mrb[207].mxu1  ;;  %v10846_v13 = vadd.f32 %v7910_v44, %v7909_v38 }
 0x45b   : > { %v10842_v36 = vadd.f32 %v7806_v3, %v7805_v33 }
 0x45e   : > { %v7912_v15 = vpop.f32.mrb[84].mxu0 }
 0x45f   : > { %v7808_v22 = vpop.f32.mrb[208].mxu1  ;;  %v7913_v16 = vpop.f32.mrb[85].mxu0 }
 0x460   : > { %v7809_v51 = vpop.f32.mrb[209].mxu1  ;;  %v10857_v49 = vadd.f32 %v7913_v16, %v7912_v15  ;;  %v7915_v56 = vpop.f32.mrb[86].mxu0 }
 0x461   : > { %v10848_v11 = vadd.f32 %v7809_v51, %v7808_v22  ;;  %v7811_v32 = vpop.f32.mrb[210].mxu1  ;;  %v7916_v12 = vpop.f32.mrb[87].mxu0 }
 0x462   : > { %v7812_v1 = vpop.f32.mrb[211].mxu1  ;;  %v10859_v14 = vadd.f32 %v7916_v12, %v7915_v56 }
 0x463   : > { %v10850_v23 = vadd.f32 %v7812_v1, %v7811_v32 }
 0x466   : > { %v7918_v9 = vpop.f32.mrb[88].mxu0 }
 0x467   : > { %v7830_v53 = vpop.f32.mrb[212].mxu1  ;;  %v7919_v29 = vpop.f32.mrb[89].mxu0 }
 0x468   : > { %v7831_v59 = vpop.f32.mrb[213].mxu1  ;;  %v10867_v58 = vadd.f32 %v7919_v29, %v7918_v9  ;;  %v7921_v52 = vpop.f32.mrb[90].mxu0 }
 0x469   : > { %v7832_v37 = vadd.f32 %v7831_v59, %v7830_v53  ;;  %v7833_v20 = vpop.f32.mrb[214].mxu1  ;;  %v7922_v7 = vpop.f32.mrb[91].mxu0 }
 0x46a   : > { %v7834_v25 = vpop.f32.mrb[215].mxu1  ;;  %v10871_v61 = vadd.f32 %v7922_v7, %v7921_v52 }
 0x46b   : > { %v6409_v46 = vadd.f32 %v7832_v37, %v6312_v6  ;;  %v7835_v31 = vadd.f32 %v7834_v25, %v7833_v20 }
 0x46d   : > { %v6412_v60 = vadd.f32 %v7835_v31, %v6315_v5  ;;  %v10865_v19 = vadd.f32 %v7896_v10, %v6409_v46  ;;  %v6323_v10 = vadd.f32 %v10822_v4, %v10855_v42  ;;  %v6328_v4 = vadd.f32 %v10824_v17, %v10855_v42 }
 0x46e   : > { %v7924_v27 = vpop.f32.mrb[92].mxu0 }
 0x46f   : > { %v10869_v21 = vadd.f32 %v7899_v45, %v6412_v60  ;;  %v7836_v34 = vpop.f32.mrb[216].mxu1  ;;  %v7925_v3 = vpop.f32.mrb[93].mxu0 }
 0x470   : > { %v7837_v48 = vpop.f32.mrb[217].mxu1  ;;  %v10879_v24 = vadd.f32 %v7925_v3, %v7924_v27  ;;  %v7927_v0 = vpop.f32.mrb[94].mxu0 }
 0x471   : > { %v7838_v43 = vadd.f32 %v7837_v48, %v7836_v34  ;;  %v7839_v18 = vpop.f32.mrb[218].mxu1  ;;  %v7928_v26 = vpop.f32.mrb[95].mxu0 }
 0x472   : > { %v7840_v41 = vpop.f32.mrb[219].mxu1  ;;  %v10883_v51 = vadd.f32 %v7928_v26, %v7927_v0 }
 0x473   : > { %v6417_v2 = vadd.f32 %v7838_v43, %v6320_v47  ;;  %v7841_v55 = vadd.f32 %v7840_v41, %v7839_v18 }
 0x475   : > { %v6420_v33 = vadd.f32 %v7841_v55, %v6323_v10  ;;  %v10877_v45 = vadd.f32 %v7902_v40, %v6417_v2  ;;  %v6331_v40 = vadd.f32 %v10826_v62, %v10855_v42  ;;  %v6336_v62 = vadd.f32 %v10828_v28, %v10855_v42 }
 0x476   : > { %v7930_v53 = vpop.f32.mrb[96].mxu0 }
 0x477   : > { %v10881_v38 = vadd.f32 %v7905_v50, %v6420_v33  ;;  %v7842_v22 = vpop.f32.mrb[220].mxu1  ;;  %v7931_v59 = vpop.f32.mrb[97].mxu0 }
 0x478   : > { %v7843_v44 = vpop.f32.mrb[221].mxu1  ;;  %v10892_v6 = vadd.f32 %v7931_v59, %v7930_v53  ;;  %v7933_v37 = vpop.f32.mrb[98].mxu0  ;;  %v6355_v53 = vadd.f32 %v10838_v63, %v10855_v42  ;;  %v6360_v63 = vadd.f32 %v10840_v35, %v10855_v42 }
 0x479   : > { %v7844_v32 = vadd.f32 %v7843_v44, %v7842_v22  ;;  %v7845_v1 = vpop.f32.mrb[222].mxu1  ;;  %v7934_v25 = vpop.f32.mrb[99].mxu0 }
 0x47a   : > { %v7846_v15 = vpop.f32.mrb[223].mxu1  ;;  %v10897_v46 = vadd.f32 %v7934_v25, %v7933_v37 }
 0x47b   : > { %v6425_v16 = vadd.f32 %v7844_v32, %v6328_v4  ;;  %v7847_v56 = vadd.f32 %v7846_v15, %v7845_v1 }
 0x47d   : > { %v6428_v12 = vadd.f32 %v7847_v56, %v6331_v40  ;;  %v10890_v50 = vadd.f32 %v10844_v30, %v6425_v16  ;;  %v6339_v30 = vadd.f32 %v10830_v8, %v10855_v42  ;;  %v6344_v8 = vadd.f32 %v10832_v39, %v10855_v42 }
 0x47e   : > { %v7936_v34 = vpop.f32.mrb[100].mxu0 }
 0x47f   : > { %v10895_v20 = vadd.f32 %v10846_v13, %v6428_v12  ;;  %v7848_v17 = vpop.f32.mrb[224].mxu1  ;;  %v7937_v48 = vpop.f32.mrb[101].mxu0 }
 0x480   : > { %v7849_v5 = vpop.f32.mrb[225].mxu1  ;;  %v10906_v47 = vadd.f32 %v7937_v48, %v7936_v34  ;;  %v7939_v43 = vpop.f32.mrb[102].mxu0 }
 0x481   : > { %v7850_v31 = vadd.f32 %v7849_v5, %v7848_v17  ;;  %v7851_v9 = vpop.f32.mrb[226].mxu1  ;;  %v7940_v41 = vpop.f32.mrb[103].mxu0 }
 0x482   : > { %v7852_v60 = vpop.f32.mrb[227].mxu1  ;;  %v7941_v2 = vadd.f32 %v7940_v41, %v7939_v43 }
 0x483   : > { %v6433_v29 = vadd.f32 %v7850_v31, %v6336_v62  ;;  %v7853_v52 = vadd.f32 %v7852_v60, %v7851_v9 }
 0x485   : > { %v6436_v7 = vadd.f32 %v7853_v52, %v6339_v30  ;;  %v10904_v13 = vadd.f32 %v10857_v49, %v6433_v29  ;;  %v6347_v49 = vadd.f32 %v10834_v57, %v10855_v42  ;;  %v6352_v57 = vadd.f32 %v10836_v54, %v10855_v42 }
 0x486   : > { %v10915_v22 = vpop.f32.mrb[104].mxu0 }
 0x487   : > { %v10909_v18 = vadd.f32 %v10859_v14, %v6436_v7  ;;  %v7854_v28 = vpop.f32.mrb[228].mxu1  ;;  %v6699_v44 = vpop.f32.mrb[105].mxu0 }
 0x488   : > { %v7855_v10 = vpop.f32.mrb[229].mxu1  ;;  %v10920_v4 = vpop.f32.mrb[106].mxu0 }
 0x489   : > { %v7856_v55 = vadd.f32 %v7855_v10, %v7854_v28  ;;  %v7857_v27 = vpop.f32.mrb[230].mxu1  ;;  %v6702_v1 = vpop.f32.mrb[107].mxu0 }
 0x48a   : > { %v7858_v33 = vpop.f32.mrb[231].mxu1 }
 0x48b   : > { %v6441_v3 = vadd.f32 %v7856_v55, %v6344_v8  ;;  %v7859_v0 = vadd.f32 %v7858_v33, %v7857_v27 }
 0x48d   : > { %v6444_v26 = vadd.f32 %v7859_v0, %v6347_v49  ;;  %v10918_v14 = vadd.f32 %v10867_v58, %v6441_v3 }
 0x48e   : > { %v10929_v59 = vpop.f32.mrb[108].mxu0 }
 0x48f   : > { %v10923_v32 = vadd.f32 %v10871_v61, %v6444_v26  ;;  %v7860_v39 = vpop.f32.mrb[232].mxu1  ;;  %v10934_v17 = vpop.f32.mrb[109].mxu0 }
 0x490   : > { %v7861_v15 = vpop.f32.mrb[233].mxu1  ;;  %v10936_v25 = vpop.f32.mrb[110].mxu0 }
 0x491   : > { %v7862_v40 = vadd.f32 %v7861_v15, %v7860_v39  ;;  %v7863_v16 = vpop.f32.mrb[234].mxu1  ;;  %v10941_v62 = vpop.f32.mrb[111].mxu0 }
 0x492   : > { %v7864_v56 = vpop.f32.mrb[235].mxu1 }
 0x493   : > { %v6449_v58 = vadd.f32 %v7862_v40, %v6352_v57  ;;  %v7865_v12 = vadd.f32 %v7864_v56, %v7863_v16 }
 0x495   : > { %v6452_v37 = vadd.f32 %v7865_v12, %v6355_v53  ;;  %v10932_v61 = vadd.f32 %v10879_v24, %v6449_v58  ;;  %v6363_v24 = vadd.f32 %v10842_v36, %v10855_v42  ;;  %v6368_v36 = vadd.f32 %v10848_v11, %v10855_v42 }
 0x496   : > { %v10947_v34 = vpop.f32.mrb[112].mxu0 }
 0x497   : > { %v10939_v54 = vadd.f32 %v10883_v51, %v6452_v37  ;;  %v7866_v5 = vpop.f32.mrb[236].mxu1  ;;  %v10952_v48 = vpop.f32.mrb[113].mxu0 }
 0x498   : > { %v7867_v31 = vpop.f32.mrb[237].mxu1  ;;  %v10954_v43 = vpop.f32.mrb[114].mxu0 }
 0x499   : > { %v7868_v9 = vadd.f32 %v7867_v31, %v7866_v5  ;;  %v7869_v60 = vpop.f32.mrb[238].mxu1  ;;  %v10959_v41 = vpop.f32.mrb[115].mxu0 }
 0x49a   : > { %v7870_v30 = vpop.f32.mrb[239].mxu1 }
 0x49b   : > { %v6457_v29 = vadd.f32 %v7868_v9, %v6360_v63  ;;  %v7871_v52 = vadd.f32 %v7870_v30, %v7869_v60 }
 0x49d   : > { %v6460_v7 = vadd.f32 %v7871_v52, %v6363_v24  ;;  %v10950_v51 = vadd.f32 %v10892_v6, %v6457_v29  ;;  %v6371_v6 = vadd.f32 %v10850_v23, %v10855_v42 }
 0x49e   : > { %v10965_v3 = vpop.f32.mrb[116].mxu0 }
 0x49f   : > { %v10957_v35 = vadd.f32 %v10897_v46, %v6460_v7  ;;  %v7872_v28 = vpop.f32.mrb[240].mxu1  ;;  %v10970_v26 = vpop.f32.mrb[117].mxu0 }
 0x4a0   : > { %v7873_v10 = vpop.f32.mrb[241].mxu1  ;;  %v10972_v39 = vpop.f32.mrb[118].mxu0 }
 0x4a1   : > { %v7874_v8 = vadd.f32 %v7873_v10, %v7872_v28  ;;  %v7875_v55 = vpop.f32.mrb[242].mxu1  ;;  %v10976_v57 = vpop.f32.mrb[119].mxu0 }
 0x4a2   : > { %v7876_v27 = vpop.f32.mrb[243].mxu1 }
 0x4a3   : > { %v6465_v33 = vadd.f32 %v7874_v8, %v6368_v36  ;;  %v7877_v49 = vadd.f32 %v7876_v27, %v7875_v55 }
 0x4a5   : > { %v6468_v46 = vadd.f32 %v7877_v49, %v6371_v6  ;;  %v10968_v0 = vadd.f32 %v10906_v47, %v6465_v33 }
 0x4a7   : > { %v10974_v11 = vadd.f32 %v7941_v2, %v6468_v46  ;;  %v7958_v15 = vpop.f32.mrb[244].mxu1 }
 0x4a8   : > { %v7959_v23 = vpop.f32.mrb[245].mxu1 }
 0x4a9   : > { %v7960_v42 = vadd.f32 %v7959_v23, %v7958_v15  ;;  %v7961_v40 = vpop.f32.mrb[246].mxu1 }
 0x4aa   : > { %v7962_v16 = vpop.f32.mrb[247].mxu1 }
 0x4ab   : > { %v7963_v56 = vadd.f32 %v7962_v16, %v7961_v40  ;;  %v6603_v53 = vadd.f32 %v7960_v42, %v10865_v19 }
 0x4ad   : > { %v6700_v47 = vadd.f32 %v6699_v44, %v6603_v53  ;;  %v6606_v58 = vadd.f32 %v7963_v56, %v10869_v21 }
 0x4af   : > { %6762 = vst [vmem:[%s10363_s29 + $0x10] sm:$0xff] %v6700_v47  ;;  %v6703_v12 = vadd.f32 %v6702_v1, %v6606_v58  ;;  %v7964_v37 = vpop.f32.mrb[248].mxu1 }
 0x4b0   : > { %v7965_v2 = vpop.f32.mrb[249].mxu1 }
 0x4b1   : > { %6763 = vst [vmem:[%s10363_s29 + $0x28] sm:$0xff] %v6703_v12  ;;  %v7966_v5 = vadd.f32 %v7965_v2, %v7964_v37  ;;  %v7967_v31 = vpop.f32.mrb[250].mxu1 }
 0x4b2   : > { %v7968_v63 = vpop.f32.mrb[251].mxu1 }
 0x4b3   : > { %v6611_v9 = vadd.f32 %v7966_v5, %v10877_v45  ;;  %v7969_v60 = vadd.f32 %v7968_v63, %v7967_v31 }
 0x4b5   : > { %v6708_v30 = vadd.f32 %v10915_v22, %v6611_v9  ;;  %v6614_v19 = vadd.f32 %v7969_v60, %v10881_v38 }
 0x4b7   : > { %6764 = vst [vmem:[%s10363_s29 + $0x40] sm:$0xff] %v6708_v30  ;;  %v6711_v21 = vadd.f32 %v10920_v4, %v6614_v19  ;;  %v7970_v44 = vpop.f32.mrb[252].mxu1 }
 0x4b8   : > { %v7971_v1 = vpop.f32.mrb[253].mxu1 }
 0x4b9   : > { %6765 = vst [vmem:[%s10363_s29 + $0x58] sm:$0xff] %v6711_v21  ;;  %v7972_v24 = vadd.f32 %v7971_v1, %v7970_v44  ;;  %v7973_v29 = vpop.f32.mrb[254].mxu1 }
 0x4ba   : > { %v7974_v52 = vpop.f32.mrb[255].mxu1 }
 0x4bb   : > { %v7975_v7 = vadd.f32 %v7974_v52, %v7973_v29  ;;  %v6619_v45 = vadd.f32 %v7972_v24, %v10890_v50 }
 0x4bd   : > { %v6716_v28 = vadd.f32 %v10934_v17, %v6619_v45  ;;  %v6622_v22 = vadd.f32 %v7975_v7, %v10895_v20 }
 0x4bf   : > { %6766 = vst [vmem:[%s10363_s29 + $0x70] sm:$0xff] %v6716_v28  ;;  %v6719_v38 = vadd.f32 %v10941_v62, %v6622_v22  ;;  %v7976_v10 = vpop.f32.mrb[0].mxu1 }
 0x4c0   : > { %v7977_v4 = vpop.f32.mrb[1].mxu1 }
 0x4c1   : > { %6767 = vst [vmem:[%s10363_s29 + $0x88] sm:$0xff] %v6719_v38  ;;  %v7978_v36 = vadd.f32 %v7977_v4, %v7976_v10  ;;  %v7979_v8 = vpop.f32.mrb[2].mxu1 }
 0x4c2   : > { %v7980_v55 = vpop.f32.mrb[3].mxu1 }
 0x4c3   : > { %v6627_v27 = vadd.f32 %v7978_v36, %v10904_v13  ;;  %v7981_v6 = vadd.f32 %v7980_v55, %v7979_v8 }
 0x4c5   : > { %v6724_v50 = vadd.f32 %v10929_v59, %v6627_v27  ;;  %v6630_v17 = vadd.f32 %v7981_v6, %v10909_v18 }
 0x4c7   : > { %6768 = vst [vmem:[%s10363_s29 + $0xa0] sm:$0xff] %v6724_v50  ;;  %v6727_v20 = vadd.f32 %v10936_v25, %v6630_v17  ;;  %v7982_v33 = vpop.f32.mrb[4].mxu1 }
 0x4c8   : > { %v7983_v62 = vpop.f32.mrb[5].mxu1 }
 0x4c9   : > { %6769 = vst [vmem:[%s10363_s29 + $0xb8] sm:$0xff] %v6727_v20  ;;  %v7984_v49 = vadd.f32 %v7983_v62, %v7982_v33  ;;  %v7985_v46 = vpop.f32.mrb[6].mxu1 }
 0x4ca   : > { %v7986_v15 = vpop.f32.mrb[7].mxu1 }
 0x4cb   : > { %v7987_v23 = vadd.f32 %v7986_v15, %v7985_v46  ;;  %v6635_v13 = vadd.f32 %v7984_v49, %v10918_v14 }
 0x4cd   : > { %v6732_v42 = vadd.f32 %v10952_v48, %v6635_v13  ;;  %v6638_v59 = vadd.f32 %v7987_v23, %v10923_v32 }
 0x4cf   : > { %6770 = vst [vmem:[%s10363_s29 + $0xd0] sm:$0xff] %v6732_v42  ;;  %v6735_v18 = vadd.f32 %v10959_v41, %v6638_v59  ;;  %v7988_v40 = vpop.f32.mrb[8].mxu1 }
 0x4d0   : > { %v7989_v25 = vpop.f32.mrb[9].mxu1 }
 0x4d1   : > { %6771 = vst [vmem:[%s10363_s29 + $0xe8] sm:$0xff] %v6735_v18  ;;  %v7990_v16 = vadd.f32 %v7989_v25, %v7988_v40  ;;  %v7991_v56 = vpop.f32.mrb[10].mxu1 }
 0x4d2   : > { %v7992_v53 = vpop.f32.mrb[11].mxu1 }
 0x4d3   : > { %v6643_v47 = vadd.f32 %v7990_v16, %v10932_v61  ;;  %v7993_v58 = vadd.f32 %v7992_v53, %v7991_v56 }
 0x4d5   : > { %v6740_v14 = vadd.f32 %v10947_v34, %v6643_v47  ;;  %v6646_v32 = vadd.f32 %v7993_v58, %v10939_v54 }
 0x4d7   : > { %6772 = vst [vmem:[%s10363_s29 + $0x100] sm:$0xff] %v6740_v14  ;;  %v6743_v48 = vadd.f32 %v10954_v43, %v6646_v32  ;;  %v7994_v41 = vpop.f32.mrb[12].mxu1 }
 0x4d8   : > { %v7995_v12 = vpop.f32.mrb[13].mxu1 }
 0x4d9   : > { %6773 = vst [vmem:[%s10363_s29 + $0x118] sm:$0xff] %v6743_v48  ;;  %v7996_v37 = vadd.f32 %v7995_v12, %v7994_v41  ;;  %v7997_v2 = vpop.f32.mrb[14].mxu1 }
 0x4da   : > { %v7998_v5 = vpop.f32.mrb[15].mxu1 }
 0x4db   : > { %v7999_v31 = vadd.f32 %v7998_v5, %v7997_v2  ;;  %v6651_v63 = vadd.f32 %v7996_v37, %v10950_v51 }
 0x4dd   : > { %v6748_v61 = vadd.f32 %v10970_v26, %v6651_v63  ;;  %v6654_v54 = vadd.f32 %v7999_v31, %v10957_v35 }
 0x4df   : > { %6774 = vst [vmem:[%s10363_s29 + $0x130] sm:$0xff] %v6748_v61  ;;  %v6751_v34 = vadd.f32 %v10976_v57, %v6654_v54  ;;  %v8000_v43 = vpop.f32.mrb[16].mxu1 }
 0x4e0   : > { %v8001_v9 = vpop.f32.mrb[17].mxu1 }
 0x4e1   : > { %6775 = vst [vmem:[%s10363_s29 + $0x148] sm:$0xff] %v6751_v34  ;;  %v8002_v60 = vadd.f32 %v8001_v9, %v8000_v43  ;;  %v8003_v30 = vpop.f32.mrb[18].mxu1 }
 0x4e2   : > { %v8004_v51 = vpop.f32.mrb[19].mxu1 }
 0x4e3   : > { %v6659_v19 = vadd.f32 %v8002_v60, %v10968_v0  ;;  %v8005_v21 = vadd.f32 %v8004_v51, %v8003_v30 }
 0x4e5   : > { %v6756_v35 = vadd.f32 %v10965_v3, %v6659_v19  ;;  %v6662_v26 = vadd.f32 %v8005_v21, %v10974_v11 }
 0x4e7   : > { %6776 = vst [vmem:[%s10363_s29 + $0x160] sm:$0xff] %v6756_v35  ;;  %v6759_v0 = vadd.f32 %v10972_v39, %v6662_v26 }
 0x4e9   : > { %6777 = vst [vmem:[%s10363_s29 + $0x178] sm:$0xff] %v6759_v0 }
 0x4ea   : > { %8983 = shalt.err (!%p8980_p12)
}
 0x4eb   : > { %s8984_s17 = scalar_lea.hbm %s11027_s30, 6144  ;;  %s8988_s12 = scalar_lea.hbm %s11152_s14, 24576 }
 0x4ec   : > { %p8985_p2 = scmp.ne.s32.totalorder %s11027_s30, %s8984_s17  ;;  %p8989_p0 = scmp.lt.u32.totalorder %s11027_s30, %s11152_s14 }
 0x4ed   : > { %p8990_p4 = scmp.lt.u32.totalorder %s8988_s12, %s8984_s17  ;;  %p8992_p3 = scmp.lt.u32.totalorder %s8984_s17, %s11027_s30 }
 0x4ee   : > { %p8986_p6 = pnand %p8985_p2, %p11153_p13 }
 0x4ef   : > { %p8991_p1 = por %p8990_p4, %p8989_p0 }
 0x4f0   : > { %p8987_p10 = pneg %p8986_p6 }
 0x4f1   : > { %p8993_p7 = por %p8992_p3, %p8991_p1 }
 0x4f3   : > { %p8994_p9 = pnand %p8993_p7, %p8987_p10 }
 0x4f5   : > { %8997 = shalt.err (!%p8994_p9)
}
 0x4f6   : > { %s9109_s5 = smov 384   ;;  %s9110_s24 = smov 24  }
 0x4f7   : > { %8266 = dma.vmem_to_hbm [thread:$0]  (%p11153_p13), %s11029_s25, 6144, %s11027_s30, %s11036_s26, %s9109_s5, %s9109_s5, %s9110_s24  }
 0x4f8 PF: > { %s11154_s21 = sld [smem:[#allocation14_spill]]  ;;  %s11155_s10 = sld [smem:[#allocation17_spill]] }
 0x4f9   : > { %p8288_p11 = scmp.ge.s32.totalorder %s9096_s28, 2 }
 0x4fe   : > { %s6810_s6 = sand.u32 1, %s11154_s21   ;;  %p11156_p5 = scmp.ne.s32.totalorder %s11155_s10, 0 }
 0x4ff   : > { %s6811_s8 = scalar_lea.sflag [#allocation6], %s6810_s6 }
 0x500   : > { %p8280_p8 = pnand %p8288_p11, %p11156_p5 }
 0x502   : > { %9051 = dma.done.wait (!%p8280_p8), %s6811_s8, 6144  }
 0x503   : > { %9053 = vsyncadd (!%p8280_p8), %s6811_s8, 4294961152  ;;  %s22_s28 = sadd.s32 1, %s9096_s28   ;;  %s11157_s1 = smov %s9314_s18 }
 0x504   : > { %p19_p12 = scmp.ge.s32.totalorder %s22_s28, 6   ;;  %s11158_s24 = sld [smem:[#allocation15_spill]] }
 0x505   : > { %s11159_s26 = sld [smem:[#allocation18_spill]]  ;;  %s11160_s18 = smov %s9060_s19 }
 0x506   : > { %s11161_s19 = smov %s9064_s20  ;;  %s11162_s20 = smov %s9319_s3 }
 0x507   : > { %s11163_s21 = smov %s9072_s22  ;;  %s11164_s22 = smov %s9076_s23 }
 0x508   : > { %s11165_s23 = smov %s11157_s1  ;;  %s11166_s25 = smov %s9092_s27 }
 0x509   : > { %s11167_s27 = smov %s11173_s7  ;;  %21 = sbr.rel (!%p19_p12) target bundleno = 14 (0xe), region = 107 }
 0x510   :  { %6816 = vsyncpa [#allocation5], 1 }
 0x511   :  { %6818 = vsyncpa [#allocation5 + $0x1], 1 }
 0x512   :  { %6819 = vsyncpa [#allocation8], 1 }
 0x513   :  { %6820 = vsyncpa [#allocation6], 1 }
 0x514   :  { %6822 = vsyncpa [#allocation6 + $0x1], 1 }

</bundles_post_ra>
